<compile_context>
chip_gen: v7x
topology: tpu7x:2x2x1
jax: 0.10.0
libtpu: 0.0.40
codegen_flags: <defaults>
</compile_context>

<pallas_src>
import functools

import jax
import jax.numpy as jnp
from jax import lax
from jax.experimental import pallas as pl
from jax.experimental.pallas import tpu as pltpu

HID = 64
OUT = 1
_HIGH = lax.Precision.HIGHEST


def _round_up(x, m):
    return ((x + m - 1) // m) * m


def _permute_gates(x):
    """Reorder the trailing 4*HID axis from PyTorch (i, f, g, o) to (i, f, o, g)."""
    shp = x.shape
    x4 = x.reshape(shp[:-1] + (4, HID))
    return x4[..., (0, 1, 3, 2), :].reshape(shp)


def _pick_row_tile(n_pad):
    """n_pad is a multiple of 128.  Pick a lane-dense row tile (multiple of 128)
    that divides n_pad, keeps >= 2 grid steps when possible (v7x dual TC), and
    caps the tile at 512 lanes."""
    if n_pad <= 128:
        return n_pad
    best = 128
    t = 128
    while t <= min(n_pad // 2, 512):
        if n_pad % t == 0:
            best = t
        t += 128
    return best


def _vmem_limit_bytes(pred_len, feat_dim, tile):
    """Derive the scoped-VMEM limit from the actual per-tile footprint and clamp
    to 32 MiB so it is safe on v7x (64 MiB physical VMEM)."""
    f_sub = _round_up(max(feat_dim, 1), 8)
    blocks = 2 * pred_len * f_sub * tile * 4            # feat in (double buffered)
    blocks += 2 * pred_len * 8 * tile * 4               # out (double buffered, 1 -> 8 sublanes)
    blocks += 4 * HID * (HID + 4 * 128) * 4             # folded weights / bias columns (padded)
    slack = 16 * 1024 * 1024                            # h/c/gates temporaries, unroll, scratch
    return min(32 * 1024 * 1024, blocks + slack)


def _lstm_kernel(feat_ref, w_hh_ref, b_mat_ref, b_gate_ref, a_col_ref,
                 seed_ref, w_out_ref, out_ref, *, pred_len, feat_dim, unroll):
    """Full LSTM recurrence for one row tile, in "transposed" layout.

    Gate/hidden channels sit in sublanes, rows (batch*city) in lanes:
      feat_ref  : (pred_len, F, TN)  raw per-step features
      w_hh_ref  : (4H, H)            effective recurrent weight (xn feedback
                                     folded in), gate rows ordered (i, f, o, g),
                                     bf16 or f32 (MXU operand dtype)
      b_mat_ref : (4H, F)            feature -> gate projection
      b_gate_ref: (4H, 1)            folded gate bias
      a_col_ref : (4H, 1)            xn -> gate projection (step-0 seed path)
      seed_ref  : (1, TN)            xn_0 - b_out per row
      w_out_ref : (H, 1)             fc_out weight
      out_ref   : (pred_len, 1, TN)  fc_out(h_t) - b_out  (lane dense)
    """
    w_hh_T = w_hh_ref[...]                                     # (4H, H)
    b_mat_T = b_mat_ref[...]                                   # (4H, F)
    tn = out_ref.shape[2]
    mxu_dt = w_hh_T.dtype

    # Hoisted broadcasts (JAX does not CSE broadcast_in_dim inside the loop).
    b_gate_b = jnp.broadcast_to(b_gate_ref[...], (4 * HID, tn))
    b_cols = [jnp.broadcast_to(b_mat_T[:, f:f + 1], (4 * HID, tn))
              for f in range(feat_dim)]
    w_out_b = jnp.broadcast_to(w_out_ref[...], (HID, tn))
    seed_gates = a_col_ref[...] * seed_ref[...]                # (4H, TN)

    def gate_in(t):
        # Feature -> gate projection as F broadcast-FMAs on the VPU; this is
        # off the h-dependency chain so it overlaps the previous MXU step.
        ft = feat_ref[t]                                       # (F, TN)
        fg = b_gate_b
        for f in range(feat_dim):
            fg = fg + b_cols[f] * ft[f:f + 1, :]
        return fg                                              # (4H, TN) f32

    def cell(gates, c):
        sig = jax.nn.sigmoid(gates[:3 * HID])                  # i | f | o
        i_g = sig[:HID]
        f_g = sig[HID:2 * HID]
        o_g = sig[2 * HID:]
        g_g = jnp.tanh(gates[3 * HID:])
        c_new = f_g * c + i_g * g_g
        h_new = o_g * jnp.tanh(c_new)
        return h_new, c_new

    def emit(t, h):
        # Fused fc_out (bias added outside): pred[t, n] = sum_k w_out[k]*h[k, n]
        out_ref[t] = jnp.sum(w_out_b * h, axis=0, keepdims=True)   # (1, TN)

    # Step 0: h = c = 0, so no recurrent matmul; xn seed from pm25_hist[:, -1].
    h, c = cell(gate_in(0) + seed_gates, jnp.zeros((HID, tn), jnp.float32))
    emit(0, h)

    def step(t, carry):
        h, c = carry
        gates = jnp.dot(w_hh_T, h.astype(mxu_dt),
                        preferred_element_type=jnp.float32) + gate_in(t)
        h, c = cell(gates, c)
        emit(t, h)
        return h, c

    lax.fori_loop(1, pred_len, step, (h, c), unroll=unroll)


@functools.partial(jax.jit, static_argnames=("hist_len", "pred_len", "mxu_bf16"))
def lstm_forward(pm25_hist, feature, params, *, hist_len, pred_len, mxu_bf16=True):
    batch, _, city, _ = pm25_hist.shape
    feat_dim = feature.shape[-1]                               # in_dim - 1
    n_rows = batch * city

    (w_in, b_in, w_ih, b_ih, w_hh, b_hh, w_out, b_out) = params

    # ---- one-time weight folding (outside the recurrence) -----------------
    # PyTorch Linear / LSTMCell weights are (out, in); transpose to (in, out)
    # and reorder gate columns to [i, f, o, g].
    w_ih_t = _permute_gates(jnp.transpose(w_ih))               # (HID, 4H)
    w_hh_t = _permute_gates(jnp.transpose(w_hh))               # (HID, 4H)
    b_lstm = _permute_gates(b_ih + b_hh).reshape(1, 4 * HID)

    w_in_t = jnp.transpose(w_in)                               # (in_dim, HID)
    w_in_x = w_in_t[:OUT]                                      # (1, HID)   xn path
    w_in_f = w_in_t[OUT:]                                      # (F, HID)   feature path
    w_out_col = jnp.transpose(w_out)                           # (HID, 1)
    b_out_r = b_out.reshape(1, OUT)

    a_mat = jnp.dot(w_in_x, w_ih_t, precision=_HIGH)           # (1, 4H)
    b_mat = jnp.dot(w_in_f, w_ih_t, precision=_HIGH)           # (F, 4H)
    w_hh_eff = w_hh_t + jnp.dot(w_out_col, a_mat, precision=_HIGH)   # (HID, 4H)
    b_gates = (jnp.dot(b_in.reshape(1, HID), w_ih_t, precision=_HIGH)
               + b_lstm
               + jnp.dot(b_out_r, a_mat, precision=_HIGH))     # (1, 4H)

    # Transposed ("channels in sublanes, rows in lanes") kernel operands.
    mxu_dtype = jnp.bfloat16 if mxu_bf16 else jnp.float32
    w_hh_eff_T = jnp.transpose(w_hh_eff).astype(mxu_dtype)     # (4H, HID)
    b_mat_T = jnp.transpose(b_mat)                             # (4H, F)
    b_gate_col = jnp.transpose(b_gates)                        # (4H, 1)
    a_col = jnp.transpose(a_mat)                               # (4H, 1)

    # ---- row padding / tiling (lane-dense, >= 2 grid steps) ---------------
    n_pad = max(256, _round_up(n_rows, 128))
    tile = _pick_row_tile(n_pad)

    feat = feature[:, hist_len:hist_len + pred_len]            # (B, P, C, F)
    feat_T = jnp.transpose(feat, (1, 3, 0, 2)).reshape(pred_len, feat_dim, n_rows)
    feat_T = jnp.pad(feat_T, ((0, 0), (0, 0), (0, n_pad - n_rows)))

    xn0 = pm25_hist[:, -1].reshape(1, n_rows)                  # (1, N)
    seed_row = jnp.pad(xn0 - b_out, ((0, 0), (0, n_pad - n_rows)))   # (1, N_pad)

    unroll = max(1, min(pred_len - 1, 4))
    kernel = functools.partial(_lstm_kernel, pred_len=pred_len,
                               feat_dim=feat_dim, unroll=unroll)

    out = pl.pallas_call(
        kernel,
        out_shape=jax.ShapeDtypeStruct((pred_len, 1, n_pad), jnp.float32),
        grid=(n_pad // tile,),
        in_specs=[
            pl.BlockSpec((pred_len, feat_dim, tile), lambda n: (0, 0, n)),
            pl.BlockSpec((4 * HID, HID), lambda n: (0, 0)),
            pl.BlockSpec((4 * HID, feat_dim), lambda n: (0, 0)),
            pl.BlockSpec((4 * HID, 1), lambda n: (0, 0)),
            pl.BlockSpec((4 * HID, 1), lambda n: (0, 0)),
            pl.BlockSpec((1, tile), lambda n: (0, n)),
            pl.BlockSpec((HID, 1), lambda n: (0, 0)),
        ],
        out_specs=pl.BlockSpec((pred_len, 1, tile), lambda n: (0, 0, n)),
        compiler_params=pltpu.CompilerParams(
            dimension_semantics=("parallel",),
            vmem_limit_bytes=_vmem_limit_bytes(pred_len, feat_dim, tile)),
    )(feat_T, w_hh_eff_T, b_mat_T, b_gate_col, a_col, seed_row, w_out_col)

    # fc_out bias + back to the torch output layout (B, P, C, 1).
    pred = out[:, 0, :n_rows] + b_out                          # (P, N)
    pred = pred.reshape(pred_len, batch, city, OUT)
    return jnp.transpose(pred, (1, 0, 2, 3))


def _reference(pm25_hist, feature, params, *, hist_len, pred_len):
    """Pure-JAX replica of the PyTorch forward for correctness checking."""
    (w_in, b_in, w_ih, b_ih, w_hh, b_hh, w_out, b_out) = params
    batch, _, city, _ = pm25_hist.shape
    n_rows = batch * city
    h = jnp.zeros((n_rows, HID), jnp.float32)
    c = jnp.zeros((n_rows, HID), jnp.float32)
    xn = pm25_hist[:, -1]                                      # (B, C, 1)
    preds = []
    for i in range(pred_len):
        x = jnp.concatenate([xn, feature[:, hist_len + i]], axis=-1)   # (B, C, in_dim)
        x = x @ w_in.T + b_in                                          # (B, C, HID)
        x2 = x.reshape(n_rows, HID)
        gates = x2 @ w_ih.T + b_ih + h @ w_hh.T + b_hh
        i_g = jax.nn.sigmoid(gates[:, 0 * HID:1 * HID])
        f_g = jax.nn.sigmoid(gates[:, 1 * HID:2 * HID])
        g_g = jnp.tanh(gates[:, 2 * HID:3 * HID])
        o_g = jax.nn.sigmoid(gates[:, 3 * HID:4 * HID])
        c = f_g * c + i_g * g_g
        h = o_g * jnp.tanh(c)
        xn = (h.reshape(batch, city, HID) @ w_out.T) + b_out           # (B, C, 1)
        preds.append(xn)
    return jnp.stack(preds, axis=1)


if __name__ == "__main__":
    # small, deterministic config
    batch, city_num = 2, 16
    hist_len, pred_len = 8, 4
    in_dim = 4                      # cat([pm25 (1), feature (in_dim-1)])
    F = in_dim - 1
    T = hist_len + pred_len

    key = jax.random.PRNGKey(0)
    ks = jax.random.split(key, 10)
    scale = 0.1
    params = (
        scale * jax.random.normal(ks[0], (HID, in_dim), jnp.float32),     # fc_in.weight
        scale * jax.random.normal(ks[1], (HID,), jnp.float32),            # fc_in.bias
        scale * jax.random.normal(ks[2], (4 * HID, HID), jnp.float32),    # lstm W_ih
        scale * jax.random.normal(ks[3], (4 * HID,), jnp.float32),        # lstm b_ih
        scale * jax.random.normal(ks[4], (4 * HID, HID), jnp.float32),    # lstm W_hh
        scale * jax.random.normal(ks[5], (4 * HID,), jnp.float32),        # lstm b_hh
        scale * jax.random.normal(ks[6], (OUT, HID), jnp.float32),        # fc_out.weight
        scale * jax.random.normal(ks[7], (OUT,), jnp.float32),            # fc_out.bias
    )

    pm25_hist = jax.random.normal(ks[8], (batch, hist_len, city_num, 1), jnp.float32)
    feature = jax.random.normal(ks[9], (batch, T, city_num, F), jnp.float32)

    ref = _reference(pm25_hist, feature, params,
                     hist_len=hist_len, pred_len=pred_len)

    # fp32 MXU path: exact forward semantics (tight, reassociation-tolerant check).
    out_f32 = lstm_forward(pm25_hist, feature, params,
                           hist_len=hist_len, pred_len=pred_len, mxu_bf16=False)
    out_f32 = jax.block_until_ready(out_f32)
    assert out_f32.shape == (batch, pred_len, city_num, 1), out_f32.shape
    assert jnp.allclose(out_f32, ref, atol=5e-4, rtol=5e-4), \
        float(jnp.max(jnp.abs(out_f32 - ref)))

    # bf16 MXU-operand path (default): rounding compounds over the serial
    # recurrence, so the tolerance against the fp32 reference is looser.
    out_bf16 = lstm_forward(pm25_hist, feature, params,
                            hist_len=hist_len, pred_len=pred_len, mxu_bf16=True)
    out_bf16 = jax.block_until_ready(out_bf16)
    assert out_bf16.shape == (batch, pred_len, city_num, 1), out_bf16.shape
    assert jnp.allclose(out_bf16, ref, atol=2e-2, rtol=2e-2), \
        float(jnp.max(jnp.abs(out_bf16 - ref)))

    print("KERNEL_OK")
</pallas_src>

<mosaic_0001>
module attributes {stable_mosaic.version = 11 : i64} {
  func.func @_lstm_kernel(%arg0: i32, %arg1: memref<4x3x128xf32, #tpu.memory_space<vmem>>, %arg2: memref<256x64xf32, #tpu.memory_space<vmem>>, %arg3: memref<256x3xf32, #tpu.memory_space<vmem>>, %arg4: memref<256x1xf32, #tpu.memory_space<vmem>>, %arg5: memref<256x1xf32, #tpu.memory_space<vmem>>, %arg6: memref<1x128xf32, #tpu.memory_space<vmem>>, %arg7: memref<64x1xf32, #tpu.memory_space<vmem>>, %arg8: memref<4x1x128xf32, #tpu.memory_space<vmem>>) attributes {dimension_semantics = [#tpu.dimension_semantics<parallel>], iteration_bounds = array<i64: 2>, scalar_prefetch = 0 : i64, scratch_operands = 0 : i64, tpu.core_type = #tpu.core_type<tc>, window_params = [{transform_indices = @transform_0, window_bounds = array<i64: 4, 3, 128>}, {pipeline_mode = #tpu.pipeline_mode<synchronous>, transform_indices = @transform_1, window_bounds = array<i64: 256, 64>}, {pipeline_mode = #tpu.pipeline_mode<synchronous>, transform_indices = @transform_2, window_bounds = array<i64: 256, 3>}, {pipeline_mode = #tpu.pipeline_mode<synchronous>, transform_indices = @transform_3, window_bounds = array<i64: 256, 1>}, {pipeline_mode = #tpu.pipeline_mode<synchronous>, transform_indices = @transform_4, window_bounds = array<i64: 256, 1>}, {transform_indices = @transform_5, window_bounds = array<i64: 1, 128>}, {pipeline_mode = #tpu.pipeline_mode<synchronous>, transform_indices = @transform_6, window_bounds = array<i64: 64, 1>}, {transform_indices = @transform_7, window_bounds = array<i64: 4, 1, 128>}]} {
    %c0 = arith.constant 0 : index
    %c0_0 = arith.constant 0 : index
    %0 = vector.load %arg2[%c0, %c0_0] : memref<256x64xf32, #tpu.memory_space<vmem>>, vector<256x64xf32>
    %c0_1 = arith.constant 0 : index
    %c0_2 = arith.constant 0 : index
    %1 = vector.load %arg3[%c0_1, %c0_2] : memref<256x3xf32, #tpu.memory_space<vmem>>, vector<256x3xf32>
    %c0_3 = arith.constant 0 : index
    %c0_4 = arith.constant 0 : index
    %2 = vector.load %arg4[%c0_3, %c0_4] : memref<256x1xf32, #tpu.memory_space<vmem>>, vector<256x1xf32>
    %3 = vector.shape_cast %2 : vector<256x1xf32> to vector<256x1xf32>
    %4 = vector.broadcast %3 : vector<256x1xf32> to vector<256x128xf32>
    %5 = vector.extract_strided_slice %1 {offsets = [0, 0], sizes = [256, 1], strides = [1, 1]} : vector<256x3xf32> to vector<256x1xf32>
    %6 = vector.shape_cast %5 : vector<256x1xf32> to vector<256x1xf32>
    %7 = vector.broadcast %6 : vector<256x1xf32> to vector<256x128xf32>
    %8 = vector.extract_strided_slice %1 {offsets = [0, 1], sizes = [256, 1], strides = [1, 1]} : vector<256x3xf32> to vector<256x1xf32>
    %9 = vector.shape_cast %8 : vector<256x1xf32> to vector<256x1xf32>
    %10 = vector.broadcast %9 : vector<256x1xf32> to vector<256x128xf32>
    %11 = vector.extract_strided_slice %1 {offsets = [0, 2], sizes = [256, 1], strides = [1, 1]} : vector<256x3xf32> to vector<256x1xf32>
    %12 = vector.shape_cast %11 : vector<256x1xf32> to vector<256x1xf32>
    %13 = vector.broadcast %12 : vector<256x1xf32> to vector<256x128xf32>
    %c0_5 = arith.constant 0 : index
    %c0_6 = arith.constant 0 : index
    %14 = vector.load %arg7[%c0_5, %c0_6] : memref<64x1xf32, #tpu.memory_space<vmem>>, vector<64x1xf32>
    %15 = vector.shape_cast %14 : vector<64x1xf32> to vector<64x1xf32>
    %16 = vector.broadcast %15 : vector<64x1xf32> to vector<64x128xf32>
    %c0_7 = arith.constant 0 : index
    %c0_8 = arith.constant 0 : index
    %17 = vector.load %arg5[%c0_7, %c0_8] : memref<256x1xf32, #tpu.memory_space<vmem>>, vector<256x1xf32>
    %c0_9 = arith.constant 0 : index
    %c0_10 = arith.constant 0 : index
    %18 = vector.load %arg6[%c0_9, %c0_10] : memref<1x128xf32, #tpu.memory_space<vmem>>, vector<1x128xf32>
    %19 = vector.broadcast %17 : vector<256x1xf32> to vector<256x128xf32>
    %20 = vector.broadcast %18 : vector<1x128xf32> to vector<256x128xf32>
    %21 = arith.mulf %19, %20 : vector<256x128xf32>
    %c0_11 = arith.constant 0 : index
    %c0_12 = arith.constant 0 : index
    %c0_13 = arith.constant 0 : index
    %22 = vector.load %arg1[%c0_11, %c0_12, %c0_13] : memref<4x3x128xf32, #tpu.memory_space<vmem>>, vector<1x3x128xf32>
    %23 = vector.shape_cast %22 : vector<1x3x128xf32> to vector<3x128xf32>
    %24 = vector.extract_strided_slice %23 {offsets = [0, 0], sizes = [1, 128], strides = [1, 1]} : vector<3x128xf32> to vector<1x128xf32>
    %25 = vector.broadcast %24 : vector<1x128xf32> to vector<256x128xf32>
    %26 = arith.mulf %7, %25 : vector<256x128xf32>
    %27 = arith.addf %4, %26 : vector<256x128xf32>
    %28 = vector.extract_strided_slice %23 {offsets = [1, 0], sizes = [1, 128], strides = [1, 1]} : vector<3x128xf32> to vector<1x128xf32>
    %29 = vector.broadcast %28 : vector<1x128xf32> to vector<256x128xf32>
    %30 = arith.mulf %10, %29 : vector<256x128xf32>
    %31 = arith.addf %27, %30 : vector<256x128xf32>
    %32 = vector.extract_strided_slice %23 {offsets = [2, 0], sizes = [1, 128], strides = [1, 1]} : vector<3x128xf32> to vector<1x128xf32>
    %33 = vector.broadcast %32 : vector<1x128xf32> to vector<256x128xf32>
    %34 = arith.mulf %13, %33 : vector<256x128xf32>
    %35 = arith.addf %31, %34 : vector<256x128xf32>
    %36 = arith.addf %35, %21 : vector<256x128xf32>
    %cst = arith.constant 0.000000e+00 : f32
    %37 = vector.broadcast %cst : f32 to vector<64x128xf32>
    %38 = vector.extract_strided_slice %36 {offsets = [0, 0], sizes = [192, 128], strides = [1, 1]} : vector<256x128xf32> to vector<192x128xf32>
    %39 = arith.negf %38 : vector<192x128xf32>
    %40 = math.exp %39 : vector<192x128xf32>
    %cst_14 = arith.constant 1.000000e+00 : f32
    %41 = vector.broadcast %cst_14 : f32 to vector<192x128xf32>
    %42 = arith.addf %41, %40 : vector<192x128xf32>
    %43 = arith.divf %41, %42 : vector<192x128xf32>
    %44 = vector.extract_strided_slice %43 {offsets = [0, 0], sizes = [64, 128], strides = [1, 1]} : vector<192x128xf32> to vector<64x128xf32>
    %45 = vector.extract_strided_slice %43 {offsets = [64, 0], sizes = [64, 128], strides = [1, 1]} : vector<192x128xf32> to vector<64x128xf32>
    %46 = vector.extract_strided_slice %43 {offsets = [128, 0], sizes = [64, 128], strides = [1, 1]} : vector<192x128xf32> to vector<64x128xf32>
    %47 = vector.extract_strided_slice %36 {offsets = [192, 0], sizes = [64, 128], strides = [1, 1]} : vector<256x128xf32> to vector<64x128xf32>
    %48 = math.tanh %47 : vector<64x128xf32>
    %49 = arith.mulf %45, %37 : vector<64x128xf32>
    %50 = arith.mulf %44, %48 : vector<64x128xf32>
    %51 = arith.addf %49, %50 : vector<64x128xf32>
    %52 = math.tanh %51 : vector<64x128xf32>
    %53 = arith.mulf %46, %52 : vector<64x128xf32>
    %54 = arith.mulf %16, %53 : vector<64x128xf32>
    %cst_15 = arith.constant dense<0.000000e+00> : vector<128xf32>
    %55 = vector.multi_reduction <add>, %54, %cst_15 [0] : vector<64x128xf32> to vector<128xf32>
    %56 = vector.shape_cast %55 : vector<128xf32> to vector<1x128xf32>
    %c0_16 = arith.constant 0 : index
    %c0_17 = arith.constant 0 : index
    %c0_18 = arith.constant 0 : index
    %57 = vector.load %arg8[%c0_16, %c0_17, %c0_18] : memref<4x1x128xf32, #tpu.memory_space<vmem>>, vector<1x1x128xf32>
    %58 = vector.shape_cast %57 : vector<1x1x128xf32> to vector<1x128xf32>
    %59 = vector.shape_cast %56 : vector<1x128xf32> to vector<1x1x128xf32>
    tpu.vector_store %arg8[%c0_16, %c0_17, %c0_18], %59 {strides = array<i32>} : memref<4x1x128xf32, #tpu.memory_space<vmem>>, vector<1x1x128xf32>,
    %c1_i32 = arith.constant 1 : i32
    %cst_19 = arith.constant dense<0.000000e+00> : vector<256x128xf32>
    %60 = tpu.matmul %0, %53, %cst_19 {dimension_numbers = #tpu.dot_dimension_numbers<[1], [0], [0], [1], [0, 0, 1, 1], [], []>} : vector<256x64xf32>, vector<64x128xf32>, vector<256x128xf32> -> vector<256x128xf32>
    %61 = arith.index_cast %c1_i32 : i32 to index
    %c0_20 = arith.constant 0 : index
    %c0_21 = arith.constant 0 : index
    %62 = vector.load %arg1[%61, %c0_20, %c0_21] : memref<4x3x128xf32, #tpu.memory_space<vmem>>, vector<1x3x128xf32>
    %63 = vector.shape_cast %62 : vector<1x3x128xf32> to vector<3x128xf32>
    %64 = vector.extract_strided_slice %63 {offsets = [0, 0], sizes = [1, 128], strides = [1, 1]} : vector<3x128xf32> to vector<1x128xf32>
    %65 = vector.broadcast %64 : vector<1x128xf32> to vector<256x128xf32>
    %66 = arith.mulf %7, %65 : vector<256x128xf32>
    %67 = arith.addf %4, %66 : vector<256x128xf32>
    %68 = vector.extract_strided_slice %63 {offsets = [1, 0], sizes = [1, 128], strides = [1, 1]} : vector<3x128xf32> to vector<1x128xf32>
    %69 = vector.broadcast %68 : vector<1x128xf32> to vector<256x128xf32>
    %70 = arith.mulf %10, %69 : vector<256x128xf32>
    %71 = arith.addf %67, %70 : vector<256x128xf32>
    %72 = vector.extract_strided_slice %63 {offsets = [2, 0], sizes = [1, 128], strides = [1, 1]} : vector<3x128xf32> to vector<1x128xf32>
    %73 = vector.broadcast %72 : vector<1x128xf32> to vector<256x128xf32>
    %74 = arith.mulf %13, %73 : vector<256x128xf32>
    %75 = arith.addf %71, %74 : vector<256x128xf32>
    %76 = arith.addf %60, %75 : vector<256x128xf32>
    %77 = vector.extract_strided_slice %76 {offsets = [0, 0], sizes = [192, 128], strides = [1, 1]} : vector<256x128xf32> to vector<192x128xf32>
    %78 = arith.negf %77 : vector<192x128xf32>
    %79 = math.exp %78 : vector<192x128xf32>
    %cst_22 = arith.constant 1.000000e+00 : f32
    %80 = vector.broadcast %cst_22 : f32 to vector<192x128xf32>
    %81 = arith.addf %80, %79 : vector<192x128xf32>
    %82 = arith.divf %80, %81 : vector<192x128xf32>
    %83 = vector.extract_strided_slice %82 {offsets = [0, 0], sizes = [64, 128], strides = [1, 1]} : vector<192x128xf32> to vector<64x128xf32>
    %84 = vector.extract_strided_slice %82 {offsets = [64, 0], sizes = [64, 128], strides = [1, 1]} : vector<192x128xf32> to vector<64x128xf32>
    %85 = vector.extract_strided_slice %82 {offsets = [128, 0], sizes = [64, 128], strides = [1, 1]} : vector<192x128xf32> to vector<64x128xf32>
    %86 = vector.extract_strided_slice %76 {offsets = [192, 0], sizes = [64, 128], strides = [1, 1]} : vector<256x128xf32> to vector<64x128xf32>
    %87 = math.tanh %86 : vector<64x128xf32>
    %88 = arith.mulf %84, %51 : vector<64x128xf32>
    %89 = arith.mulf %83, %87 : vector<64x128xf32>
    %90 = arith.addf %88, %89 : vector<64x128xf32>
    %91 = math.tanh %90 : vector<64x128xf32>
    %92 = arith.mulf %85, %91 : vector<64x128xf32>
    %93 = arith.mulf %16, %92 : vector<64x128xf32>
    %cst_23 = arith.constant dense<0.000000e+00> : vector<128xf32>
    %94 = vector.multi_reduction <add>, %93, %cst_23 [0] : vector<64x128xf32> to vector<128xf32>
    %95 = vector.shape_cast %94 : vector<128xf32> to vector<1x128xf32>
    %96 = arith.index_cast %c1_i32 : i32 to index
    %c0_24 = arith.constant 0 : index
    %c0_25 = arith.constant 0 : index
    %97 = vector.load %arg8[%96, %c0_24, %c0_25] : memref<4x1x128xf32, #tpu.memory_space<vmem>>, vector<1x1x128xf32>
    %98 = vector.shape_cast %97 : vector<1x1x128xf32> to vector<1x128xf32>
    %99 = vector.shape_cast %95 : vector<1x128xf32> to vector<1x1x128xf32>
    tpu.vector_store %arg8[%96, %c0_24, %c0_25], %99 {strides = array<i32>} : memref<4x1x128xf32, #tpu.memory_space<vmem>>, vector<1x1x128xf32>,
    %c2_i32 = arith.constant 2 : i32
    %cst_26 = arith.constant dense<0.000000e+00> : vector<256x128xf32>
    %100 = tpu.matmul %0, %92, %cst_26 {dimension_numbers = #tpu.dot_dimension_numbers<[1], [0], [0], [1], [0, 0, 1, 1], [], []>} : vector<256x64xf32>, vector<64x128xf32>, vector<256x128xf32> -> vector<256x128xf32>
    %101 = arith.index_cast %c2_i32 : i32 to index
    %c0_27 = arith.constant 0 : index
    %c0_28 = arith.constant 0 : index
    %102 = vector.load %arg1[%101, %c0_27, %c0_28] : memref<4x3x128xf32, #tpu.memory_space<vmem>>, vector<1x3x128xf32>
    %103 = vector.shape_cast %102 : vector<1x3x128xf32> to vector<3x128xf32>
    %104 = vector.extract_strided_slice %103 {offsets = [0, 0], sizes = [1, 128], strides = [1, 1]} : vector<3x128xf32> to vector<1x128xf32>
    %105 = vector.broadcast %104 : vector<1x128xf32> to vector<256x128xf32>
    %106 = arith.mulf %7, %105 : vector<256x128xf32>
    %107 = arith.addf %4, %106 : vector<256x128xf32>
    %108 = vector.extract_strided_slice %103 {offsets = [1, 0], sizes = [1, 128], strides = [1, 1]} : vector<3x128xf32> to vector<1x128xf32>
    %109 = vector.broadcast %108 : vector<1x128xf32> to vector<256x128xf32>
    %110 = arith.mulf %10, %109 : vector<256x128xf32>
    %111 = arith.addf %107, %110 : vector<256x128xf32>
    %112 = vector.extract_strided_slice %103 {offsets = [2, 0], sizes = [1, 128], strides = [1, 1]} : vector<3x128xf32> to vector<1x128xf32>
    %113 = vector.broadcast %112 : vector<1x128xf32> to vector<256x128xf32>
    %114 = arith.mulf %13, %113 : vector<256x128xf32>
    %115 = arith.addf %111, %114 : vector<256x128xf32>
    %116 = arith.addf %100, %115 : vector<256x128xf32>
    %117 = vector.extract_strided_slice %116 {offsets = [0, 0], sizes = [192, 128], strides = [1, 1]} : vector<256x128xf32> to vector<192x128xf32>
    %118 = arith.negf %117 : vector<192x128xf32>
    %119 = math.exp %118 : vector<192x128xf32>
    %cst_29 = arith.constant 1.000000e+00 : f32
    %120 = vector.broadcast %cst_29 : f32 to vector<192x128xf32>
    %121 = arith.addf %120, %119 : vector<192x128xf32>
    %122 = arith.divf %120, %121 : vector<192x128xf32>
    %123 = vector.extract_strided_slice %122 {offsets = [0, 0], sizes = [64, 128], strides = [1, 1]} : vector<192x128xf32> to vector<64x128xf32>
    %124 = vector.extract_strided_slice %122 {offsets = [64, 0], sizes = [64, 128], strides = [1, 1]} : vector<192x128xf32> to vector<64x128xf32>
    %125 = vector.extract_strided_slice %122 {offsets = [128, 0], sizes = [64, 128], strides = [1, 1]} : vector<192x128xf32> to vector<64x128xf32>
    %126 = vector.extract_strided_slice %116 {offsets = [192, 0], sizes = [64, 128], strides = [1, 1]} : vector<256x128xf32> to vector<64x128xf32>
    %127 = math.tanh %126 : vector<64x128xf32>
    %128 = arith.mulf %124, %90 : vector<64x128xf32>
    %129 = arith.mulf %123, %127 : vector<64x128xf32>
    %130 = arith.addf %128, %129 : vector<64x128xf32>
    %131 = math.tanh %130 : vector<64x128xf32>
    %132 = arith.mulf %125, %131 : vector<64x128xf32>
    %133 = arith.mulf %16, %132 : vector<64x128xf32>
    %cst_30 = arith.constant dense<0.000000e+00> : vector<128xf32>
    %134 = vector.multi_reduction <add>, %133, %cst_30 [0] : vector<64x128xf32> to vector<128xf32>
    %135 = vector.shape_cast %134 : vector<128xf32> to vector<1x128xf32>
    %136 = arith.index_cast %c2_i32 : i32 to index
    %c0_31 = arith.constant 0 : index
    %c0_32 = arith.constant 0 : index
    %137 = vector.load %arg8[%136, %c0_31, %c0_32] : memref<4x1x128xf32, #tpu.memory_space<vmem>>, vector<1x1x128xf32>
    %138 = vector.shape_cast %137 : vector<1x1x128xf32> to vector<1x128xf32>
    %139 = vector.shape_cast %135 : vector<1x128xf32> to vector<1x1x128xf32>
    tpu.vector_store %arg8[%136, %c0_31, %c0_32], %139 {strides = array<i32>} : memref<4x1x128xf32, #tpu.memory_space<vmem>>, vector<1x1x128xf32>,
    %c3_i32 = arith.constant 3 : i32
    %cst_33 = arith.constant dense<0.000000e+00> : vector<256x128xf32>
    %140 = tpu.matmul %0, %132, %cst_33 {dimension_numbers = #tpu.dot_dimension_numbers<[1], [0], [0], [1], [0, 0, 1, 1], [], []>} : vector<256x64xf32>, vector<64x128xf32>, vector<256x128xf32> -> vector<256x128xf32>
    %141 = arith.index_cast %c3_i32 : i32 to index
    %c0_34 = arith.constant 0 : index
    %c0_35 = arith.constant 0 : index
    %142 = vector.load %arg1[%141, %c0_34, %c0_35] : memref<4x3x128xf32, #tpu.memory_space<vmem>>, vector<1x3x128xf32>
    %143 = vector.shape_cast %142 : vector<1x3x128xf32> to vector<3x128xf32>
    %144 = vector.extract_strided_slice %143 {offsets = [0, 0], sizes = [1, 128], strides = [1, 1]} : vector<3x128xf32> to vector<1x128xf32>
    %145 = vector.broadcast %144 : vector<1x128xf32> to vector<256x128xf32>
    %146 = arith.mulf %7, %145 : vector<256x128xf32>
    %147 = arith.addf %4, %146 : vector<256x128xf32>
    %148 = vector.extract_strided_slice %143 {offsets = [1, 0], sizes = [1, 128], strides = [1, 1]} : vector<3x128xf32> to vector<1x128xf32>
    %149 = vector.broadcast %148 : vector<1x128xf32> to vector<256x128xf32>
    %150 = arith.mulf %10, %149 : vector<256x128xf32>
    %151 = arith.addf %147, %150 : vector<256x128xf32>
    %152 = vector.extract_strided_slice %143 {offsets = [2, 0], sizes = [1, 128], strides = [1, 1]} : vector<3x128xf32> to vector<1x128xf32>
    %153 = vector.broadcast %152 : vector<1x128xf32> to vector<256x128xf32>
    %154 = arith.mulf %13, %153 : vector<256x128xf32>
    %155 = arith.addf %151, %154 : vector<256x128xf32>
    %156 = arith.addf %140, %155 : vector<256x128xf32>
    %157 = vector.extract_strided_slice %156 {offsets = [0, 0], sizes = [192, 128], strides = [1, 1]} : vector<256x128xf32> to vector<192x128xf32>
    %158 = arith.negf %157 : vector<192x128xf32>
    %159 = math.exp %158 : vector<192x128xf32>
    %cst_36 = arith.constant 1.000000e+00 : f32
    %160 = vector.broadcast %cst_36 : f32 to vector<192x128xf32>
    %161 = arith.addf %160, %159 : vector<192x128xf32>
    %162 = arith.divf %160, %161 : vector<192x128xf32>
    %163 = vector.extract_strided_slice %162 {offsets = [0, 0], sizes = [64, 128], strides = [1, 1]} : vector<192x128xf32> to vector<64x128xf32>
    %164 = vector.extract_strided_slice %162 {offsets = [64, 0], sizes = [64, 128], strides = [1, 1]} : vector<192x128xf32> to vector<64x128xf32>
    %165 = vector.extract_strided_slice %162 {offsets = [128, 0], sizes = [64, 128], strides = [1, 1]} : vector<192x128xf32> to vector<64x128xf32>
    %166 = vector.extract_strided_slice %156 {offsets = [192, 0], sizes = [64, 128], strides = [1, 1]} : vector<256x128xf32> to vector<64x128xf32>
    %167 = math.tanh %166 : vector<64x128xf32>
    %168 = arith.mulf %164, %130 : vector<64x128xf32>
    %169 = arith.mulf %163, %167 : vector<64x128xf32>
    %170 = arith.addf %168, %169 : vector<64x128xf32>
    %171 = math.tanh %170 : vector<64x128xf32>
    %172 = arith.mulf %165, %171 : vector<64x128xf32>
    %173 = arith.mulf %16, %172 : vector<64x128xf32>
    %cst_37 = arith.constant dense<0.000000e+00> : vector<128xf32>
    %174 = vector.multi_reduction <add>, %173, %cst_37 [0] : vector<64x128xf32> to vector<128xf32>
    %175 = vector.shape_cast %174 : vector<128xf32> to vector<1x128xf32>
    %176 = arith.index_cast %c3_i32 : i32 to index
    %c0_38 = arith.constant 0 : index
    %c0_39 = arith.constant 0 : index
    %177 = vector.load %arg8[%176, %c0_38, %c0_39] : memref<4x1x128xf32, #tpu.memory_space<vmem>>, vector<1x1x128xf32>
    %178 = vector.shape_cast %177 : vector<1x1x128xf32> to vector<1x128xf32>
    %179 = vector.shape_cast %175 : vector<1x128xf32> to vector<1x1x128xf32>
    tpu.vector_store %arg8[%176, %c0_38, %c0_39], %179 {strides = array<i32>} : memref<4x1x128xf32, #tpu.memory_space<vmem>>, vector<1x1x128xf32>,
    %c3_i32_40 = arith.constant 3 : i32
    return
  }
  func.func @transform_0(%arg0: i32) -> (i32, i32, i32) {
    %c0_i32 = arith.constant 0 : i32
    %c0_i32_0 = arith.constant 0 : i32
    %c0_i32_1 = arith.constant 0 : i32
    return %c0_i32, %c0_i32_0, %arg0 : i32, i32, i32
  }
  func.func @transform_1(%arg0: i32) -> (i32, i32) {
    %c0_i32 = arith.constant 0 : i32
    %c0_i32_0 = arith.constant 0 : i32
    %c0_i32_1 = arith.constant 0 : i32
    return %c0_i32, %c0_i32_0 : i32, i32
  }
  func.func @transform_2(%arg0: i32) -> (i32, i32) {
    %c0_i32 = arith.constant 0 : i32
    %c0_i32_0 = arith.constant 0 : i32
    %c0_i32_1 = arith.constant 0 : i32
    return %c0_i32, %c0_i32_0 : i32, i32
  }
  func.func @transform_3(%arg0: i32) -> (i32, i32) {
    %c0_i32 = arith.constant 0 : i32
    %c0_i32_0 = arith.constant 0 : i32
    %c0_i32_1 = arith.constant 0 : i32
    return %c0_i32, %c0_i32_0 : i32, i32
  }
  func.func @transform_4(%arg0: i32) -> (i32, i32) {
    %c0_i32 = arith.constant 0 : i32
    %c0_i32_0 = arith.constant 0 : i32
    %c0_i32_1 = arith.constant 0 : i32
    return %c0_i32, %c0_i32_0 : i32, i32
  }
  func.func @transform_5(%arg0: i32) -> (i32, i32) {
    %c0_i32 = arith.constant 0 : i32
    %c0_i32_0 = arith.constant 0 : i32
    return %c0_i32, %arg0 : i32, i32
  }
  func.func @transform_6(%arg0: i32) -> (i32, i32) {
    %c0_i32 = arith.constant 0 : i32
    %c0_i32_0 = arith.constant 0 : i32
    %c0_i32_1 = arith.constant 0 : i32
    return %c0_i32, %c0_i32_0 : i32, i32
  }
  func.func @transform_7(%arg0: i32) -> (i32, i32, i32) {
    %c0_i32 = arith.constant 0 : i32
    %c0_i32_0 = arith.constant 0 : i32
    %c0_i32_1 = arith.constant 0 : i32
    return %c0_i32, %c0_i32_0, %arg0 : i32, i32, i32
  }
}

</mosaic_0001>

<bundles_post_ra>
// kernel: lstm_forward.1
= control target key start
LH: loop header
LB: loop body
LE: loop exit
PB: predicated region body
PF: predicated region fallthrough
CT: control target
= control target key end

     0   :  { %s5148_s24 = smov 0   ;;  %s5150_s25 = smov 0   ;;  %s8294_s0 = inlined_call_operand.vmem [shape: f32[4,3,256], index: 0, kind: input, shape index: {}]   ;;  %s8295_s1 = inlined_call_operand.vmem [shape: f32[256,64], index: 1, kind: input, shape index: {}]   ;;  %s8296_s2 = inlined_call_operand.vmem [shape: f32[256,3], index: 2, kind: input, shape index: {}]   ;;  %s8297_s3 = inlined_call_operand.vmem [shape: f32[256,1], index: 3, kind: input, shape index: {}]   ;;  %s8298_s4 = inlined_call_operand.vmem [shape: f32[256,1], index: 4, kind: input, shape index: {}]   ;;  %s8299_s5 = inlined_call_operand.vmem [shape: f32[1,256], index: 5, kind: input, shape index: {}]   ;;  %s8300_s6 = inlined_call_operand.vmem [shape: f32[64,1], index: 6, kind: input, shape index: {}]   ;;  %s8301_s7 = inlined_call_operand.vmem [shape: f32[4,1,256], index: 7, kind: output, shape index: {}]  }
   0x1   :  { %s5152_s26 = smov 0  }
   0x2 LB: > { %s5164_s27 = sadd.s32 4294967295, %s5103_s26   ;;  %s5167_s28 = sadd.s32 1, %s5103_s26   ;;  %s5103_s26 = sphi %s5152_s26, %s8897_s26   ;;  %s5099_s25 = sphi %s5150_s25, %s8896_s25   ;;  %s5095_s24 = sphi %s5148_s24, %s8895_s24  }
   0x3   : > { %s21_s29 = ssub.s32 %s5103_s26, %s5167_s28  ;;  %s24_s30 = sadd.s32 1, %s5099_s25 }
   0x4   : > { %p22_p0 = scmp.eq.s32.totalorder %s21_s29, 0  ;;  %p31_p1 = scmp.ne.s32.totalorder %s5099_s25, %s5095_s24 }
   0x5   : > { %p32_p2 = scmp.eq.s32.totalorder %s5103_s26, 0  ;;  %p192_p3 = scmp.eq.s32.totalorder %s5164_s27, 1 }
   0x6   : > { %s5177_s8 = scalar_select %p22_p0, %s5099_s25, %s24_s30  }
   0x7   : > { %p33_p4 = por %p32_p2, %p31_p1  ;;  %p5179_p5 = por %p192_p3, %p31_p1 }
   0x8   : > { %p3895_p6 = scmp.ge.s32.totalorder %s5103_s26, 2 }
   0xa   : > { %229 = sbr.rel (%p3895_p6) target bundleno = 24 (0x18), region = 36 }
  0x11   : > { %232 = sbr.rel (!%p33_p4) target bundleno = 24 (0x18), region = 40  ;;  %s234_s10 = sand.u32 (%p33_p4), 1, %s5099_s25  }
  0x12   : > { %s3897_s11 = sshll.u32 (%p33_p4), %s5103_s26, 2  ;;  %s3896_s12 = sshll.u32 (%p33_p4), %s234_s10, 4 }
  0x13   : > { %s238_s15 = scalar_lea.vmem (%p33_p4), %s8294_s0, %s3897_s11  ;;  %s236_s16 = scalar_lea.vmem (%p33_p4), [#allocation2], %s3896_s12 }
  0x14   : > { %v254_v0 = vld [vmem:[%s238_s15] sm:$0xf] (%p33_p4)  ;;  %v256_v1 = vld [vmem:[%s238_s15 + $0x8] sm:$0xf] (%p33_p4)  ;;  %v258_v2 = vld [vmem:[%s238_s15 + $0x10] sm:$0xf] (%p33_p4) }
  0x15   : > { %255 = vst [vmem:[%s236_s16] sm:$0xf] (%p33_p4), %v254_v0  ;;  %257 = vst [vmem:[%s236_s16 + $0x4] sm:$0xf] (%p33_p4), %v256_v1  ;;  %v260_v3 = vld [vmem:[%s238_s15 + $0x18] sm:$0xf] (%p33_p4) }
  0x16   : > { %259 = vst [vmem:[%s236_s16 + $0x8] sm:$0xf] (%p33_p4), %v258_v2  ;;  %261 = vst [vmem:[%s236_s16 + $0xc] sm:$0xf] (%p33_p4), %v260_v3 }
  0x18 PF: > { %p3898_p7 = scmp.ge.s32.totalorder %s5103_s26, 1  ;;  %p297_p8 = scmp.lt.s32.totalorder %s5103_s26, 3 }
  0x1a   : > { %p298_p9 = pnand %p3898_p7, %p297_p8 }
  0x1c   : > { %301 = sbr.rel (%p298_p9) target bundleno = 1574 (0x626), region = 85 }
  0x23   : > { %v5194_v4 = vld [vmem:[%s8296_s2 + $0x40] sm:$0xff]  ;;  %v8302_v6 = vmov 1   ;;  %v8304_v7 = vmov 0   ;;  %v1292_v8 = vlaneseq  ;;  %v5208_v9 = vld [vmem:[%s8296_s2 + $0x48] sm:$0xff]  ;;  %s304_s23 = sand.u32 1, %s5095_s24   ;;  %v5219_v12 = vld [vmem:[%s8296_s2 + $0x10] sm:$0xff]  ;;  %s3784_s17 = scalar_lea.vmem (%p5179_p5), %s8301_s7, %s5164_s27 }
  0x24   : > { %v5199_v5 = vld [vmem:[%s8296_s2] sm:$0xff]  ;;  %4499 = vset.pattern.permute.xlu0 %v8302_v6  ;;  %4498 = vset.pattern.permute.xlu1 %v8304_v7  ;;  %v405_v11 = vld [vmem:[%s8297_s3 + $0x8] sm:$0xff]  ;;  %s3899_s11 = sshll.u32 %s304_s23, 4  ;;  %v5232_v15 = vld [vmem:[%s8296_s2 + $0x58] sm:$0xff]  ;;  %v8306_v36 = vmov 2   ;;  %p337_p10 = scmp.lt.s32.totalorder %s5164_s27, 1 }
  0x25   : > { %638 = vperm.xlu1 %4498, %v5194_v4   ;;  %757 = vperm.xlu0 %4499, %v5199_v5   ;;  %v1293_v10 = vshrl.u32 %v1292_v8, 7  ;;  %v413_v14 = vld [vmem:[%s8297_s3 + $0x48] sm:$0xff]  ;;  %s5236_s16 = scalar_lea.vmem [#allocation2], %s3899_s11  ;;  %v5254_v23 = vld [vmem:[%s8296_s2 + $0x20] sm:$0xff]  ;;  %v5280_v29 = vld [vmem:[%s8296_s2 + $0x30] sm:$0xff]  ;;  %vm1948_vm0 = vcmask 523264  }
  0x26   : > { %v3926_v17 = vld [vmem:[%s5236_s16 + $0x4] sm:$0x7]  ;;  %v3984_v18 = vld [vmem:[%s5236_s16 + $0x8] sm:$0x7]  ;;  %v4042_v19 = vld [vmem:[%s5236_s16 + $0xc] sm:$0x7] }
  0x27   : > { %v5224_v13 = vsub.s32 0, %v1293_v10  ;;  %v5234_v16 = vsub.s32 1, %v1293_v10  ;;  %v5268_v27 = vld [vmem:[%s8296_s2 + $0x8] sm:$0xff]  ;;  %v5287_v30 = vld [vmem:[%s8296_s2 + $0x78] sm:$0xff]  ;;  %v382_v31 = vld [vmem:[%s8296_s2 + $0x50] sm:$0xff]  ;;  %v5306_v34 = vsub.s32 2, %v1293_v10 }
  0x28   : > { %v385_v28 = vld [vmem:[%s8296_s2 + $0x68] sm:$0xff]  ;;  %v5297_v32 = vld [vmem:[%s8296_s2 + $0x80] sm:$0xff]  ;;  %v5312_v35 = vld [vmem:[%s8296_s2 + $0x90] sm:$0xff]  ;;  %s338_s20 = scalar_select %p337_p10, %s5164_s27, 1 }
  0x29   : > { %643 = vperm.xlu1 %4498, %v5208_v9   ;;  %793 = vperm.xlu0 %4499, %v5208_v9   ;;  %v5243_v20 = vrot.slane %v3926_v17, %v5224_v13  ;;  %v5246_v21 = vrot.slane %v3984_v18, %v5224_v13  ;;  %v5249_v22 = vrot.slane %v4042_v19, %v5224_v13  ;;  %v5303_v33 = vld [vmem:[%s8296_s2 + $0xc8] sm:$0xff]  ;;  %v5323_v38 = vld [vmem:[%s8296_s2 + $0xd8] sm:$0xff]  ;;  %v406_v39 = vld [vmem:[%s8297_s3 + $0x10] sm:$0xff] }
  0x2a   : > { %v5257_v24 = vrot.slane %v3926_v17, %v5234_v16  ;;  %v5260_v25 = vrot.slane %v3984_v18, %v5234_v16  ;;  %v5263_v26 = vrot.slane %v4042_v19, %v5234_v16  ;;  %v5317_v37 = vrot.slane %v3926_v17, %v5306_v34  ;;  %v5333_v40 = vld [vmem:[%s8296_s2 + $0xa0] sm:$0xff]  ;;  %v414_v41 = vld [vmem:[%s8297_s3 + $0x50] sm:$0xff]  ;;  %v401_v42 = vld [vmem:[%s8296_s2 + $0xe8] sm:$0xff]  ;;  %s6269_s26 = scalar_lea.vmem %s8299_s5, %s338_s20 }
  0x2b   : > { %8410 = vst [vmem:[#allocation4_spill] sm:$0xff] %v5243_v20  ;;  %8411 = vst [vmem:[#allocation5_spill] sm:$0xff] %v5246_v21  ;;  %v415_v43 = vld [vmem:[%s8297_s3 + $0x58] sm:$0xff]  ;;  %v5349_v44 = vld [vmem:[%s8296_s2 + $0xb0] sm:$0xff]  ;;  %v5363_v47 = vrot.slane %v3984_v18, %v5306_v34  ;;  %v5368_v48 = vrot.slane %v4042_v19, %v5306_v34 }
  0x2c   : > { %8412 = vst [vmem:[#allocation6_spill] sm:$0xff] %v5249_v22  ;;  %v403_v45 = vld [vmem:[%s8296_s2 + $0xf8] sm:$0xff]  ;;  %v1060_v49 = vld [vmem:[%s8298_s4] sm:$0xff]  ;;  %v1069_v51 = vld [vmem:[%s8298_s4 + $0x48] sm:$0xff] }
  0x2d   : > { %443 = vperm.xlu1 %4498, %v405_v11   ;;  %765 = vperm.xlu0 %4499, %v5219_v12   ;;  %v5358_v46 = vld [vmem:[%s8296_s2 + $0x18] sm:$0xff]  ;;  %8413 = vst [vmem:[#allocation7_spill] sm:$0xff] %v5368_v48  ;;  %v1068_v50 = vld [vmem:[%s8298_s4 + $0x40] sm:$0xff]  ;;  %v5386_v52 = vld [vmem:[%s8296_s2 + $0x28] sm:$0xff] }
  0x2e   : > { %v408_v53 = vld [vmem:[%s8297_s3 + $0x20] sm:$0xff]  ;;  %v417_v55 = vld [vmem:[%s8297_s3 + $0x68] sm:$0xff]  ;;  %v1062_v57 = vld [vmem:[%s8298_s4 + $0x10] sm:$0xff] }
  0x2f   : > { %v416_v54 = vld [vmem:[%s8297_s3 + $0x60] sm:$0xff]  ;;  %v1070_v58 = vld [vmem:[%s8298_s4 + $0x50] sm:$0xff]  ;;  %v1071_v61 = vld [vmem:[%s8298_s4 + $0x58] sm:$0xff] }
  0x30   : > { %v5414_v56 = vld [vmem:[%s8296_s2 + $0x60] sm:$0xff]  ;;  %v5441_v0 = vld [vmem:[%s8296_s2 + $0x38] sm:$0xff] }
  0x31   : > { %483 = vperm.xlu1 %4498, %v413_v14   ;;  %801 = vperm.xlu0 %4499, %v5232_v15   ;;  %v404_v3 = vld [vmem:[%s8297_s3] sm:$0xff] }
  0x32   : > { %v412_v10 = vld [vmem:[%s8297_s3 + $0x40] sm:$0xff] }
  0x35   : > { %4500 = vset.pattern.permute.xlu1 %v8302_v6  ;;  %773 = vperm.xlu0 %4499, %v5254_v23  }
  0x36   : > { %761 = vperm.xlu1 %4500, %v5268_v27  }
  0x39   : > { %809 = vperm.xlu0 %4499, %v385_v28  }
  0x3a   : > { %789 = vperm.xlu1 %4500, %v5194_v4  }
  0x3d   : > { %781 = vperm.xlu0 %4499, %v5280_v29  }
  0x3e   : > { %4501 = vset.pattern.permute.xlu1 %v8304_v7 }
  0x3f   : > { %608 = vperm.xlu1 %4501, %v5219_v12  }
  0x41   : > { %817 = vperm.xlu0 %4499, %v5287_v30  }
  0x43   : > { %648 = vperm.xlu1 %4501, %v382_v31  }
  0x45   : > { %821 = vperm.xlu0 %4499, %v5297_v32  }
  0x47   : > { %653 = vperm.xlu1 %4501, %v5232_v15  }
  0x49   : > { %857 = vperm.xlu0 %4499, %v5303_v33  }
  0x4b   : > { %4502 = vset.pattern.permute.xlu1 %v8306_v36 }
  0x4c   : > { %889 = vperm.xlu1 %4502, %v5268_v27  }
  0x4d   : > { %829 = vperm.xlu0 %4499, %v5312_v35  }
  0x50   : > { %917 = vperm.xlu1 %4502, %v5194_v4  }
  0x51   : > { %865 = vperm.xlu0 %4499, %v5323_v38  }
  0x54   : > { %4503 = vset.pattern.permute.xlu1 %v8304_v7 }
  0x55   : > { %448 = vperm.xlu1 %4503, %v406_v39   ;;  %837 = vperm.xlu0 %4499, %v5333_v40  }
  0x59   : > { %488 = vperm.xlu1 %4503, %v414_v41   ;;  %873 = vperm.xlu0 %4499, %v401_v42  }
  0x5d   : > { %493 = vperm.xlu1 %4503, %v415_v43   ;;  %845 = vperm.xlu0 %4499, %v5349_v44  }
  0x61   : > { %4504 = vset.pattern.permute.xlu1 %v8302_v6  ;;  %881 = vperm.xlu0 %4499, %v403_v45  }
  0x62   : > { %769 = vperm.xlu1 %4504, %v5358_v46  }
  0x65   : > { %4529 = vset.pattern.permute.xlu0 %v8306_v36 }
  0x66   : > { %797 = vperm.xlu1 %4504, %v382_v31   ;;  %885 = vperm.xlu0 %4529, %v5199_v5  }
  0x6a   : > { %4505 = vset.pattern.permute.xlu1 %v8304_v7  ;;  %921 = vperm.xlu0 %4529, %v5208_v9  }
  0x6b   : > { %1095 = vperm.xlu1 %4505, %v1060_v49  }
  0x6e   : > { %893 = vperm.xlu0 %4529, %v5219_v12  }
  0x6f   : > { %1135 = vperm.xlu1 %4505, %v1068_v50  }
  0x72   : > { %929 = vperm.xlu0 %4529, %v5232_v15  }
  0x73   : > { %1140 = vperm.xlu1 %4505, %v1069_v51   ;;  %v418_v51 = vld [vmem:[%s8297_s3 + $0x70] sm:$0xff] }
  0x76   : > { %901 = vperm.xlu0 %4529, %v5254_v23  }
  0x77   : > { %623 = vperm.xlu1 %4505, %v5386_v52  }
  0x7a   : > { %937 = vperm.xlu0 %4529, %v385_v28  }
  0x7b   : > { %663 = vperm.xlu1 %4505, %v385_v28  }
  0x7e   : > { %909 = vperm.xlu0 %4529, %v5280_v29  }
  0x7f   : > { %4506 = vset.pattern.permute.xlu1 %v8306_v36 }
  0x80   : > { %897 = vperm.xlu1 %4506, %v5358_v46  }
  0x82   : > { %945 = vperm.xlu0 %4529, %v5287_v30  }
  0x84   : > { %925 = vperm.xlu1 %4506, %v382_v31  }
  0x86   : > { %949 = vperm.xlu0 %4529, %v5297_v32  }
  0x88   : > { %4507 = vset.pattern.permute.xlu1 %v8304_v7 }
  0x89   : > { %458 = vperm.xlu1 %4507, %v408_v53  }
  0x8a   : > { %985 = vperm.xlu0 %4529, %v5303_v33  }
  0x8d   : > { %498 = vperm.xlu1 %4507, %v416_v54   ;;  %v419_v54 = vld [vmem:[%s8297_s3 + $0x78] sm:$0xff] }
  0x8e   : > { %957 = vperm.xlu0 %4529, %v5312_v35  }
  0x91   : > { %503 = vperm.xlu1 %4507, %v417_v55  }
  0x92   : > { %993 = vperm.xlu0 %4529, %v5323_v38  }
  0x95   : > { %4508 = vset.pattern.permute.xlu1 %v8302_v6 }
  0x96   : > { %777 = vperm.xlu1 %4508, %v5386_v52   ;;  %965 = vperm.xlu0 %4529, %v5333_v40  }
  0x9a   : > { %805 = vperm.xlu1 %4508, %v5414_v56   ;;  %1001 = vperm.xlu0 %4529, %v401_v42   ;;  %v407_v42 = vld [vmem:[%s8297_s3 + $0x18] sm:$0xff] }
  0x9e   : > { %4509 = vset.pattern.permute.xlu1 %v8304_v7  ;;  %973 = vperm.xlu0 %4529, %v5349_v44  }
  0x9f   : > { %1105 = vperm.xlu1 %4509, %v1062_v57  }
  0xa2   : > { %1009 = vperm.xlu0 %4529, %v403_v45   ;;  %v410_v45 = vld [vmem:[%s8297_s3 + $0x30] sm:$0xff] }
  0xa3   : > { %1145 = vperm.xlu1 %4509, %v1070_v58  }
  0xa4   : > { %v5425_v59 = vpop.permute.xlu1 %638  ;;  %v5427_v60 = vpop.permute.xlu0 %757 }
  0xa5   : > { %8414 = vst [vmem:[#allocation8_spill] sm:$0xff] %v5425_v59  ;;  %8415 = vst [vmem:[#allocation9_spill] sm:$0xff] %v5427_v60 }
  0xa6   : > { %4532 = vset.pattern.permute.xlu0 %v8304_v7 }
  0xa7   : > { %1150 = vperm.xlu1 %4509, %v1071_v61   ;;  %598 = vperm.xlu0 %4532, %v5199_v5   ;;  %v409_v61 = vld [vmem:[%s8297_s3 + $0x28] sm:$0xff] }
  0xa8   : > { %v5434_v62 = vpop.permute.xlu1 %643  ;;  %v5436_v63 = vpop.permute.xlu0 %793 }
  0xa9   : > { %8416 = vst [vmem:[#allocation10_spill] sm:$0xff] %v5434_v62  ;;  %8417 = vst [vmem:[#allocation11_spill] sm:$0xff] %v5436_v63  ;;  %v1757_v4 = vmul.f32 %v5243_v20, %v5434_v62  ;;  %v1825_v5 = vmul.f32 %v5257_v24, %v5436_v63  ;;  %v2500_v11 = vmul.f32 %v5246_v21, %v5434_v62 }
  0xaa   : > { %v2568_v12 = vmul.f32 %v5260_v25, %v5436_v63  ;;  %v3146_v14 = vmul.f32 %v5249_v22, %v5434_v62  ;;  %v3214_v15 = vmul.f32 %v5263_v26, %v5436_v63 }
  0xab   : > { %633 = vperm.xlu1 %4509, %v5441_v0   ;;  %603 = vperm.xlu0 %4532, %v5268_v27  }
  0xac   : > { %v5445_v1 = vpop.permute.xlu1 %443  ;;  %v5447_v2 = vpop.permute.xlu0 %765 }
  0xad   : > { %8418 = vst [vmem:[#allocation12_spill] sm:$0xff] %v5445_v1  ;;  %8419 = vst [vmem:[#allocation13_spill] sm:$0xff] %v5447_v2 }
  0xaf   : > { %673 = vperm.xlu1 %4509, %v5287_v30   ;;  %438 = vperm.xlu0 %4532, %v404_v3  }
  0xb0   : > { %v5457_v8 = vpop.permute.xlu1 %483  ;;  %v5459_v9 = vpop.permute.xlu0 %801 }
  0xb1   : > { %8420 = vst [vmem:[#allocation14_spill] sm:$0xff] %v5457_v8  ;;  %8421 = vst [vmem:[#allocation15_spill] sm:$0xff] %v5459_v9  ;;  %v1789_v17 = vadd.f32 %v1757_v4, %v5457_v8  ;;  %v2532_v18 = vadd.f32 %v2500_v11, %v5457_v8  ;;  %v3178_v19 = vadd.f32 %v3146_v14, %v5457_v8  ;;  %v1064_v11 = vld [vmem:[%s8298_s4 + $0x20] sm:$0xff] }
  0xb2   : > { %v1818_v14 = vmul.f32 %v5257_v24, %v5447_v2 }
  0xb3   : > { %4510 = vset.pattern.permute.xlu1 %v8306_v36  ;;  %478 = vperm.xlu0 %4532, %v412_v10   ;;  %v5476_v27 = vadd.f32 %v1825_v5, %v1789_v17  ;;  %v5481_v30 = vadd.f32 %v2568_v12, %v2532_v18  ;;  %v5483_v31 = vadd.f32 %v3214_v15, %v3178_v19  ;;  %v1072_v18 = vld [vmem:[%s8298_s4 + $0x60] sm:$0xff]  ;;  %v5602_v36 = vld [vmem:[%s8296_s2 + $0x88] sm:$0xff] }
  0xb4   : > { %905 = vperm.xlu1 %4510, %v5386_v52   ;;  %v5479_v28 = vpop.permute.xlu0 %773 }
  0xb5   : > { %v5485_v39 = vpop.permute.xlu1 %761 }
  0xb6   : > { %8422 = vst [vmem:[#allocation16_spill] sm:$0xff] %v5485_v39 }
  0xb7   : > { %613 = vperm.xlu0 %4532, %v5358_v46   ;;  %v1061_v46 = vld [vmem:[%s8298_s4 + $0x8] sm:$0xff] }
  0xb8   : > { %933 = vperm.xlu1 %4510, %v5414_v56   ;;  %v5489_v41 = vpop.permute.xlu0 %809 }
  0xb9   : > { %8423 = vst [vmem:[#allocation17_spill] sm:$0xff] %v5489_v41  ;;  %v5494_v43 = vpop.permute.xlu1 %789 }
  0xba   : > { %8424 = vst [vmem:[#allocation18_spill] sm:$0xff] %v5494_v43 }
  0xbb   : > { %453 = vperm.xlu0 %4532, %v407_v42  }
  0xbc   : > { %4511 = vset.pattern.permute.xlu1 %v8304_v7  ;;  %v5500_v49 = vpop.permute.xlu0 %781 }
  0xbd   : > { %468 = vperm.xlu1 %4511, %v410_v45   ;;  %v3207_v45 = vmul.f32 %v5263_v26, %v5447_v2 }
  0xbe   : > { %v5505_v50 = vpop.permute.xlu1 %608 }
  0xbf   : > { %8425 = vst [vmem:[#allocation19_spill] sm:$0xff] %v5505_v50  ;;  %1100 = vperm.xlu0 %4532, %v1061_v46   ;;  %v1750_v12 = vmul.f32 %v5243_v20, %v5505_v50  ;;  %v2493_v19 = vmul.f32 %v5246_v21, %v5505_v50  ;;  %v3139_v42 = vmul.f32 %v5249_v22, %v5505_v50 }
  0xc0   : > { %v5510_v52 = vpop.permute.xlu0 %817 }
  0xc1   : > { %508 = vperm.xlu1 %4511, %v418_v51  }
  0xc2   : > { %v5512_v53 = vpop.permute.xlu1 %648 }
  0xc3   : > { %8426 = vst [vmem:[#allocation20_spill] sm:$0xff] %v5512_v53  ;;  %618 = vperm.xlu0 %4532, %v5254_v23   ;;  %v5535_v23 = vld [vmem:[%s8296_s2 + $0x70] sm:$0xff] }
  0xc4   : > { %v5518_v55 = vpop.permute.xlu0 %821 }
  0xc5   : > { %8427 = vst [vmem:[#allocation21_spill] sm:$0xff] %v5518_v55  ;;  %513 = vperm.xlu1 %4511, %v419_v54  }
  0xc6   : > { %v5520_v57 = vpop.permute.xlu1 %653 }
  0xc7   : > { %8428 = vst [vmem:[#allocation22_spill] sm:$0xff] %v5520_v57  ;;  %658 = vperm.xlu0 %4532, %v5414_v56   ;;  %v1063_v56 = vld [vmem:[%s8298_s4 + $0x18] sm:$0xff] }
  0xc8   : > { %v5523_v58 = vpop.permute.xlu0 %857 }
  0xc9   : > { %8429 = vst [vmem:[#allocation23_spill] sm:$0xff] %v5523_v58  ;;  %4512 = vset.pattern.permute.xlu1 %v8302_v6  ;;  %v1073_v6 = vld [vmem:[%s8298_s4 + $0x68] sm:$0xff] }
  0xca   : > { %785 = vperm.xlu1 %4512, %v5441_v0  }
  0xcb   : > { %v5530_v3 = vpop.permute.xlu1 %889  ;;  %463 = vperm.xlu0 %4532, %v409_v61  }
  0xcc   : > { %8430 = vst [vmem:[#allocation24_spill] sm:$0xff] %v5530_v3  ;;  %v5537_v4 = vpop.permute.xlu0 %829 }
  0xcd   : > { %8431 = vst [vmem:[#allocation25_spill] sm:$0xff] %v5537_v4 }
  0xce   : > { %813 = vperm.xlu1 %4512, %v5535_v23  }
  0xcf   : > { %v5543_v5 = vpop.permute.xlu1 %917  ;;  %1110 = vperm.xlu0 %4532, %v1063_v56  }
  0xd0   : > { %v5545_v10 = vpop.permute.xlu0 %865 }
  0xd1   : > { %8432 = vst [vmem:[#allocation26_spill] sm:$0xff] %v5545_v10 }
  0xd2   : > { %4513 = vset.pattern.permute.xlu1 %v8304_v7 }
  0xd3   : > { %1115 = vperm.xlu1 %4513, %v1064_v11   ;;  %628 = vperm.xlu0 %4532, %v5280_v29   ;;  %v2561_v29 = vmul.f32 %v5260_v25, %v5447_v2 }
  0xd4   : > { %v5556_v15 = vpop.permute.xlu1 %448  ;;  %v5558_v17 = vpop.permute.xlu0 %837 }
  0xd5   : > { %8433 = vst [vmem:[#allocation27_spill] sm:$0xff] %v5556_v15  ;;  %8434 = vst [vmem:[#allocation28_spill] sm:$0xff] %v5558_v17  ;;  %v1782_v46 = vadd.f32 %v1750_v12, %v5556_v15  ;;  %v2525_v51 = vadd.f32 %v2493_v19, %v5556_v15  ;;  %v3171_v54 = vadd.f32 %v3139_v42, %v5556_v15  ;;  %v411_v12 = vld [vmem:[%s8297_s3 + $0x38] sm:$0xff] }
  0xd6   : > { %v3148_v15 = vmul.f32 %v5249_v22, %v5520_v57 }
  0xd7   : > { %1155 = vperm.xlu1 %4513, %v1072_v18   ;;  %668 = vperm.xlu0 %4532, %v5535_v23   ;;  %v5575_v61 = vadd.f32 %v1818_v14, %v1782_v46  ;;  %v5587_v19 = vadd.f32 %v2561_v29, %v2525_v51  ;;  %v5589_v42 = vadd.f32 %v3207_v45, %v3171_v54 }
  0xd8   : > { %v5577_v56 = vpop.permute.xlu1 %488  ;;  %v5579_v11 = vpop.permute.xlu0 %873  ;;  %v1759_v14 = vmul.f32 %v5243_v20, %v5520_v57  ;;  %v1827_v18 = vmul.f32 %v5257_v24, %v5459_v9  ;;  %v2502_v29 = vmul.f32 %v5246_v21, %v5520_v57  ;;  %v2570_v45 = vmul.f32 %v5260_v25, %v5459_v9 }
  0xd9   : > { %8435 = vst [vmem:[#allocation29_spill] sm:$0xff] %v5577_v56  ;;  %8436 = vst [vmem:[#allocation30_spill] sm:$0xff] %v5579_v11  ;;  %v3147_v57 = vmul.f32 %v5249_v22, %v5512_v53 }
  0xdb   : > { %1160 = vperm.xlu1 %4513, %v1073_v6   ;;  %473 = vperm.xlu0 %4532, %v411_v12   ;;  %v1065_v6 = vld [vmem:[%s8298_s4 + $0x28] sm:$0xff]  ;;  %v3179_v4 = vadd.f32 %v3147_v57, %v5577_v56  ;;  %v1067_v57 = vld [vmem:[%s8298_s4 + $0x38] sm:$0xff] }
  0xdc   : > { %v5595_v46 = vpop.permute.xlu1 %493  ;;  %v5597_v7 = vpop.permute.xlu0 %845 }
  0xdd   : > { %8437 = vst [vmem:[#allocation31_spill] sm:$0xff] %v5595_v46  ;;  %8438 = vst [vmem:[#allocation32_spill] sm:$0xff] %v5597_v7  ;;  %v1791_v51 = vadd.f32 %v1759_v14, %v5595_v46  ;;  %v2534_v54 = vadd.f32 %v2502_v29, %v5595_v46  ;;  %v5625_v14 = vld [vmem:[%s8296_s2 + $0xc0] sm:$0xff]  ;;  %v3216_v29 = vmul.f32 %v5263_v26, %v5459_v9 }
  0xdf   : > { %683 = vperm.xlu1 %4513, %v5602_v36   ;;  %1120 = vperm.xlu0 %4532, %v1065_v6   ;;  %v1859_v12 = vadd.f32 %v1827_v18, %v1791_v51  ;;  %v2602_v11 = vadd.f32 %v2570_v45, %v2534_v54  ;;  %v1758_v18 = vmul.f32 %v5243_v20, %v5512_v53 }
  0xe0   : > { %v5614_v7 = vpop.permute.xlu0 %881  ;;  %v3180_v6 = vadd.f32 %v3148_v15, %v5595_v46 }
  0xe1   : > { %8439 = vst [vmem:[#allocation33_spill] sm:$0xff] %v5614_v7  ;;  %v5616_v17 = vpop.permute.xlu1 %769  ;;  %v8442_v7 = vmov 2  }
  0xe2   : > { %v3248_v2 = vadd.f32 %v3216_v29, %v3180_v6 }
  0xe3   : > { %723 = vperm.xlu1 %4513, %v5303_v33   ;;  %678 = vperm.xlu0 %4532, %v5297_v32   ;;  %v2501_v32 = vmul.f32 %v5246_v21, %v5512_v53  ;;  %v1790_v33 = vadd.f32 %v1758_v18, %v5577_v56  ;;  %v421_v18 = vld [vmem:[%s8297_s3 + $0x88] sm:$0xff] }
  0xe5   : > { %v5632_v45 = vpop.permute.xlu1 %797  ;;  %v5634_v51 = vpop.permute.xlu0 %885  ;;  %v2533_v15 = vadd.f32 %v2501_v32, %v5577_v56 }
  0xe6   : > { %8440 = vst [vmem:[#allocation34_spill] sm:$0xff] %v5632_v45  ;;  %8441 = vst [vmem:[#allocation35_spill] sm:$0xff] %v5634_v51  ;;  %v1826_v54 = vmul.f32 %v5257_v24, %v5632_v45  ;;  %v2569_v46 = vmul.f32 %v5260_v25, %v5632_v45  ;;  %v3215_v50 = vmul.f32 %v5263_v26, %v5632_v45 }
  0xe7   : > { %4514 = vset.pattern.permute.xlu1 %v8442_v7  ;;  %718 = vperm.xlu0 %4532, %v5625_v14  }
  0xe8   : > { %913 = vperm.xlu1 %4514, %v5441_v0   ;;  %v5652_v9 = vadd.f32 %v1826_v54, %v1790_v33  ;;  %v5658_v32 = vadd.f32 %v2569_v46, %v2533_v15  ;;  %v5669_v29 = vadd.f32 %v3215_v50, %v3179_v4  ;;  %v420_v50 = vld [vmem:[%s8297_s3 + $0x80] sm:$0xff] }
  0xe9   : > { %v5656_v10 = vpop.permute.xlu0 %921 }
  0xea   : > { %8443 = vst [vmem:[#allocation36_spill] sm:$0xff] %v5656_v10  ;;  %v5661_v8 = vpop.permute.xlu1 %1095  ;;  %v1893_v0 = vmul.f32 %v5317_v37, %v5656_v10  ;;  %v2636_v53 = vmul.f32 %v5363_v47, %v5656_v10  ;;  %v3282_v6 = vmul.f32 %v5368_v48, %v5656_v10 }
  0xeb   : > { %8444 = vst [vmem:[#allocation37_spill] sm:$0xff] %v5661_v8  ;;  %523 = vperm.xlu0 %4532, %v421_v18   ;;  %v5816_v8 = vld [vmem:[%s8296_s2 + $0xe0] sm:$0xff] }
  0xec   : > { %941 = vperm.xlu1 %4514, %v5535_v23   ;;  %v5676_v46 = vadd.f32 %v1893_v0, %v5476_v27  ;;  %v5679_v33 = vadd.f32 %v2636_v53, %v5481_v30  ;;  %v5682_v54 = vadd.f32 %v3282_v6, %v5483_v31  ;;  %v8450_v31 = vmov 0   ;;  %8470 = vst [vmem:[#allocation61_spill] sm:$0xff] %v5816_v8 }
  0xed   : > { %v5684_v15 = vpop.permute.xlu0 %893 }
  0xee   : > { %8445 = vst [vmem:[#allocation38_spill] sm:$0xff] %v5676_v46  ;;  %8446 = vst [vmem:[#allocation39_spill] sm:$0xff] %v5679_v33  ;;  %v5686_v18 = vpop.permute.xlu1 %1135  ;;  %v1886_v23 = vmul.f32 %v5317_v37, %v5684_v15  ;;  %v2629_v27 = vmul.f32 %v5363_v47, %v5684_v15  ;;  %v3275_v30 = vmul.f32 %v5368_v48, %v5684_v15 }
  0xef   : > { %8447 = vst [vmem:[#allocation40_spill] sm:$0xff] %v5682_v54  ;;  %8448 = vst [vmem:[#allocation41_spill] sm:$0xff] %v5684_v15  ;;  %1130 = vperm.xlu0 %4532, %v1067_v57   ;;  %v428_v57 = vld [vmem:[%s8297_s3 + $0xc0] sm:$0xff] }
  0xf0   : > { %8449 = vst [vmem:[#allocation42_spill] sm:$0xff] %v5686_v18  ;;  %4515 = vset.pattern.permute.xlu1 %v8450_v31  ;;  %v5699_v53 = vadd.f32 %v1886_v23, %v5575_v61  ;;  %v5702_v4 = vadd.f32 %v2629_v27, %v5587_v19  ;;  %v5705_v0 = vadd.f32 %v3275_v30, %v5589_v42  ;;  %v5724_v42 = vld [vmem:[%s8296_s2 + $0xd0] sm:$0xff] }
  0xf1   : > { %518 = vperm.xlu1 %4515, %v420_v50   ;;  %v5707_v6 = vpop.permute.xlu0 %929 }
  0xf2   : > { %8451 = vst [vmem:[#allocation43_spill] sm:$0xff] %v5699_v53  ;;  %8452 = vst [vmem:[#allocation44_spill] sm:$0xff] %v5702_v4  ;;  %v5709_v54 = vpop.permute.xlu1 %1140  ;;  %v1895_v33 = vmul.f32 %v5317_v37, %v5707_v6  ;;  %v2638_v61 = vmul.f32 %v5363_v47, %v5707_v6  ;;  %v3284_v19 = vmul.f32 %v5368_v48, %v5707_v6 }
  0xf3   : > { %8453 = vst [vmem:[#allocation45_spill] sm:$0xff] %v5705_v0  ;;  %8454 = vst [vmem:[#allocation46_spill] sm:$0xff] %v5707_v6  ;;  %688 = vperm.xlu0 %4532, %v5312_v35   ;;  %v429_v35 = vld [vmem:[%s8297_s3 + $0xc8] sm:$0xff] }
  0xf4   : > { %8455 = vst [vmem:[#allocation47_spill] sm:$0xff] %v5709_v54  ;;  %v5726_v50 = vadd.f32 %v1895_v33, %v1859_v12  ;;  %v5728_v23 = vadd.f32 %v2638_v61, %v2602_v11  ;;  %v5730_v27 = vadd.f32 %v3284_v19, %v3248_v2  ;;  %v423_v11 = vld [vmem:[%s8297_s3 + $0x98] sm:$0xff] }
  0xf5   : > { %558 = vperm.xlu1 %4515, %v428_v57   ;;  %v5732_v30 = vpop.permute.xlu0 %901 }
  0xf6   : > { %8456 = vst [vmem:[#allocation48_spill] sm:$0xff] %v5726_v50  ;;  %8457 = vst [vmem:[#allocation49_spill] sm:$0xff] %v5728_v23  ;;  %v5734_v0 = vpop.permute.xlu1 %623  ;;  %v5741_v4 = vmul.f32 %v5317_v37, %v5732_v30  ;;  %v5745_v12 = vmul.f32 %v5363_v47, %v5732_v30  ;;  %v5749_v2 = vmul.f32 %v5368_v48, %v5732_v30  ;;  %v8462_v23 = vmov 1  }
  0xf7   : > { %8458 = vst [vmem:[#allocation50_spill] sm:$0xff] %v5730_v27  ;;  %728 = vperm.xlu0 %4532, %v5724_v42  }
  0xf8   : > { %8459 = vst [vmem:[#allocation51_spill] sm:$0xff] %v5749_v2 }
  0xf9   : > { %563 = vperm.xlu1 %4515, %v429_v35   ;;  %v5755_v33 = vpop.permute.xlu0 %937  ;;  %v1077_v35 = vld [vmem:[%s8298_s4 + $0x88] sm:$0xff] }
  0xfa   : > { %8460 = vst [vmem:[#allocation52_spill] sm:$0xff] %v5755_v33  ;;  %v5757_v57 = vpop.permute.xlu1 %663  ;;  %v5761_v61 = vmul.f32 %v5317_v37, %v5755_v33  ;;  %v5765_v19 = vmul.f32 %v5363_v47, %v5755_v33  ;;  %v5769_v27 = vmul.f32 %v5368_v48, %v5755_v33 }
  0xfb   : > { %8461 = vst [vmem:[#allocation53_spill] sm:$0xff] %v5757_v57  ;;  %533 = vperm.xlu0 %4532, %v423_v11  }
  0xfd   : > { %4516 = vset.pattern.permute.xlu1 %v8462_v23  ;;  %v5775_v50 = vpop.permute.xlu0 %909 }
  0xfe   : > { %825 = vperm.xlu1 %4516, %v5602_v36   ;;  %v5780_v46 = vmul.f32 %v5317_v37, %v5775_v50  ;;  %v5784_v53 = vmul.f32 %v5363_v47, %v5775_v50  ;;  %v5788_v11 = vmul.f32 %v5368_v48, %v5775_v50 }
  0xff   : > { %v5790_v33 = vpop.permute.xlu1 %897  ;;  %1180 = vperm.xlu0 %4532, %v1077_v35   ;;  %v1066_v35 = vld [vmem:[%s8298_s4 + $0x30] sm:$0xff] }
 0x100   : > { %8463 = vst [vmem:[#allocation54_spill] sm:$0xff] %v5780_v46  ;;  %8464 = vst [vmem:[#allocation55_spill] sm:$0xff] %v5784_v53 }
 0x101   : > { %8465 = vst [vmem:[#allocation56_spill] sm:$0xff] %v5788_v11  ;;  %v5792_v6 = vpop.permute.xlu0 %945 }
 0x102   : > { %8466 = vst [vmem:[#allocation57_spill] sm:$0xff] %v5792_v6  ;;  %853 = vperm.xlu1 %4516, %v5625_v14   ;;  %v5797_v15 = vmul.f32 %v5317_v37, %v5792_v6  ;;  %v5801_v45 = vmul.f32 %v5363_v47, %v5792_v6  ;;  %v5805_v56 = vmul.f32 %v5368_v48, %v5792_v6 }
 0x103   : > { %v5807_v18 = vpop.permute.xlu1 %925  ;;  %698 = vperm.xlu0 %4532, %v5333_v40  }
 0x104   : > { %8467 = vst [vmem:[#allocation58_spill] sm:$0xff] %v5801_v45  ;;  %8468 = vst [vmem:[#allocation59_spill] sm:$0xff] %v5805_v56  ;;  %v1894_v54 = vmul.f32 %v5317_v37, %v5807_v18  ;;  %v2637_v10 = vmul.f32 %v5363_v47, %v5807_v18  ;;  %v3283_v40 = vmul.f32 %v5368_v48, %v5807_v18 }
 0x105   : > { %8469 = vst [vmem:[#allocation60_spill] sm:$0xff] %v5807_v18  ;;  %v5822_v63 = vpop.permute.xlu0 %949  ;;  %v1074_v18 = vld [vmem:[%s8298_s4 + $0x70] sm:$0xff] }
 0x106   : > { %8471 = vst [vmem:[#allocation62_spill] sm:$0xff] %v5822_v63  ;;  %4517 = vset.pattern.permute.xlu1 %v8450_v31  ;;  %v5829_v62 = vmul.f32 %v5317_v37, %v5822_v63  ;;  %v5833_v6 = vadd.f32 %v1894_v54, %v5652_v9  ;;  %v5836_v58 = vadd.f32 %v2637_v10, %v5658_v32  ;;  %v1075_v32 = vld [vmem:[%s8298_s4 + $0x78] sm:$0xff] }
 0x107   : > { %1125 = vperm.xlu1 %4517, %v1066_v35   ;;  %738 = vperm.xlu0 %4532, %v5816_v8   ;;  %v5839_v55 = vadd.f32 %v3283_v40, %v5669_v29  ;;  %v425_v35 = vld [vmem:[%s8297_s3 + $0xa8] sm:$0xff]  ;;  %v1079_v29 = vld [vmem:[%s8298_s4 + $0x98] sm:$0xff] }
 0x108   : > { %8472 = vst [vmem:[#allocation63_spill] sm:$0xff] %v5829_v62  ;;  %8473 = vst [vmem:[#allocation64_spill] sm:$0xff] %v5833_v6  ;;  %v5841_v56 = vpop.permute.xlu1 %458  ;;  %v2572_v6 = vmul.f32 %v5260_v25, %v5489_v41 }
 0x109   : > { %8474 = vst [vmem:[#allocation65_spill] sm:$0xff] %v5836_v58  ;;  %8475 = vst [vmem:[#allocation66_spill] sm:$0xff] %v5839_v55  ;;  %v5849_v62 = vpop.permute.xlu0 %985  ;;  %v1761_v55 = vmul.f32 %v5243_v20, %v5757_v57  ;;  %v2504_v58 = vmul.f32 %v5246_v21, %v5757_v57 }
 0x10a   : > { %8476 = vst [vmem:[#allocation67_spill] sm:$0xff] %v5849_v62  ;;  %v5853_v9 = vmul.f32 %v5317_v37, %v5849_v62 }
 0x10b   : > { %1165 = vperm.xlu1 %4517, %v1074_v18   ;;  %543 = vperm.xlu0 %4532, %v425_v35   ;;  %v5867_v18 = vmul.f32 %v5363_v47, %v5822_v63  ;;  %v1829_v35 = vmul.f32 %v5257_v24, %v5489_v41 }
 0x10c   : > { %8477 = vst [vmem:[#allocation68_spill] sm:$0xff] %v5853_v9  ;;  %v5855_v10 = vpop.permute.xlu1 %498 }
 0x10d   : > { %8478 = vst [vmem:[#allocation69_spill] sm:$0xff] %v5855_v10  ;;  %v5863_v54 = vpop.permute.xlu0 %957  ;;  %8480 = vst [vmem:[#allocation71_spill] sm:$0xff] %v5867_v18 }
 0x10e   : > { %8479 = vst [vmem:[#allocation70_spill] sm:$0xff] %v5863_v54  ;;  %v5871_v40 = vmul.f32 %v5317_v37, %v5863_v54 }
 0x10f   : > { %1170 = vperm.xlu1 %4517, %v1075_v32   ;;  %1190 = vperm.xlu0 %4532, %v1079_v29   ;;  %v3150_v32 = vmul.f32 %v5249_v22, %v5757_v57  ;;  %v3218_v29 = vmul.f32 %v5263_v26, %v5489_v41  ;;  %v402_v57 = vld [vmem:[%s8296_s2 + $0xf0] sm:$0xff]  ;;  %v5904_v41 = vmul.f32 %v5368_v48, %v5822_v63 }
 0x110   : > { %8481 = vst [vmem:[#allocation72_spill] sm:$0xff] %v5871_v40  ;;  %v5881_v9 = vpop.permute.xlu1 %503  ;;  %v5886_v40 = vld [vmem:[%s8296_s2 + $0x98] sm:$0xff]  ;;  %v1816_v63 = vmul.f32 %v5257_v24, %v5427_v60 }
 0x111   : > { %8482 = vst [vmem:[#allocation73_spill] sm:$0xff] %v5881_v9  ;;  %v5892_v18 = vpop.permute.xlu0 %993  ;;  %v1793_v8 = vadd.f32 %v1761_v55, %v5881_v9  ;;  %v2536_v11 = vadd.f32 %v2504_v58, %v5881_v9  ;;  %v3182_v2 = vadd.f32 %v3150_v32, %v5881_v9  ;;  %8484 = vst [vmem:[#allocation75_spill] sm:$0xff] %v5904_v41 }
 0x112   : > { %8483 = vst [vmem:[#allocation74_spill] sm:$0xff] %v5892_v18  ;;  %v2627_v41 = vmul.f32 %v5363_v47, %v5634_v51 }
 0x113   : > { %693 = vperm.xlu1 %4517, %v5886_v40   ;;  %708 = vperm.xlu0 %4532, %v5349_v44   ;;  %v1861_v53 = vadd.f32 %v1829_v35, %v1793_v8  ;;  %v2604_v46 = vadd.f32 %v2572_v6, %v2536_v11  ;;  %v3250_v45 = vadd.f32 %v3218_v29, %v3182_v2 }
 0x114   : > { %v5918_v8 = vmul.f32 %v5363_v47, %v5849_v62  ;;  %v5927_v2 = vmul.f32 %v5317_v37, %v5892_v18  ;;  %v5962_v29 = vmul.f32 %v5363_v47, %v5863_v54 }
 0x115   : > { %v5906_v55 = vpop.permute.xlu1 %777  ;;  %v5908_v58 = vpop.permute.xlu0 %965  ;;  %v5911_v32 = vadd.f32 %v5761_v61, %v1861_v53  ;;  %v5914_v44 = vadd.f32 %v5765_v19, %v2604_v46  ;;  %v427_v46 = vld [vmem:[%s8297_s3 + $0xb8] sm:$0xff]  ;;  %v5933_v53 = vadd.f32 %v5769_v27, %v3250_v45  ;;  %v1081_v45 = vld [vmem:[%s8298_s4 + $0xa8] sm:$0xff] }
 0x116   : > { %8485 = vst [vmem:[#allocation76_spill] sm:$0xff] %v5908_v58  ;;  %8488 = vst [vmem:[#allocation79_spill] sm:$0xff] %v5918_v8  ;;  %v5922_v6 = vmul.f32 %v5317_v37, %v5908_v58 }
 0x117   : > { %8486 = vst [vmem:[#allocation77_spill] sm:$0xff] %v5911_v32  ;;  %8487 = vst [vmem:[#allocation78_spill] sm:$0xff] %v5914_v44  ;;  %733 = vperm.xlu1 %4517, %v5323_v38   ;;  %748 = vperm.xlu0 %4532, %v402_v57   ;;  %v5946_v38 = vmul.f32 %v5368_v48, %v5849_v62  ;;  %v1083_v44 = vld [vmem:[%s8298_s4 + $0xb8] sm:$0xff] }
 0x118   : > { %8489 = vst [vmem:[#allocation80_spill] sm:$0xff] %v5922_v6  ;;  %8490 = vst [vmem:[#allocation81_spill] sm:$0xff] %v5927_v2 }
 0x119   : > { %8491 = vst [vmem:[#allocation82_spill] sm:$0xff] %v5933_v53  ;;  %v5935_v61 = vpop.permute.xlu1 %805  ;;  %v5937_v19 = vpop.permute.xlu0 %1001  ;;  %8495 = vst [vmem:[#allocation86_spill] sm:$0xff] %v5946_v38  ;;  %v5974_v53 = vmul.f32 %v5363_v47, %v5892_v18 }
 0x11a   : > { %8492 = vst [vmem:[#allocation83_spill] sm:$0xff] %v5935_v61  ;;  %8493 = vst [vmem:[#allocation84_spill] sm:$0xff] %v5937_v19  ;;  %v5941_v11 = vmul.f32 %v5317_v37, %v5937_v19  ;;  %v5982_v32 = vmul.f32 %v5363_v47, %v5937_v19 }
 0x11b   : > { %4518 = vset.pattern.permute.xlu1 %v8442_v7  ;;  %553 = vperm.xlu0 %4532, %v427_v46   ;;  %8499 = vst [vmem:[#allocation90_spill] sm:$0xff] %v5962_v29  ;;  %v5966_v46 = vmul.f32 %v5363_v47, %v5908_v58  ;;  %8502 = vst [vmem:[#allocation93_spill] sm:$0xff] %v5974_v53 }
 0x11c   : > { %8494 = vst [vmem:[#allocation85_spill] sm:$0xff] %v5941_v11  ;;  %953 = vperm.xlu1 %4518, %v5602_v36   ;;  %8503 = vst [vmem:[#allocation94_spill] sm:$0xff] %v5982_v32  ;;  %v1012_v32 = vld [vmem:[%s8300_s6] sm:$0xff]  ;;  %v6005_v11 = vmul.f32 %v5368_v48, %v5863_v54  ;;  %v1018_v54 = vld [vmem:[%s8300_s6 + $0x30] sm:$0xff] }
 0x11d   : > { %v5952_v27 = vpop.permute.xlu0 %973  ;;  %8500 = vst [vmem:[#allocation91_spill] sm:$0xff] %v5966_v46  ;;  %v6009_v46 = vmul.f32 %v5368_v48, %v5908_v58  ;;  %v431_v58 = vld [vmem:[%s8297_s3 + $0xd8] sm:$0xff] }
 0x11e   : > { %8496 = vst [vmem:[#allocation87_spill] sm:$0xff] %v5952_v27  ;;  %v5954_v57 = vpop.permute.xlu1 %1105  ;;  %v5958_v35 = vmul.f32 %v5317_v37, %v5952_v27  ;;  %v5970_v36 = vmul.f32 %v5363_v47, %v5952_v27  ;;  %8508 = vst [vmem:[#allocation99_spill] sm:$0xff] %v6005_v11  ;;  %v2560_v11 = vmul.f32 %v5260_v25, %v5485_v39 }
 0x11f   : > { %8497 = vst [vmem:[#allocation88_spill] sm:$0xff] %v5954_v57  ;;  %1200 = vperm.xlu0 %4532, %v1081_v45   ;;  %8509 = vst [vmem:[#allocation100_spill] sm:$0xff] %v6009_v46 }
 0x120   : > { %8498 = vst [vmem:[#allocation89_spill] sm:$0xff] %v5958_v35  ;;  %8501 = vst [vmem:[#allocation92_spill] sm:$0xff] %v5970_v36  ;;  %981 = vperm.xlu1 %4518, %v5625_v14   ;;  %v422_v36 = vld [vmem:[%s8297_s3 + $0x90] sm:$0xff] }
 0x121   : > { %v5984_v35 = vpop.permute.xlu0 %1009 }
 0x122   : > { %8504 = vst [vmem:[#allocation95_spill] sm:$0xff] %v5984_v35  ;;  %v5986_v45 = vpop.permute.xlu1 %1145  ;;  %v5993_v9 = vmul.f32 %v5317_v37, %v5984_v35  ;;  %v5997_v14 = vmul.f32 %v5363_v47, %v5984_v35  ;;  %v6025_v6 = vmul.f32 %v5368_v48, %v5984_v35  ;;  %v1014_v35 = vld [vmem:[%s8300_s6 + $0x10] sm:$0xff] }
 0x123   : > { %8505 = vst [vmem:[#allocation96_spill] sm:$0xff] %v5986_v45  ;;  %1210 = vperm.xlu0 %4532, %v1083_v44   ;;  %v6017_v44 = vmul.f32 %v5368_v48, %v5892_v18  ;;  %v2559_v18 = vmul.f32 %v5260_v25, %v5427_v60 }
 0x124   : > { %8506 = vst [vmem:[#allocation97_spill] sm:$0xff] %v5993_v9  ;;  %8507 = vst [vmem:[#allocation98_spill] sm:$0xff] %v5997_v14  ;;  %4519 = vset.pattern.permute.xlu1 %v8450_v31  ;;  %v6013_v9 = vmul.f32 %v5368_v48, %v5952_v27  ;;  %v6021_v14 = vmul.f32 %v5368_v48, %v5937_v19  ;;  %v430_v27 = vld [vmem:[%s8297_s3 + $0xd0] sm:$0xff] }
 0x125   : > { %8511 = vst [vmem:[#allocation102_spill] sm:$0xff] %v6017_v44  ;;  %528 = vperm.xlu1 %4519, %v422_v36   ;;  %8513 = vst [vmem:[#allocation104_spill] sm:$0xff] %v6025_v6 }
 0x126   : > { %8510 = vst [vmem:[#allocation101_spill] sm:$0xff] %v6013_v9  ;;  %8512 = vst [vmem:[#allocation103_spill] sm:$0xff] %v6021_v14  ;;  %v6027_v45 = vpop.permute.xlu1 %1150  ;;  %v6029_v46 = vpop.permute.xlu0 %598 }
 0x127   : > { %8514 = vst [vmem:[#allocation105_spill] sm:$0xff] %v6027_v45  ;;  %8515 = vst [vmem:[#allocation106_spill] sm:$0xff] %v6029_v46  ;;  %v1748_v9 = vmul.f32 %v5243_v20, %v6029_v46  ;;  %1022 = vperm.xlu0 %4532, %v1012_v32   ;;  %v2491_v36 = vmul.f32 %v5246_v21, %v6029_v46  ;;  %v3137_v14 = vmul.f32 %v5249_v22, %v6029_v46 }
 0x128   : > { %v1884_v46 = vmul.f32 %v5317_v37, %v5634_v51 }
 0x129   : > { %568 = vperm.xlu1 %4519, %v430_v27   ;;  %v1016_v27 = vld [vmem:[%s8300_s6 + $0x20] sm:$0xff] }
 0x12a   : > { %v6043_v6 = vpop.permute.xlu1 %633  ;;  %v6045_v19 = vpop.permute.xlu0 %603 }
 0x12b   : > { %8516 = vst [vmem:[#allocation107_spill] sm:$0xff] %v6043_v6  ;;  %8517 = vst [vmem:[#allocation108_spill] sm:$0xff] %v6045_v19  ;;  %v1749_v32 = vmul.f32 %v5243_v20, %v6045_v19  ;;  %v2492_v45 = vmul.f32 %v5246_v21, %v6045_v19  ;;  %1032 = vperm.xlu0 %4532, %v1014_v35   ;;  %v3138_v57 = vmul.f32 %v5249_v22, %v6045_v19 }
 0x12c   : > { %v1817_v35 = vmul.f32 %v5257_v24, %v5485_v39 }
 0x12d   : > { %573 = vperm.xlu1 %4519, %v431_v58   ;;  %v1781_v62 = vadd.f32 %v1749_v32, %v5445_v1  ;;  %v2524_v2 = vadd.f32 %v2492_v45, %v5445_v1  ;;  %v1885_v45 = vmul.f32 %v5317_v37, %v5530_v3 }
 0x12e   : > { %v6062_v44 = vpop.permute.xlu1 %673  ;;  %v6064_v53 = vpop.permute.xlu0 %438 }
 0x12f   : > { %8518 = vst [vmem:[#allocation109_spill] sm:$0xff] %v6064_v53  ;;  %v1780_v58 = vadd.f32 %v1748_v9, %v6064_v53  ;;  %v2523_v32 = vadd.f32 %v2491_v36, %v6064_v53  ;;  %1042 = vperm.xlu0 %4532, %v1016_v27   ;;  %v3169_v29 = vadd.f32 %v3137_v14, %v6064_v53  ;;  %v6089_v53 = vld [vmem:[%s5236_s16] sm:$0x7]  ;;  %s3900_s16 = sshll.u32 %s304_s23, 2 }
 0x130   : > { %v1849_v19 = vadd.f32 %v1817_v35, %v1781_v62  ;;  %v1756_v9 = vmul.f32 %v5243_v20, %v5425_v59  ;;  %v2499_v36 = vmul.f32 %v5246_v21, %v5425_v59  ;;  %v2592_v27 = vadd.f32 %v2560_v11, %v2524_v2  ;;  %s7674_s29 = scalar_lea.vmem [#allocation3], %s3900_s16 }
 0x131   : > { %4520 = vset.pattern.permute.xlu1 %v8462_v23  ;;  %v1848_v14 = vadd.f32 %v1816_v63, %v1780_v58  ;;  %v3145_v35 = vmul.f32 %v5249_v22, %v5425_v59  ;;  %v2591_v8 = vadd.f32 %v2559_v18, %v2523_v32  ;;  %v1824_v11 = vmul.f32 %v5257_v24, %v5494_v43 }
 0x132   : > { %833 = vperm.xlu1 %4520, %v5886_v40   ;;  %v6092_v62 = vpop.permute.xlu0 %478  ;;  %v6096_v38 = vadd.f32 %v1885_v45, %v1849_v19  ;;  %v2628_v18 = vmul.f32 %v5363_v47, %v5530_v3  ;;  %v6113_v19 = vrot.slane %v6089_v53, %v5224_v13  ;;  %v1892_v13 = vmul.f32 %v5317_v37, %v5543_v5 }
 0x133   : > { %8519 = vst [vmem:[#allocation110_spill] sm:$0xff] %v6092_v62  ;;  %v1788_v23 = vadd.f32 %v1756_v9, %v6092_v62  ;;  %v2531_v63 = vadd.f32 %v2499_v36, %v6092_v62  ;;  %v6102_v2 = vpop.permute.xlu1 %905  ;;  %1052 = vperm.xlu0 %4532, %v1018_v54   ;;  %v3177_v58 = vadd.f32 %v3145_v35, %v6092_v62 }
 0x134   : > { %8520 = vst [vmem:[#allocation111_spill] sm:$0xff] %v6096_v38  ;;  %v6107_v6 = vadd.f32 %v1884_v46, %v1848_v14  ;;  %v6116_v9 = vadd.f32 %v2628_v18, %v2592_v27  ;;  %v6118_v54 = vadd.f32 %v2627_v41, %v2591_v8  ;;  %v3206_v36 = vmul.f32 %v5263_v26, %v5485_v39  ;;  %v1076_v8 = vld [vmem:[%s8298_s4 + $0x80] sm:$0xff] }
 0x135   : > { %v1856_v32 = vadd.f32 %v1824_v11, %v1788_v23  ;;  %v2567_v23 = vmul.f32 %v5260_v25, %v5494_v43  ;;  %v3170_v11 = vadd.f32 %v3138_v57, %v5445_v1  ;;  %v3205_v18 = vmul.f32 %v5263_v26, %v5427_v60  ;;  %v1084_v60 = vld [vmem:[%s8298_s4 + $0xc0] sm:$0xff] }
 0x136   : > { %8521 = vst [vmem:[#allocation112_spill] sm:$0xff] %v6107_v6  ;;  %861 = vperm.xlu1 %4520, %v5724_v42   ;;  %v614_v45 = vpop.permute.xlu0 %613  ;;  %8522 = vst [vmem:[#allocation113_spill] sm:$0xff] %v6116_v9  ;;  %v2635_v9 = vmul.f32 %v5363_v47, %v5543_v5  ;;  %v3274_v6 = vmul.f32 %v5368_v48, %v5530_v3  ;;  %v1819_v57 = vmul.f32 %v5257_v24, %v5616_v17 }
 0x137   : > { %8523 = vst [vmem:[#allocation114_spill] sm:$0xff] %v6118_v54  ;;  %v1299_v46 = vmul.f32 %v6113_v19, %v614_v45  ;;  %v1751_v14 = vmul.f32 %v5243_v20, %v614_v45  ;;  %v6124_v35 = vpop.permute.xlu1 %933  ;;  %v2494_v27 = vmul.f32 %v5246_v21, %v614_v45  ;;  %v3140_v41 = vmul.f32 %v5249_v22, %v614_v45 }
 0x138   : > { %8524 = vst [vmem:[#allocation115_spill] sm:$0xff] %v6124_v35  ;;  %v6138_v54 = vadd.f32 %v1892_v13, %v1856_v32  ;;  %v3213_v45 = vmul.f32 %v5263_v26, %v5494_v43  ;;  %v2562_v1 = vmul.f32 %v5260_v25, %v5616_v17  ;;  %v2599_v32 = vadd.f32 %v2567_v23, %v2531_v63 }
 0x139   : > { %v3273_v13 = vmul.f32 %v5368_v48, %v5634_v51  ;;  %v3208_v43 = vmul.f32 %v5263_v26, %v5616_v17  ;;  %v3238_v63 = vadd.f32 %v3206_v36, %v3170_v11  ;;  %v3237_v23 = vadd.f32 %v3205_v18, %v3169_v29 }
 0x13a   : > { %8525 = vst [vmem:[#allocation116_spill] sm:$0xff] %v6138_v54  ;;  %4521 = vset.pattern.permute.xlu1 %v8450_v31  ;;  %v454_v38 = vpop.permute.xlu0 %453  ;;  %v6162_v31 = vadd.f32 %v2635_v9, %v2599_v32  ;;  %v3276_v9 = vmul.f32 %v5368_v48, %v5790_v33  ;;  %v3245_v36 = vadd.f32 %v3213_v45, %v3177_v58 }
 0x13b   : > { %v6153_v54 = vadd.f32 %v1299_v46, %v454_v38  ;;  %v1783_v39 = vadd.f32 %v1751_v14, %v454_v38  ;;  %v2526_v3 = vadd.f32 %v2494_v27, %v454_v38  ;;  %1175 = vperm.xlu1 %4521, %v1076_v8   ;;  %v3172_v62 = vadd.f32 %v3140_v41, %v454_v38 }
 0x13c   : > { %v6157_v59 = vpop.permute.xlu1 %468  ;;  %8527 = vst [vmem:[#allocation118_spill] sm:$0xff] %v6162_v31  ;;  %v1887_v46 = vmul.f32 %v5317_v37, %v5790_v33  ;;  %v2630_v27 = vmul.f32 %v5363_v47, %v5790_v33  ;;  %v6170_v38 = vadd.f32 %v3274_v6, %v3238_v63  ;;  %v6172_v41 = vadd.f32 %v3273_v13, %v3237_v23 }
 0x13d   : > { %8526 = vst [vmem:[#allocation117_spill] sm:$0xff] %v6157_v59  ;;  %v1851_v51 = vadd.f32 %v1819_v57, %v1783_v39  ;;  %v2594_v14 = vadd.f32 %v2562_v1, %v2526_v3  ;;  %v3240_v59 = vadd.f32 %v3208_v43, %v3172_v62  ;;  %v1085_v3 = vld [vmem:[%s8298_s4 + $0xc8] sm:$0xff]  ;;  %v3281_v43 = vmul.f32 %v5368_v48, %v5543_v5 }
 0x13e   : > { %v6168_v8 = vpop.permute.xlu0 %1100  ;;  %8528 = vst [vmem:[#allocation119_spill] sm:$0xff] %v6170_v38  ;;  %8529 = vst [vmem:[#allocation120_spill] sm:$0xff] %v6172_v41  ;;  %v6191_v62 = vrot.slane %v6089_v53, %v5234_v16  ;;  %v6197_v11 = vrot.slane %v6089_v53, %v5306_v34  ;;  %v6213_v34 = vld [vmem:[%s8296_s2 + $0xa8] sm:$0xff]  ;;  %v1820_v53 = vmul.f32 %v5257_v24, %v5479_v28 }
 0x13f   : > { %1215 = vperm.xlu1 %4521, %v1084_v60   ;;  %v6176_v39 = vadd.f32 %v1887_v46, %v1851_v51  ;;  %v6178_v29 = vadd.f32 %v2630_v27, %v2594_v14  ;;  %v6185_v6 = vadd.f32 %v3276_v9, %v3240_v59  ;;  %v6193_v51 = vadd.f32 %v3281_v43, %v3245_v36 }
 0x140   : > { %v6180_v1 = vpop.permute.xlu1 %508  ;;  %v1368_v16 = vmul.f32 %v6191_v62, %v5479_v28  ;;  %v1763_v32 = vmul.f32 %v5243_v20, %v6062_v44  ;;  %v1367_v63 = vmul.f32 %v6191_v62, %v5616_v17  ;;  %v1831_v23 = vmul.f32 %v5257_v24, %v5510_v52 }
 0x141   : > { %8530 = vst [vmem:[#allocation121_spill] sm:$0xff] %v6176_v39  ;;  %8531 = vst [vmem:[#allocation122_spill] sm:$0xff] %v6178_v29  ;;  %v2563_v46 = vmul.f32 %v5260_v25, %v5479_v28  ;;  %v1436_v14 = vmul.f32 %v6197_v11, %v5732_v30  ;;  %v1753_v30 = vmul.f32 %v5243_v20, %v5734_v0 }
 0x142   : > { %8532 = vst [vmem:[#allocation123_spill] sm:$0xff] %v6185_v6  ;;  %v619_v60 = vpop.permute.xlu0 %618  ;;  %8533 = vst [vmem:[#allocation124_spill] sm:$0xff] %v6193_v51  ;;  %v1435_v6 = vmul.f32 %v6197_v11, %v5790_v33 }
 0x143   : > { %v1300_v18 = vmul.f32 %v6113_v19, %v619_v60  ;;  %v1752_v59 = vmul.f32 %v5243_v20, %v619_v60  ;;  %v2495_v58 = vmul.f32 %v5246_v21, %v619_v60  ;;  %1220 = vperm.xlu1 %4521, %v1085_v3   ;;  %v6206_v45 = vmul.f32 %v5249_v22, %v619_v60 }
 0x144   : > { %v6208_v57 = vpop.permute.xlu1 %513 }
 0x145   : > { %v1332_v13 = vadd.f32 %v1300_v18, %v5841_v56  ;;  %v1784_v9 = vadd.f32 %v1752_v59, %v5841_v56  ;;  %v1795_v3 = vadd.f32 %v1763_v32, %v6208_v57  ;;  %v2527_v36 = vadd.f32 %v2495_v58, %v5841_v56 }
 0x146   : > { %v6228_v27 = vpop.permute.xlu0 %658  ;;  %v2496_v18 = vmul.f32 %v5246_v21, %v5734_v0  ;;  %v3142_v59 = vmul.f32 %v5249_v22, %v5734_v0 }
 0x147   : > { %8534 = vst [vmem:[#allocation125_spill] sm:$0xff] %v6228_v27  ;;  %v1760_v17 = vmul.f32 %v5243_v20, %v6228_v27  ;;  %v2503_v43 = vmul.f32 %v5246_v21, %v6228_v27  ;;  %v6242_v60 = vmul.f32 %v5249_v22, %v6228_v27  ;;  %703 = vperm.xlu1 %4521, %v6213_v34  }
 0x148   : > { %v1400_v58 = vadd.f32 %v1368_v16, %v1332_v13  ;;  %v1852_v32 = vadd.f32 %v1820_v53, %v1784_v9  ;;  %v1863_v38 = vadd.f32 %v1831_v23, %v1795_v3  ;;  %v2595_v31 = vadd.f32 %v2563_v46, %v2527_v36  ;;  %v5046_v46 = vld [vmem:[%s8296_s2 + $0xe8] sm:$0xff] }
 0x149   : > { %v6251_v51 = vpop.permute.xlu1 %785  ;;  %v1792_v41 = vadd.f32 %v1760_v17, %v5855_v10  ;;  %v1821_v27 = vmul.f32 %v5257_v24, %v5906_v55  ;;  %v1828_v16 = vmul.f32 %v5257_v24, %v5935_v61  ;;  %v2564_v53 = vmul.f32 %v5260_v25, %v5906_v55 }
 0x14a   : > { %v6256_v29 = vpop.permute.xlu0 %463  ;;  %v6258_v39 = vadd.f32 %v1436_v14, %v1400_v58  ;;  %v1399_v14 = vadd.f32 %v1367_v63, %v6153_v54  ;;  %v1889_v9 = vmul.f32 %v5317_v37, %v6102_v2  ;;  %v6281_v3 = vadd.f32 %v5741_v4, %v1852_v32  ;;  %v6293_v63 = vld [vmem:[%s6269_s26] ss:$0 sm:$0xff] }
 0x14b   : > { %v1785_v33 = vadd.f32 %v1753_v30, %v6256_v29  ;;  %v2528_v13 = vadd.f32 %v2496_v18, %v6256_v29  ;;  %v3174_v23 = vadd.f32 %v3142_v59, %v6256_v29  ;;  %743 = vperm.xlu1 %4521, %v5046_v46   ;;  %v1860_v36 = vadd.f32 %v1828_v16, %v1792_v41 }
 0x14c   : > { %8535 = vst [vmem:[#allocation126_spill] sm:$0xff] %v6258_v39  ;;  %8536 = vst [vmem:[#allocation127_spill] sm:$0xff] %v6281_v3  ;;  %v1896_v17 = vmul.f32 %v5317_v37, %v6124_v35  ;;  %v6288_v59 = vadd.f32 %v5797_v15, %v1863_v38  ;;  %v2632_v54 = vmul.f32 %v5363_v47, %v6102_v2 }
 0x14d   : > { %v6285_v30 = vpop.permute.xlu1 %813  ;;  %v1853_v18 = vadd.f32 %v1821_v27, %v1785_v33  ;;  %v2596_v58 = vadd.f32 %v2564_v53, %v2528_v13  ;;  %v2506_v4 = vmul.f32 %v5246_v21, %v6062_v44  ;;  %v3210_v41 = vmul.f32 %v5263_v26, %v5906_v55 }
 0x14e   : > { %8537 = vst [vmem:[#allocation128_spill] sm:$0xff] %v6288_v59  ;;  %v1111_v46 = vpop.permute.xlu0 %1110  ;;  %v6295_v39 = vadd.f32 %v1896_v17, %v1860_v36  ;;  %v1467_v32 = vadd.f32 %v1435_v6, %v1399_v14  ;;  %v1370_v16 = vmul.f32 %v6191_v62, %v5500_v49  ;;  %v6311_v53 = vadd.f32 %v5745_v12, %v2595_v31 }
 0x14f   : > { %v1262_v27 = vmul.f32 %v6293_v63, %v1111_v46  ;;  %4522 = vset.pattern.permute.xlu1 %v8442_v7  ;;  %v6303_v15 = vadd.f32 %v1889_v9, %v1853_v18  ;;  %v6305_v38 = vadd.f32 %v2632_v54, %v2596_v58  ;;  %v2535_v33 = vadd.f32 %v2503_v43, %v5855_v10 }
 0x150   : > { %8538 = vst [vmem:[#allocation129_spill] sm:$0xff] %v6295_v39  ;;  %961 = vperm.xlu1 %4522, %v5886_v40   ;;  %8541 = vst [vmem:[#allocation132_spill] sm:$0xff] %v6311_v53  ;;  %v2571_v13 = vmul.f32 %v5260_v25, %v5935_v61  ;;  %v1822_v14 = vmul.f32 %v5257_v24, %v5500_v49  ;;  %v2538_v9 = vadd.f32 %v2506_v4, %v6208_v57  ;;  %v8545_v53 = vld [vmem:[#allocation117_spill] sm:$0xff] }
 0x151   : > { %8539 = vst [vmem:[#allocation130_spill] sm:$0xff] %v6303_v15  ;;  %8540 = vst [vmem:[#allocation131_spill] sm:$0xff] %v6305_v38  ;;  %v6316_v6 = vadd.f32 %v1467_v32, %v1262_v27  ;;  %v3242_v36 = vadd.f32 %v3210_v41, %v3174_v23  ;;  %v2565_v31 = vmul.f32 %v5260_v25, %v5500_v49 }
 0x152   : > { %v6321_v40 = vpop.permute.xlu1 %1115  ;;  %v629_v17 = vpop.permute.xlu0 %628  ;;  %v2603_v12 = vadd.f32 %v2571_v13, %v2535_v33  ;;  %v2639_v43 = vmul.f32 %v5363_v47, %v6124_v35  ;;  %v2574_v18 = vmul.f32 %v5260_v25, %v5510_v52  ;;  %v3278_v23 = vmul.f32 %v5368_v48, %v6102_v2 }
 0x153   : > { %8542 = vst [vmem:[#allocation133_spill] sm:$0xff] %v6316_v6  ;;  %8543 = vst [vmem:[#allocation134_spill] sm:$0xff] %v6321_v40  ;;  %v1302_v58 = vmul.f32 %v6113_v19, %v629_v17  ;;  %v1754_v54 = vmul.f32 %v5243_v20, %v629_v17  ;;  %v3209_v46 = vmul.f32 %v5263_v26, %v5479_v28 }
 0x154   : > { %v2497_v4 = vmul.f32 %v5246_v21, %v629_v17  ;;  %v3143_v41 = vmul.f32 %v5249_v22, %v629_v17  ;;  %989 = vperm.xlu1 %4522, %v5724_v42   ;;  %v6338_v27 = vadd.f32 %v2639_v43, %v2603_v12  ;;  %v2606_v32 = vadd.f32 %v2574_v18, %v2538_v9  ;;  %v424_v42 = vld [vmem:[%s8297_s3 + $0xa0] sm:$0xff]  ;;  %v8547_v17 = vld [vmem:[#allocation58_spill] sm:$0xff] }
 0x155   : > { %v1438_v33 = vmul.f32 %v6197_v11, %v5775_v50  ;;  %v1301_v13 = vmul.f32 %v6113_v19, %v5734_v0  ;;  %v1334_v38 = vadd.f32 %v1302_v58, %v8545_v53  ;;  %v1369_v28 = vmul.f32 %v6191_v62, %v5906_v55  ;;  %v8550_v18 = vld [vmem:[#allocation107_spill] sm:$0xff] }
 0x156   : > { %8544 = vst [vmem:[#allocation135_spill] sm:$0xff] %v6338_v27  ;;  %v6347_v59 = vpop.permute.xlu1 %1155  ;;  %v6349_v39 = vpop.permute.xlu0 %668  ;;  %v1786_v9 = vadd.f32 %v1754_v54, %v8545_v53  ;;  %v2529_v50 = vadd.f32 %v2497_v4, %v8545_v53  ;;  %v6357_v12 = vadd.f32 %v8547_v17, %v2606_v32  ;;  %v6359_v0 = vadd.f32 %v3278_v23, %v3242_v36 }
 0x157   : > { %8546 = vst [vmem:[#allocation117_spill] sm:$0xff] %v6347_v59  ;;  %v1333_v43 = vadd.f32 %v1301_v13, %v6256_v29  ;;  %v1762_v55 = vmul.f32 %v5243_v20, %v6349_v39  ;;  %v1755_v58 = vmul.f32 %v5243_v20, %v8550_v18  ;;  %v2498_v27 = vmul.f32 %v5246_v21, %v8550_v18 }
 0x158   : > { %8548 = vst [vmem:[#allocation58_spill] sm:$0xff] %v6357_v12  ;;  %8549 = vst [vmem:[#allocation136_spill] sm:$0xff] %v6359_v0  ;;  %v2505_v54 = vmul.f32 %v5246_v21, %v6349_v39  ;;  %v6372_v4 = vmul.f32 %v5249_v22, %v6349_v39  ;;  %v8551_v36 = vmov 0   ;;  %v1402_v23 = vadd.f32 %v1370_v16, %v1334_v38  ;;  %v432_v38 = vld [vmem:[%s8297_s3 + $0xe0] sm:$0xff] }
 0x159   : > { %4523 = vset.pattern.permute.xlu1 %v8551_v36  ;;  %v1854_v29 = vadd.f32 %v1822_v14, %v1786_v9  ;;  %v3144_v32 = vmul.f32 %v5249_v22, %v8550_v18  ;;  %v1794_v13 = vadd.f32 %v1762_v55, %v6180_v1  ;;  %v1830_v17 = vmul.f32 %v5257_v24, %v6285_v30  ;;  %v8553_v14 = vld [vmem:[#allocation54_spill] sm:$0xff] }
 0x15a   : > { %538 = vperm.xlu1 %4523, %v424_v42   ;;  %v3173_v0 = vadd.f32 %v6206_v45, %v5841_v56  ;;  %v6382_v12 = vpop.permute.xlu1 %1160  ;;  %v474_v3 = vpop.permute.xlu0 %473  ;;  %v6387_v16 = vadd.f32 %v1438_v33, %v1402_v23  ;;  %v2597_v9 = vadd.f32 %v2565_v31, %v2529_v50  ;;  %v2537_v55 = vadd.f32 %v2505_v54, %v6180_v1 }
 0x15b   : > { %8552 = vst [vmem:[#allocation107_spill] sm:$0xff] %v6382_v12  ;;  %v6390_v42 = vadd.f32 %v8553_v14, %v1854_v29  ;;  %v1787_v15 = vadd.f32 %v1755_v58, %v474_v3  ;;  %v1401_v40 = vadd.f32 %v1369_v28, %v1333_v43  ;;  %v1823_v56 = vmul.f32 %v5257_v24, %v6251_v51  ;;  %v433_v43 = vld [vmem:[%s8297_s3 + $0xe8] sm:$0xff] }
 0x15c   : > { %v2566_v45 = vmul.f32 %v5260_v25, %v6251_v51  ;;  %v2530_v12 = vadd.f32 %v2498_v27, %v474_v3  ;;  %v3176_v59 = vadd.f32 %v3144_v32, %v474_v3  ;;  %v6397_v6 = vadd.f32 %v1830_v17, %v1794_v13  ;;  %v8556_v27 = vld [vmem:[#allocation55_spill] sm:$0xff] }
 0x15d   : > { %8554 = vst [vmem:[#allocation54_spill] sm:$0xff] %v6390_v42  ;;  %v2573_v33 = vmul.f32 %v5260_v25, %v6285_v30  ;;  %v1437_v31 = vmul.f32 %v6197_v11, %v6102_v2  ;;  %v1855_v50 = vadd.f32 %v1823_v56, %v1787_v15  ;;  %v6409_v23 = vadd.f32 %v8556_v27, %v2597_v9  ;;  %v8558_v15 = vld [vmem:[#allocation51_spill] sm:$0xff] }
 0x15e   : > { %578 = vperm.xlu1 %4523, %v432_v38   ;;  %v6403_v58 = vpop.permute.xlu1 %683  ;;  %v1121_v28 = vpop.permute.xlu0 %1120  ;;  %v2598_v54 = vadd.f32 %v2566_v45, %v2530_v12  ;;  %v3241_v32 = vadd.f32 %v3209_v46, %v3173_v0  ;;  %v3212_v2 = vmul.f32 %v5263_v26, %v6251_v51  ;;  %v3152_v14 = vmul.f32 %v5249_v22, %v6062_v44  ;;  %v8568_v42 = vld [vmem:[#allocation59_spill] sm:$0xff] }
 0x15f   : > { %8555 = vst [vmem:[#allocation137_spill] sm:$0xff] %v6403_v58  ;;  %8557 = vst [vmem:[#allocation55_spill] sm:$0xff] %v6409_v23  ;;  %v6411_v29 = vadd.f32 %v2573_v33, %v2537_v55  ;;  %v1264_v13 = vmul.f32 %v6293_v63, %v1121_v28  ;;  %v1469_v17 = vadd.f32 %v1437_v31, %v1401_v40  ;;  %v8563_v28 = vmov 1  }
 0x160   : > { %v6417_v38 = vadd.f32 %v8558_v15, %v3241_v32  ;;  %v3244_v12 = vadd.f32 %v3212_v2, %v3176_v59  ;;  %v3175_v9 = vadd.f32 %v3143_v41, %v8545_v53  ;;  %v3181_v40 = vadd.f32 %v6242_v60, %v5855_v10 }
 0x161   : > { %v6421_v56 = vadd.f32 %v1469_v17, %v1264_v13  ;;  %v3184_v0 = vadd.f32 %v3152_v14, %v6208_v57  ;;  %v3211_v33 = vmul.f32 %v5263_v26, %v5500_v49  ;;  %v3217_v59 = vmul.f32 %v5263_v26, %v5935_v61 }
 0x162   : > { %8559 = vst [vmem:[#allocation51_spill] sm:$0xff] %v6417_v38  ;;  %583 = vperm.xlu1 %4523, %v433_v43   ;;  %v6424_v55 = vpop.permute.xlu1 %723  ;;  %v6426_v46 = vpop.permute.xlu0 %678  ;;  %v1303_v53 = vmul.f32 %v6113_v19, %v8550_v18  ;;  %v3220_v31 = vmul.f32 %v5263_v26, %v5510_v52  ;;  %v1765_v18 = vmul.f32 %v5243_v20, %v6403_v58 }
 0x163   : > { %8560 = vst [vmem:[#allocation138_spill] sm:$0xff] %v6421_v56  ;;  %8561 = vst [vmem:[#allocation139_spill] sm:$0xff] %v6424_v55  ;;  %v1764_v45 = vmul.f32 %v5243_v20, %v6426_v46  ;;  %v2507_v41 = vmul.f32 %v5246_v21, %v6426_v46  ;;  %v6443_v60 = vmul.f32 %v5249_v22, %v6426_v46 }
 0x164   : > { %8562 = vst [vmem:[#allocation140_spill] sm:$0xff] %v6426_v46  ;;  %v3243_v43 = vadd.f32 %v3211_v33, %v3175_v9  ;;  %v3249_v49 = vadd.f32 %v3217_v59, %v3181_v40  ;;  %v1335_v27 = vadd.f32 %v1303_v53, %v474_v3  ;;  %v3285_v13 = vmul.f32 %v5368_v48, %v6124_v35  ;;  %v8570_v35 = vld [vmem:[#allocation61_spill] sm:$0xff] }
 0x165   : > { %v3252_v17 = vadd.f32 %v3220_v31, %v3184_v0  ;;  %v2508_v9 = vmul.f32 %v5246_v21, %v6403_v58  ;;  %v3154_v40 = vmul.f32 %v5249_v22, %v6403_v58  ;;  %v3183_v59 = vadd.f32 %v6372_v4, %v6180_v1  ;;  %v8565_v31 = vld [vmem:[#allocation56_spill] sm:$0xff]  ;;  %v8592_v58 = vld [vmem:[#allocation79_spill] sm:$0xff] }
 0x166   : > { %4524 = vset.pattern.permute.xlu1 %v8563_v28  ;;  %v6449_v32 = vpop.permute.xlu0 %718  ;;  %v6477_v38 = vadd.f32 %v8565_v31, %v3243_v43  ;;  %v6479_v23 = vadd.f32 %v3285_v13, %v3249_v49  ;;  %v1371_v10 = vmul.f32 %v6191_v62, %v6251_v51  ;;  %v3219_v43 = vmul.f32 %v5263_v26, %v6285_v30 }
 0x167   : > { %841 = vperm.xlu1 %4524, %v6213_v34   ;;  %8564 = vst [vmem:[#allocation141_spill] sm:$0xff] %v6449_v32  ;;  %v6457_v2 = vmul.f32 %v5243_v20, %v6449_v32  ;;  %v6461_v15 = vmul.f32 %v5246_v21, %v6449_v32  ;;  %v6465_v3 = vmul.f32 %v5249_v22, %v6449_v32  ;;  %v914_v14 = vpop.permute.xlu1 %913 }
 0x168   : > { %v1891_v0 = vmul.f32 %v5317_v37, %v914_v14  ;;  %v2634_v33 = vmul.f32 %v5363_v47, %v914_v14  ;;  %v3280_v53 = vmul.f32 %v5368_v48, %v914_v14  ;;  %8566 = vst [vmem:[#allocation56_spill] sm:$0xff] %v6477_v38  ;;  %8567 = vst [vmem:[#allocation142_spill] sm:$0xff] %v6479_v23 }
 0x169   : > { %v6482_v56 = vadd.f32 %v8568_v42, %v3252_v17  ;;  %v1439_v51 = vmul.f32 %v6197_v11, %v914_v14 }
 0x16a   : > { %v6485_v61 = vpop.permute.xlu0 %523  ;;  %v6489_v32 = vadd.f32 %v1891_v0, %v1855_v50  ;;  %v6491_v4 = vadd.f32 %v2634_v33, %v2598_v54  ;;  %v1078_v50 = vld [vmem:[%s8298_s4 + $0x90] sm:$0xff]  ;;  %v1403_v0 = vadd.f32 %v1371_v10, %v1335_v27  ;;  %v3251_v33 = vadd.f32 %v3219_v43, %v3183_v59 }
 0x16b   : > { %8569 = vst [vmem:[#allocation59_spill] sm:$0xff] %v6482_v56  ;;  %869 = vperm.xlu1 %4524, %v8570_v35   ;;  %8571 = vst [vmem:[#allocation61_spill] sm:$0xff] %v6485_v61  ;;  %v6496_v49 = vadd.f32 %v1765_v18, %v6485_v61  ;;  %v6499_v42 = vadd.f32 %v2508_v9, %v6485_v61  ;;  %v6502_v13 = vadd.f32 %v3154_v40, %v6485_v61  ;;  %v6504_v17 = vpop.permute.xlu1 %941  ;;  %v1086_v27 = vld [vmem:[%s8298_s4 + $0xd0] sm:$0xff] }
 0x16c   : > { %8572 = vst [vmem:[#allocation143_spill] sm:$0xff] %v6489_v32  ;;  %8573 = vst [vmem:[#allocation144_spill] sm:$0xff] %v6491_v4  ;;  %v1898_v54 = vmul.f32 %v5317_v37, %v6504_v17  ;;  %v2641_v18 = vmul.f32 %v5363_v47, %v6504_v17  ;;  %v6514_v9 = vadd.f32 %v3280_v53, %v3244_v12  ;;  %v8580_v43 = vld [vmem:[#allocation21_spill] sm:$0xff] }
 0x16d   : > { %v3287_v40 = vmul.f32 %v5368_v48, %v6504_v17  ;;  %v1471_v38 = vadd.f32 %v1439_v51, %v1403_v0  ;;  %v1832_v51 = vmul.f32 %v5257_v24, %v8580_v43  ;;  %v3221_v4 = vmul.f32 %v5263_v26, %v8580_v43 }
 0x16e   : > { %8574 = vst [vmem:[#allocation145_spill] sm:$0xff] %v6514_v9  ;;  %v1131_v14 = vpop.permute.xlu0 %1130  ;;  %v6520_v31 = vadd.f32 %v1898_v54, %v6397_v6  ;;  %v6523_v56 = vadd.f32 %v2641_v18, %v6411_v29  ;;  %v8584_v9 = vld [vmem:[#allocation71_spill] sm:$0xff] }
 0x16f   : > { %4525 = vset.pattern.permute.xlu1 %v8551_v36  ;;  %v1266_v23 = vmul.f32 %v6293_v63, %v1131_v14  ;;  %v6526_v10 = vadd.f32 %v3287_v40, %v3251_v33  ;;  %v8582_v14 = vld [vmem:[#allocation63_spill] sm:$0xff] }
 0x170   : > { %8575 = vst [vmem:[#allocation146_spill] sm:$0xff] %v6520_v31  ;;  %8576 = vst [vmem:[#allocation147_spill] sm:$0xff] %v6523_v56  ;;  %1185 = vperm.xlu1 %4525, %v1078_v50   ;;  %v6528_v12 = vpop.permute.xlu1 %518  ;;  %v2575_v50 = vmul.f32 %v5260_v25, %v8580_v43 }
 0x171   : > { %8577 = vst [vmem:[#allocation148_spill] sm:$0xff] %v6526_v10  ;;  %8578 = vst [vmem:[#allocation149_spill] sm:$0xff] %v6528_v12  ;;  %v6533_v59 = vadd.f32 %v1471_v38, %v1266_v23  ;;  %v1796_v6 = vadd.f32 %v1764_v45, %v6528_v12  ;;  %v2539_v53 = vadd.f32 %v2507_v41, %v6528_v12  ;;  %v1087_v45 = vld [vmem:[%s8298_s4 + $0xd8] sm:$0xff] }
 0x172   : > { %v6537_v29 = vpop.permute.xlu0 %688  ;;  %v3185_v33 = vadd.f32 %v6443_v60, %v6528_v12  ;;  %v1773_v10 = vmul.f32 %v5243_v20, %v6424_v55 }
 0x173   : > { %8579 = vst [vmem:[#allocation150_spill] sm:$0xff] %v6533_v59  ;;  %v6545_v54 = vmul.f32 %v5243_v20, %v6537_v29  ;;  %v6549_v23 = vmul.f32 %v5246_v21, %v6537_v29  ;;  %v6558_v41 = vmul.f32 %v5249_v22, %v6537_v29  ;;  %v1864_v18 = vadd.f32 %v1832_v51, %v1796_v6  ;;  %v8588_v59 = vld [vmem:[#allocation75_spill] sm:$0xff] }
 0x174   : > { %1225 = vperm.xlu1 %4525, %v1086_v27   ;;  %v6551_v38 = vpop.permute.xlu1 %558  ;;  %v2607_v0 = vadd.f32 %v2575_v50, %v2539_v53  ;;  %v6593_v50 = vld [vmem:[%s8296_s2 + $0xb8] sm:$0xff] }
 0x175   : > { %v6565_v27 = vadd.f32 %v8582_v14, %v1864_v18  ;;  %v3162_v18 = vmul.f32 %v5249_v22, %v6424_v55  ;;  %v8587_v14 = vld [vmem:[#allocation23_spill] sm:$0xff] }
 0x176   : > { %v6562_v40 = vpop.permute.xlu0 %728  ;;  %v6570_v56 = vadd.f32 %v8584_v9, %v2607_v0  ;;  %v2516_v9 = vmul.f32 %v5246_v21, %v6424_v55  ;;  %v2584_v32 = vmul.f32 %v5260_v25, %v8587_v14 }
 0x177   : > { %8581 = vst [vmem:[#allocation151_spill] sm:$0xff] %v6562_v40  ;;  %8583 = vst [vmem:[#allocation63_spill] sm:$0xff] %v6565_v27  ;;  %v6576_v6 = vmul.f32 %v5243_v20, %v6562_v40  ;;  %v6580_v60 = vmul.f32 %v5246_v21, %v6562_v40  ;;  %v6584_v53 = vmul.f32 %v5249_v22, %v6562_v40 }
 0x178   : > { %8585 = vst [vmem:[#allocation71_spill] sm:$0xff] %v6570_v56  ;;  %1230 = vperm.xlu1 %4525, %v1087_v45   ;;  %v6588_v51 = vpop.permute.xlu1 %563  ;;  %v3253_v45 = vadd.f32 %v3221_v4, %v3185_v33  ;;  %v1841_v56 = vmul.f32 %v5257_v24, %v8587_v14  ;;  %v3230_v33 = vmul.f32 %v5263_v26, %v8587_v14 }
 0x179   : > { %8586 = vst [vmem:[#allocation152_spill] sm:$0xff] %v6588_v51  ;;  %v1805_v0 = vadd.f32 %v1773_v10, %v6588_v51  ;;  %v2548_v31 = vadd.f32 %v2516_v9, %v6588_v51  ;;  %v3194_v4 = vadd.f32 %v3162_v18, %v6588_v51  ;;  %v8590_v9 = vld [vmem:[#allocation68_spill] sm:$0xff]  ;;  %v8637_v51 = vld [vmem:[#allocation47_spill] sm:$0xff] }
 0x17a   : > { %v6603_v27 = vpop.permute.xlu0 %533  ;;  %v6606_v40 = vadd.f32 %v8588_v59, %v3253_v45 }
 0x17b   : > { %v1873_v10 = vadd.f32 %v1841_v56, %v1805_v0  ;;  %v2616_v55 = vadd.f32 %v2584_v32, %v2548_v31  ;;  %v3262_v43 = vadd.f32 %v3230_v33, %v3194_v4  ;;  %v5047_v32 = vld [vmem:[%s8296_s2 + $0xf8] sm:$0xff]  ;;  %v1310_v4 = vmul.f32 %v6113_v19, %v6349_v39 }
 0x17c   : > { %8589 = vst [vmem:[#allocation75_spill] sm:$0xff] %v6606_v40  ;;  %713 = vperm.xlu1 %4525, %v6593_v50   ;;  %v8594_v31 = vld [vmem:[#allocation86_spill] sm:$0xff] }
 0x17d   : > { %v6612_v12 = vpop.permute.xlu1 %825  ;;  %v6615_v61 = vadd.f32 %v8590_v9, %v1873_v10  ;;  %v6618_v46 = vadd.f32 %v8592_v58, %v2616_v55  ;;  %v6632_v0 = vadd.f32 %v8594_v31, %v3262_v43 }
 0x17e   : > { %v6620_v59 = vpop.permute.xlu0 %1180  ;;  %v1833_v45 = vmul.f32 %v5257_v24, %v6612_v12  ;;  %v2576_v18 = vmul.f32 %v5260_v25, %v6612_v12  ;;  %v3222_v56 = vmul.f32 %v5263_v26, %v6612_v12 }
 0x17f   : > { %8591 = vst [vmem:[#allocation68_spill] sm:$0xff] %v6615_v61  ;;  %8593 = vst [vmem:[#allocation79_spill] sm:$0xff] %v6618_v46 }
 0x180   : > { %753 = vperm.xlu1 %4525, %v5047_v32   ;;  %8595 = vst [vmem:[#allocation86_spill] sm:$0xff] %v6632_v0  ;;  %v6635_v58 = vadd.f32 %v1833_v45, %v6496_v49  ;;  %v6638_v55 = vadd.f32 %v2576_v18, %v6499_v42  ;;  %v6645_v10 = vadd.f32 %v3222_v56, %v6502_v13 }
 0x181   : > { %v6642_v33 = vpop.permute.xlu1 %853  ;;  %v1804_v49 = vadd.f32 %v6457_v2, %v6551_v38  ;;  %v2547_v42 = vadd.f32 %v6461_v15, %v6551_v38  ;;  %v3193_v18 = vadd.f32 %v6465_v3, %v6551_v38  ;;  %v1311_v2 = vmul.f32 %v6113_v19, %v6062_v44 }
 0x182   : > { %v1840_v9 = vmul.f32 %v5257_v24, %v6642_v33  ;;  %v2583_v43 = vmul.f32 %v5260_v25, %v6642_v33  ;;  %v6651_v32 = vpop.permute.xlu0 %698  ;;  %v3229_v39 = vmul.f32 %v5263_v26, %v6642_v33  ;;  %v1342_v0 = vadd.f32 %v1310_v4, %v6180_v1 }
 0x183   : > { %8596 = vst [vmem:[#allocation153_spill] sm:$0xff] %v6651_v32  ;;  %v6662_v13 = vmul.f32 %v5243_v20, %v6651_v32  ;;  %v6666_v45 = vmul.f32 %v5246_v21, %v6651_v32  ;;  %v6675_v15 = vmul.f32 %v5249_v22, %v6651_v32  ;;  %v1378_v3 = vmul.f32 %v6191_v62, %v6285_v30 }
 0x184   : > { %4526 = vset.pattern.permute.xlu1 %v8442_v7  ;;  %v6677_v56 = vadd.f32 %v1840_v9, %v1804_v49  ;;  %v6679_v31 = vadd.f32 %v2583_v43, %v2547_v42  ;;  %v6682_v40 = vadd.f32 %v3229_v39, %v3193_v18  ;;  %v1343_v44 = vadd.f32 %v1311_v2, %v6208_v57  ;;  %v426_v49 = vld [vmem:[%s8297_s3 + $0xb0] sm:$0xff] }
 0x185   : > { %8597 = vst [vmem:[#allocation154_spill] sm:$0xff] %v6662_v13  ;;  %8598 = vst [vmem:[#allocation155_spill] sm:$0xff] %v6666_v45  ;;  %969 = vperm.xlu1 %4526, %v6213_v34   ;;  %v1446_v9 = vmul.f32 %v6197_v11, %v6504_v17  ;;  %v1379_v17 = vmul.f32 %v6191_v62, %v5510_v52  ;;  %v8606_v39 = vld [vmem:[#allocation57_spill] sm:$0xff]  ;;  %v8625_v45 = vld [vmem:[#allocation8_spill] sm:$0xff] }
 0x186   : > { %8599 = vst [vmem:[#allocation156_spill] sm:$0xff] %v6675_v15  ;;  %v1126_v46 = vpop.permute.xlu1 %1125  ;;  %v6687_v61 = vpop.permute.xlu0 %738 }
 0x187   : > { %8600 = vst [vmem:[#allocation157_spill] sm:$0xff] %v6687_v61  ;;  %v1265_v34 = vmul.f32 %v6293_v63, %v1126_v46  ;;  %v6694_v43 = vmul.f32 %v5243_v20, %v6687_v61  ;;  %v6698_v1 = vmul.f32 %v5246_v21, %v6687_v61  ;;  %v6703_v57 = vmul.f32 %v5249_v22, %v6687_v61 }
 0x188   : > { %v1410_v46 = vadd.f32 %v1378_v3, %v1342_v0  ;;  %v1411_v61 = vadd.f32 %v1379_v17, %v1343_v44  ;;  %v434_v0 = vld [vmem:[%s8297_s3 + $0xf0] sm:$0xff]  ;;  %v435_v44 = vld [vmem:[%s8297_s3 + $0xf8] sm:$0xff] }
 0x189   : > { %8601 = vst [vmem:[#allocation158_spill] sm:$0xff] %v6694_v43  ;;  %8602 = vst [vmem:[#allocation159_spill] sm:$0xff] %v6698_v1  ;;  %997 = vperm.xlu1 %4526, %v8570_v35   ;;  %v6706_v30 = vadd.f32 %v6387_v16, %v1265_v34  ;;  %v1447_v35 = vmul.f32 %v6197_v11, %v8606_v39  ;;  %v8622_v43 = vld [vmem:[#allocation14_spill] sm:$0xff] }
 0x18a   : > { %8603 = vst [vmem:[#allocation160_spill] sm:$0xff] %v6703_v57  ;;  %v1166_v4 = vpop.permute.xlu1 %1165  ;;  %v6713_v42 = vpop.permute.xlu0 %543  ;;  %v1478_v2 = vadd.f32 %v1446_v9, %v1410_v46  ;;  %v8621_v57 = vld [vmem:[#allocation11_spill] sm:$0xff] }
 0x18b   : > { %8604 = vst [vmem:[#allocation161_spill] sm:$0xff] %v6706_v30  ;;  %8605 = vst [vmem:[#allocation162_spill] sm:$0xff] %v6713_v42  ;;  %v1273_v18 = vmul.f32 %v6293_v63, %v1166_v4  ;;  %v1479_v30 = vadd.f32 %v1447_v35, %v1411_v61  ;;  %v1373_v1 = vmul.f32 %v6191_v62, %v8621_v57  ;;  %v8629_v42 = vld [vmem:[#allocation16_spill] sm:$0xff] }
 0x18d   : > { %4527 = vset.pattern.permute.xlu1 %v8551_v36  ;;  %v6719_v16 = vadd.f32 %v1478_v2, %v1273_v18 }
 0x18e   : > { %548 = vperm.xlu1 %4527, %v426_v49   ;;  %v1171_v52 = vpop.permute.xlu1 %1170  ;;  %v6724_v3 = vpop.permute.xlu0 %1190  ;;  %v8611_v49 = vld [vmem:[#allocation106_spill] sm:$0xff] }
 0x18f   : > { %8607 = vst [vmem:[#allocation57_spill] sm:$0xff] %v6719_v16  ;;  %8608 = vst [vmem:[#allocation163_spill] sm:$0xff] %v6724_v3  ;;  %v1274_v34 = vmul.f32 %v6293_v63, %v1171_v52  ;;  %v1296_v61 = vmul.f32 %v6113_v19, %v8611_v49 }
 0x191   : > { %v6727_v39 = vadd.f32 %v1479_v30, %v1274_v34 }
 0x192   : > { %588 = vperm.xlu1 %4527, %v434_v0   ;;  %v6729_v9 = vpop.permute.xlu1 %693  ;;  %v6734_v46 = vpop.permute.xlu0 %708 }
 0x193   : > { %8609 = vst [vmem:[#allocation164_spill] sm:$0xff] %v6727_v39  ;;  %8610 = vst [vmem:[#allocation165_spill] sm:$0xff] %v6734_v46  ;;  %v1767_v17 = vmul.f32 %v5243_v20, %v6729_v9  ;;  %v2510_v4 = vmul.f32 %v5246_v21, %v6729_v9  ;;  %v3156_v30 = vmul.f32 %v5249_v22, %v6729_v9  ;;  %v8615_v39 = vld [vmem:[#allocation10_spill] sm:$0xff] }
 0x194   : > { %v6746_v35 = vmul.f32 %v5243_v20, %v6734_v46  ;;  %v6750_v18 = vmul.f32 %v5246_v21, %v6734_v46  ;;  %v6754_v2 = vmul.f32 %v5249_v22, %v6734_v46  ;;  %v1305_v16 = vmul.f32 %v6113_v19, %v8615_v39 }
 0x195   : > { %v6757_v52 = vadd.f32 %v1767_v17, %v6603_v27  ;;  %v6762_v34 = vadd.f32 %v2510_v4, %v6603_v27  ;;  %v6765_v49 = vadd.f32 %v3156_v30, %v6603_v27 }
 0x196   : > { %8612 = vst [vmem:[#allocation106_spill] sm:$0xff] %v6746_v35  ;;  %8613 = vst [vmem:[#allocation166_spill] sm:$0xff] %v6750_v18  ;;  %593 = vperm.xlu1 %4527, %v435_v44   ;;  %v6759_v0 = vpop.permute.xlu1 %733  ;;  %v6781_v4 = vpop.permute.xlu0 %748  ;;  %v8618_v18 = vld [vmem:[#allocation109_spill] sm:$0xff]  ;;  %v1337_v15 = vadd.f32 %v1305_v16, %v8622_v43  ;;  %v8627_v16 = vld [vmem:[#allocation110_spill] sm:$0xff] }
 0x197   : > { %8614 = vst [vmem:[#allocation167_spill] sm:$0xff] %v6754_v2  ;;  %v6771_v44 = vmul.f32 %v5243_v20, %v6759_v0  ;;  %v6775_v46 = vmul.f32 %v5246_v21, %v6759_v0  ;;  %v6779_v17 = vmul.f32 %v5249_v22, %v6759_v0  ;;  %8616 = vst [vmem:[#allocation10_spill] sm:$0xff] %v6781_v4  ;;  %v8617_v2 = vld [vmem:[#allocation9_spill] sm:$0xff] }
 0x198   : > { %v1364_v30 = vmul.f32 %v6191_v62, %v8617_v2  ;;  %v1328_v35 = vadd.f32 %v1296_v61, %v8618_v18  ;;  %v6788_v39 = vmul.f32 %v5243_v20, %v6781_v4  ;;  %v6792_v3 = vmul.f32 %v5246_v21, %v6781_v4  ;;  %v8624_v61 = vld [vmem:[#allocation108_spill] sm:$0xff] }
 0x199   : > { %v6800_v2 = vmul.f32 %v5249_v22, %v6781_v4  ;;  %v1297_v18 = vmul.f32 %v6113_v19, %v8624_v61  ;;  %v8628_v61 = vld [vmem:[#allocation18_spill] sm:$0xff]  ;;  %v1365_v22 = vmul.f32 %v6191_v62, %v8629_v42  ;;  %v8630_v21 = vld [vmem:[#allocation36_spill] sm:$0xff] }
 0x19a   : > { %8619 = vst [vmem:[#allocation9_spill] sm:$0xff] %v6788_v39  ;;  %8620 = vst [vmem:[#allocation109_spill] sm:$0xff] %v6792_v3  ;;  %4528 = vset.pattern.permute.xlu1 %v8563_v28  ;;  %v1304_v39 = vmul.f32 %v6113_v19, %v8625_v45  ;;  %v8626_v3 = vld [vmem:[#allocation35_spill] sm:$0xff]  ;;  %v1396_v43 = vadd.f32 %v1364_v30, %v1328_v35  ;;  %v1372_v32 = vmul.f32 %v6191_v62, %v8628_v61  ;;  %v8631_v30 = vld [vmem:[#allocation12_spill] sm:$0xff] }
 0x19b   : > { %8623 = vst [vmem:[#allocation11_spill] sm:$0xff] %v6800_v2  ;;  %849 = vperm.xlu1 %4528, %v6593_v50   ;;  %v1432_v13 = vmul.f32 %v6197_v11, %v8626_v3  ;;  %v6809_v57 = vpop.permute.xlu1 %953  ;;  %v1405_v45 = vadd.f32 %v1373_v1, %v1337_v15  ;;  %v1441_v35 = vmul.f32 %v6197_v11, %v8630_v21  ;;  %v8634_v42 = vld [vmem:[#allocation24_spill] sm:$0xff]  ;;  %v8635_v21 = vld [vmem:[#allocation25_spill] sm:$0xff] }
 0x19c   : > { %v1336_v28 = vadd.f32 %v1304_v39, %v8627_v16  ;;  %v1901_v4 = vmul.f32 %v5317_v37, %v6809_v57  ;;  %v2644_v2 = vmul.f32 %v5363_v47, %v6809_v57  ;;  %v3290_v3 = vmul.f32 %v5368_v48, %v6809_v57  ;;  %v6828_v16 = vld [vmem:[%s8296_s2 + $0xf0] sm:$0xff] }
 0x19d   : > { %v1329_v39 = vadd.f32 %v1297_v18, %v8631_v30  ;;  %v1433_v61 = vmul.f32 %v6197_v11, %v8634_v42  ;;  %v1382_v18 = vmul.f32 %v6191_v62, %v8635_v21  ;;  %v1834_v30 = vmul.f32 %v5257_v24, %v8635_v21 }
 0x19e   : > { %v6832_v15 = vadd.f32 %v1901_v4, %v6635_v58  ;;  %v6835_v1 = vadd.f32 %v2644_v2, %v6638_v55  ;;  %v6846_v14 = vadd.f32 %v3290_v3, %v6645_v10  ;;  %v1268_v58 = vmul.f32 %v6293_v63, %v8637_v51  ;;  %v1080_v2 = vld [vmem:[%s8298_s4 + $0xa0] sm:$0xff] }
 0x19f   : > { %877 = vperm.xlu1 %4528, %v6828_v16   ;;  %v6839_v20 = vpop.permute.xlu1 %981  ;;  %v1464_v4 = vadd.f32 %v1432_v13, %v1396_v43  ;;  %v1404_v55 = vadd.f32 %v1372_v32, %v1336_v28  ;;  %v8638_v32 = vld [vmem:[#allocation37_spill] sm:$0xff]  ;;  %v1473_v43 = vadd.f32 %v1441_v35, %v1405_v45  ;;  %v1397_v28 = vadd.f32 %v1365_v22, %v1329_v39 }
 0x1a0   : > { %8632 = vst [vmem:[#allocation14_spill] sm:$0xff] %v6832_v15  ;;  %8633 = vst [vmem:[#allocation108_spill] sm:$0xff] %v6835_v1  ;;  %v1908_v42 = vmul.f32 %v5317_v37, %v6839_v20  ;;  %v1440_v1 = vmul.f32 %v6197_v11, %v5543_v5  ;;  %v1314_v15 = vmul.f32 %v6113_v19, %v6537_v29 }
 0x1a1   : > { %8636 = vst [vmem:[#allocation8_spill] sm:$0xff] %v6846_v14  ;;  %v2651_v10 = vmul.f32 %v5363_v47, %v6839_v20  ;;  %v3297_v51 = vmul.f32 %v5368_v48, %v6839_v20  ;;  %v1259_v13 = vmul.f32 %v6293_v63, %v8638_v32  ;;  %v2577_v5 = vmul.f32 %v5260_v25, %v8635_v21 }
 0x1a2   : > { %v6867_v3 = vadd.f32 %v1908_v42, %v6677_v56  ;;  %v3223_v14 = vmul.f32 %v5263_v26, %v8635_v21  ;;  %v1505_v45 = vadd.f32 %v1473_v43, %v1268_v58  ;;  %v1472_v35 = vadd.f32 %v1440_v1, %v1404_v55  ;;  %v8643_v1 = vld [vmem:[#allocation26_spill] sm:$0xff] }
 0x1a3   : > { %4530 = vset.pattern.permute.xlu1 %v8551_v36  ;;  %v6872_v29 = vadd.f32 %v2651_v10, %v6679_v31  ;;  %v6877_v48 = vadd.f32 %v3297_v51, %v6682_v40  ;;  %v1496_v22 = vadd.f32 %v1464_v4, %v1259_v13  ;;  %v1260_v56 = vmul.f32 %v6293_v63, %v6168_v8  ;;  %v8642_v40 = vld [vmem:[#allocation42_spill] sm:$0xff] }
 0x1a4   : > { %8639 = vst [vmem:[#allocation35_spill] sm:$0xff] %v6867_v3  ;;  %1195 = vperm.xlu1 %4530, %v1080_v2   ;;  %v529_v39 = vpop.permute.xlu1 %528  ;;  %v1088_v2 = vld [vmem:[%s8298_s4 + $0xe0] sm:$0xff]  ;;  %v1267_v58 = vmul.f32 %v6293_v63, %v8642_v40  ;;  %v1465_v4 = vadd.f32 %v1433_v61, %v1397_v28  ;;  %v1391_v55 = vmul.f32 %v6191_v62, %v8643_v1  ;;  %v3911_v43 = vmul.f32 -1.442695, %v1505_v45  ;;  %v8645_v45 = vld [vmem:[#allocation72_spill] sm:$0xff] }
 0x1a5   : > { %8640 = vst [vmem:[#allocation110_spill] sm:$0xff] %v6872_v29  ;;  %8641 = vst [vmem:[#allocation18_spill] sm:$0xff] %v6877_v48  ;;  %v1346_v42 = vadd.f32 %v1314_v15, %v529_v39  ;;  %v1798_v31 = vadd.f32 %v6545_v54, %v529_v39  ;;  %v2541_v10 = vadd.f32 %v6549_v23, %v529_v39  ;;  %v8644_v15 = vld [vmem:[#allocation70_spill] sm:$0xff]  ;;  %v3902_v28 = vmul.f32 -1.442695, %v1496_v22 }
 0x1a6   : > { %v3187_v21 = vadd.f32 %v6558_v41, %v529_v39  ;;  %v1450_v54 = vmul.f32 %v6197_v11, %v8644_v15  ;;  %v1504_v48 = vadd.f32 %v1472_v35, %v1267_v58  ;;  %v1089_v41 = vld [vmem:[%s8298_s4 + $0xe8] sm:$0xff]  ;;  %v1843_v61 = vmul.f32 %v5257_v24, %v8643_v1 }
 0x1a7   : > { %v1414_v8 = vadd.f32 %v1382_v18, %v1346_v42  ;;  %v1866_v51 = vadd.f32 %v1834_v30, %v1798_v31  ;;  %v2609_v32 = vadd.f32 %v2577_v5, %v2541_v10  ;;  %v1497_v39 = vadd.f32 %v1465_v4, %v1260_v56  ;;  %v8648_v56 = vld [vmem:[#allocation99_spill] sm:$0xff]  ;;  %v8650_v31 = vld [vmem:[#allocation74_spill] sm:$0xff] }
 0x1a8   : > { %1235 = vperm.xlu1 %4530, %v1088_v2   ;;  %v3255_v13 = vadd.f32 %v3223_v14, %v3187_v21  ;;  %v6893_v23 = vpop.permute.xlu1 %568  ;;  %v8646_v2 = vld [vmem:[#allocation90_spill] sm:$0xff]  ;;  %4534 = vpow2.f32 %v3911_v43  ;;  %v1459_v10 = vmul.f32 %v6197_v11, %v8650_v31  ;;  %v3910_v21 = vmul.f32 -1.442695, %v1504_v48 }
 0x1a9   : > { %v6902_v18 = vadd.f32 %v6576_v6, %v6893_v23  ;;  %v6906_v14 = vadd.f32 %v6580_v60, %v6893_v23  ;;  %v6910_v30 = vadd.f32 %v6584_v53, %v6893_v23  ;;  %v6912_v5 = vadd.f32 %v1450_v54, %v1414_v8  ;;  %v8659_v31 = vld [vmem:[#allocation102_spill] sm:$0xff] }
 0x1aa   : > { %v6915_v35 = vadd.f32 %v8645_v45, %v1866_v51  ;;  %v6918_v22 = vadd.f32 %v8646_v2, %v2609_v32  ;;  %v1323_v6 = vmul.f32 %v6113_v19, %v6759_v0  ;;  %v2586_v60 = vmul.f32 %v5260_v25, %v8643_v1  ;;  %v8651_v32 = vld [vmem:[#allocation140_spill] sm:$0xff] }
 0x1ab   : > { %v6925_v42 = vadd.f32 %v8648_v56, %v3255_v13  ;;  %v3232_v53 = vmul.f32 %v5263_v26, %v8643_v1  ;;  %v1315_v40 = vmul.f32 %v6113_v19, %v6729_v9  ;;  %4536 = vpow2.f32 %v3902_v28  ;;  %v8652_v1 = vld [vmem:[#allocation137_spill] sm:$0xff] }
 0x1ac   : > { %8647 = vst [vmem:[#allocation16_spill] sm:$0xff] %v6918_v22  ;;  %1240 = vperm.xlu1 %4530, %v1089_v41   ;;  %v574_v58 = vpop.permute.xlu1 %573  ;;  %v3903_v51 = vmul.f32 -1.442695, %v1497_v39  ;;  %v1312_v13 = vmul.f32 %v6113_v19, %v8651_v32  ;;  %v1313_v43 = vmul.f32 %v6113_v19, %v8652_v1  ;;  %v1381_v48 = vmul.f32 %v6191_v62, %v6612_v12  ;;  %v8654_v12 = vld [vmem:[#allocation81_spill] sm:$0xff]  ;;  %v8683_v22 = vld [vmem:[#allocation34_spill] sm:$0xff] }
 0x1ad   : > { %8649 = vst [vmem:[#allocation36_spill] sm:$0xff] %v6925_v42  ;;  %v1355_v0 = vadd.f32 %v1323_v6, %v574_v58  ;;  %v1807_v4 = vadd.f32 %v6771_v44, %v574_v58  ;;  %v2550_v8 = vadd.f32 %v6775_v46, %v574_v58  ;;  %v3196_v15 = vadd.f32 %v6779_v17, %v574_v58  ;;  %v8653_v44 = vld [vmem:[#allocation61_spill] sm:$0xff]  ;;  %v8682_v42 = vld [vmem:[#allocation7_spill] sm:$0xff] }
 0x1ae   : > { %4538 = vpow2.f32 %v3910_v21  ;;  %v1345_v46 = vadd.f32 %v1313_v43, %v8653_v44  ;;  %v1347_v28 = vadd.f32 %v1315_v40, %v6603_v27  ;;  %v1449_v45 = vmul.f32 %v6197_v11, %v6809_v57  ;;  %v8658_v57 = vld [vmem:[#allocation149_spill] sm:$0xff]  ;;  %v8662_v43 = vld [vmem:[#allocation62_spill] sm:$0xff] }
 0x1af   : > { %v1423_v9 = vadd.f32 %v1391_v55, %v1355_v0  ;;  %v1875_v54 = vadd.f32 %v1843_v61, %v1807_v4  ;;  %v2618_v41 = vadd.f32 %v2586_v60, %v2550_v8  ;;  %v3264_v39 = vadd.f32 %v3232_v53, %v3196_v15 }
 0x1b0   : > { %4531 = vset.pattern.permute.xlu1 %v8442_v7  ;;  %v8656_v7 = vld [vmem:[#allocation93_spill] sm:$0xff]  ;;  %4540 = vpow2.f32 %v3903_v51  ;;  %v1413_v56 = vadd.f32 %v1381_v48, %v1345_v46  ;;  %v1344_v53 = vadd.f32 %v1312_v13, %v8658_v57  ;;  %v1276_v4 = vmul.f32 %v6293_v63, %v6620_v59 }
 0x1b1   : > { %977 = vperm.xlu1 %4531, %v6593_v50   ;;  %v834_v17 = vpop.permute.xlu1 %833  ;;  %v6948_v2 = vadd.f32 %v1459_v10, %v1423_v9  ;;  %v6951_v6 = vadd.f32 %v8654_v12, %v1875_v54  ;;  %v6954_v55 = vadd.f32 %v8656_v7, %v2618_v41  ;;  %v6962_v10 = vadd.f32 %v8659_v31, %v3264_v39  ;;  %v8661_v51 = vld [vmem:[#allocation21_spill] sm:$0xff] }
 0x1b2   : > { %v1383_v61 = vmul.f32 %v6191_v62, %v834_v17  ;;  %v1835_v60 = vmul.f32 %v5257_v24, %v834_v17  ;;  %v2578_v27 = vmul.f32 %v5260_v25, %v834_v17  ;;  %v3224_v50 = vmul.f32 %v5263_v26, %v834_v17  ;;  %v4535_v13 = vpop.eup %4534  ;;  %v1082_v59 = vld [vmem:[%s8298_s4 + $0xb0] sm:$0xff] }
 0x1b3   : > { %8655 = vst [vmem:[#allocation12_spill] sm:$0xff] %v6951_v6  ;;  %8657 = vst [vmem:[#allocation24_spill] sm:$0xff] %v6954_v55  ;;  %v1380_v32 = vmul.f32 %v6191_v62, %v8661_v51  ;;  %v1481_v1 = vadd.f32 %v1449_v45, %v1413_v56  ;;  %v1448_v15 = vmul.f32 %v6197_v11, %v8662_v43  ;;  %v8663_v48 = vld [vmem:[#allocation141_spill] sm:$0xff]  ;;  %v8698_v6 = vld [vmem:[#allocation156_spill] sm:$0xff] }
 0x1b4   : > { %8660 = vst [vmem:[#allocation25_spill] sm:$0xff] %v6962_v10  ;;  %v6964_v21 = vadd.f32 %v1383_v61, %v1347_v28  ;;  %v6968_v40 = vadd.f32 %v1835_v60, %v6757_v52  ;;  %v6971_v58 = vadd.f32 %v2578_v27, %v6762_v34  ;;  %v6974_v0 = vadd.f32 %v3224_v50, %v6765_v49  ;;  %v8664_v28 = vld [vmem:[#allocation139_spill] sm:$0xff]  ;;  %v8665_v61 = vld [vmem:[#allocation152_spill] sm:$0xff] }
 0x1b5   : > { %1005 = vperm.xlu1 %4531, %v6828_v16   ;;  %v6978_v8 = vpop.permute.xlu1 %861  ;;  %v4537_v16 = vpop.eup %4536  ;;  %v1320_v9 = vmul.f32 %v6113_v19, %v8663_v48  ;;  %v1412_v54 = vadd.f32 %v1380_v32, %v1344_v53  ;;  %v1321_v39 = vmul.f32 %v6113_v19, %v8664_v28  ;;  %v1388_v45 = vmul.f32 %v6191_v62, %v6642_v33  ;;  %v8666_v53 = vld [vmem:[#allocation23_spill] sm:$0xff] }
 0x1b6   : > { %v1842_v52 = vmul.f32 %v5257_v24, %v6978_v8  ;;  %v2585_v34 = vmul.f32 %v5260_v25, %v6978_v8  ;;  %v3231_v49 = vmul.f32 %v5263_v26, %v6978_v8  ;;  %v1513_v12 = vadd.f32 %v1481_v1, %v1276_v4  ;;  %v8667_v1 = vld [vmem:[#allocation67_spill] sm:$0xff] }
 0x1b7   : > { %v1352_v7 = vadd.f32 %v1320_v9, %v6551_v38  ;;  %v1353_v60 = vadd.f32 %v1321_v39, %v8665_v61  ;;  %v1600_v27 = vadd.f32 1.0, %v4537_v16  ;;  %v1480_v50 = vadd.f32 %v1448_v15, %v1412_v54  ;;  %v1013_v9 = vld [vmem:[%s8300_s6 + $0x8] sm:$0xff] }
 0x1b8   : > { %v6997_v41 = vadd.f32 %v1842_v52, %v6902_v18  ;;  %v7000_v44 = vadd.f32 %v2585_v34, %v6906_v14  ;;  %v7003_v46 = vadd.f32 %v3231_v49, %v6910_v30  ;;  %v4539_v17 = vpop.eup %4538  ;;  %v1090_v18 = vld [vmem:[%s8298_s4 + $0xf0] sm:$0xff]  ;;  %v1456_v14 = vmul.f32 %v6197_v11, %v6839_v20  ;;  %v1091_v20 = vld [vmem:[%s8298_s4 + $0xf8] sm:$0xff] }
 0x1b9   : > { %4533 = vset.pattern.permute.xlu1 %v8551_v36  ;;  %v1608_v56 = vadd.f32 1.0, %v4539_v17  ;;  %v1420_v57 = vadd.f32 %v1388_v45, %v1352_v7  ;;  %v1389_v31 = vmul.f32 %v6191_v62, %v8666_v53  ;;  %v3919_v4 = vmul.f32 -1.442695, %v1513_v12  ;;  %v1015_v45 = vld [vmem:[%s8300_s6 + $0x18] sm:$0xff]  ;;  %v8668_v17 = vld [vmem:[#allocation4_spill] sm:$0xff] }
 0x1ba   : > { %1205 = vperm.xlu1 %4533, %v1082_v59   ;;  %v1176_v36 = vpop.permute.xlu1 %1175  ;;  %v4541_v33 = vpop.eup %4540  ;;  %v1457_v38 = vmul.f32 %v6197_v11, %v8667_v1  ;;  %v1609_v59 = vadd.f32 1.0, %v4535_v13  ;;  %4542 = vrcp.f32 %v1600_v27  ;;  %v8672_v27 = vld [vmem:[#allocation19_spill] sm:$0xff] }
 0x1bb   : > { %v1275_v30 = vmul.f32 %v6293_v63, %v1176_v36  ;;  %v1488_v34 = vadd.f32 %v1456_v14, %v1420_v57  ;;  %v1421_v49 = vadd.f32 %v1389_v31, %v1353_v60  ;;  %4544 = vrcp.f32 %v1608_v56  ;;  %v8669_v36 = vld [vmem:[#allocation5_spill] sm:$0xff]  ;;  %v1017_v56 = vld [vmem:[%s8300_s6 + $0x28] sm:$0xff] }
 0x1bc   : > { %v1601_v16 = vadd.f32 1.0, %v4541_v33  ;;  %4546 = vpow2.f32 %v3919_v4 }
 0x1bd   : > { %v1512_v51 = vadd.f32 %v1480_v50, %v1275_v30  ;;  %v1489_v28 = vadd.f32 %v1457_v38, %v1421_v49  ;;  %v8671_v30 = vld [vmem:[#allocation162_spill] sm:$0xff]  ;;  %v1298_v50 = vmul.f32 %v6113_v19, %v8672_v27  ;;  %v8674_v38 = vld [vmem:[#allocation27_spill] sm:$0xff] }
 0x1be   : > { %1245 = vperm.xlu1 %4533, %v1090_v18   ;;  %v1216_v32 = vpop.permute.xlu1 %1215 }
 0x1bf   : > { %v1283_v52 = vmul.f32 %v6293_v63, %v1216_v32  ;;  %v3918_v15 = vmul.f32 -1.442695, %v1512_v51 }
 0x1c1   : > { %v1520_v43 = vadd.f32 %v1488_v34, %v1283_v52  ;;  %v1330_v52 = vadd.f32 %v1298_v50, %v8674_v38 }
 0x1c2   : > { %1250 = vperm.xlu1 %4533, %v1091_v20   ;;  %v1221_v48 = vpop.permute.xlu1 %1220  ;;  %v8673_v20 = vld [vmem:[#allocation13_spill] sm:$0xff] }
 0x1c3   : > { %4548 = vtanh.f32 %v1520_v43  ;;  %v1284_v54 = vmul.f32 %v6293_v63, %v1221_v48  ;;  %v8670_v63 = vld [vmem:[#allocation6_spill] sm:$0xff]  ;;  %v1366_v1 = vmul.f32 %v6191_v62, %v8673_v20  ;;  %v8676_v43 = vld [vmem:[#allocation20_spill] sm:$0xff] }
 0x1c4   : > { %4550 = vrcp.f32 %v1609_v59  ;;  %v4543_v60 = vpop.eup %4542  ;;  %v8675_v59 = vld [vmem:[#allocation15_spill] sm:$0xff] }
 0x1c5   : > { %4552 = vrcp.f32 %v1601_v16  ;;  %v1521_v39 = vadd.f32 %v1489_v28, %v1284_v54  ;;  %v4545_v53 = vpop.eup %4544  ;;  %v1375_v16 = vmul.f32 %v6191_v62, %v8675_v59  ;;  %v8677_v28 = vld [vmem:[#allocation22_spill] sm:$0xff]  ;;  %v8679_v59 = vld [vmem:[#allocation29_spill] sm:$0xff] }
 0x1c6   : > { %1027 = vperm.xlu1 %4533, %v1013_v9   ;;  %4554 = vpow2.f32 %v3918_v15  ;;  %v7029_v13 = vpop.permute.xlu1 %703  ;;  %v4547_v32 = vpop.eup %4546  ;;  %v1306_v15 = vmul.f32 %v6113_v19, %v8676_v43  ;;  %v1019_v9 = vld [vmem:[%s8300_s6 + $0x38] sm:$0xff]  ;;  %v8680_v43 = vld [vmem:[#allocation31_spill] sm:$0xff] }
 0x1c7   : > { %4556 = vtanh.f32 %v1521_v39  ;;  %v1769_v12 = vmul.f32 %v8668_v17, %v7029_v13  ;;  %v2512_v18 = vmul.f32 %v8669_v36, %v7029_v13  ;;  %v3158_v14 = vmul.f32 %v8670_v63, %v7029_v13 }
 0x1c8   : > { %v1307_v39 = vmul.f32 %v6113_v19, %v8677_v28 }
 0x1c9   : > { %v7041_v7 = vadd.f32 %v1769_v12, %v8671_v30  ;;  %v7044_v61 = vadd.f32 %v2512_v18, %v8671_v30  ;;  %v7054_v57 = vadd.f32 %v3158_v14, %v8671_v30  ;;  %v8678_v18 = vld [vmem:[#allocation28_spill] sm:$0xff] }
 0x1ca   : > { %1037 = vperm.xlu1 %4533, %v1015_v45   ;;  %v7048_v33 = vpop.permute.xlu1 %743  ;;  %v1680_v45 = vmul.f32 0.0, %v4545_v53  ;;  %v1384_v14 = vmul.f32 %v6191_v62, %v8678_v18  ;;  %v1836_v27 = vmul.f32 %v5257_v24, %v8678_v18  ;;  %v1338_v53 = vadd.f32 %v1306_v15, %v8679_v59 }
 0x1cb   : > { %v7058_v31 = vmul.f32 %v8668_v17, %v7048_v33  ;;  %v7062_v4 = vmul.f32 %v8669_v36, %v7048_v33  ;;  %v7066_v51 = vmul.f32 %v8670_v63, %v7048_v33  ;;  %v1339_v28 = vadd.f32 %v1307_v39, %v8680_v43 }
 0x1cc   : > { %v1374_v15 = vmul.f32 %v6191_v62, %v8683_v22 }
 0x1cd   : > { %v4549_v34 = vpop.eup %4548 }
 0x1ce   : > { %1047 = vperm.xlu1 %4533, %v1017_v56   ;;  %v4551_v49 = vpop.eup %4550  ;;  %v1688_v48 = vmul.f32 %v4549_v34, %v4543_v60  ;;  %v1398_v56 = vadd.f32 %v1366_v1, %v1330_v52  ;;  %v1617_v60 = vadd.f32 1.0, %v4547_v32  ;;  %v2579_v52 = vmul.f32 %v5260_v25, %v8678_v18 }
 0x1cf   : > { %v4553_v54 = vpop.eup %4552  ;;  %v7080_v12 = vpop.permute.xlu1 %961  ;;  %v1681_v29 = vmul.f32 0.0, %v4551_v49  ;;  %v8686_v49 = vld [vmem:[#allocation41_spill] sm:$0xff] }
 0x1d0   : > { %v4555_v50 = vpop.eup %4554  ;;  %v1903_v20 = vmul.f32 %v5317_v37, %v7080_v12  ;;  %v2646_v38 = vmul.f32 %v5363_v47, %v7080_v12  ;;  %v7092_v10 = vadd.f32 %v1688_v48, %v1680_v45  ;;  %v3292_v55 = vmul.f32 %v8682_v42, %v7080_v12 }
 0x1d1   : > { %v4557_v34 = vpop.eup %4556  ;;  %v1616_v59 = vadd.f32 1.0, %v4555_v50  ;;  %4558 = vrcp.f32 %v1617_v60  ;;  %v8688_v50 = vld [vmem:[#allocation88_spill] sm:$0xff] }
 0x1d2   : > { %8681 = vst [vmem:[#allocation47_spill] sm:$0xff] %v7092_v10  ;;  %1057 = vperm.xlu1 %4533, %v1019_v9   ;;  %v1689_v1 = vmul.f32 %v4557_v34, %v4553_v54  ;;  %v7097_v32 = vadd.f32 %v1903_v20, %v6968_v40  ;;  %v7106_v48 = vadd.f32 %v2646_v38, %v6971_v58  ;;  %4560 = vtanh.f32 %v7092_v10  ;;  %v8689_v60 = vld [vmem:[#allocation60_spill] sm:$0xff]  ;;  %v8691_v34 = vld [vmem:[#allocation153_spill] sm:$0xff] }
 0x1d3   : > { %v7103_v39 = vpop.permute.xlu1 %989  ;;  %v7109_v9 = vadd.f32 %v3292_v55, %v6974_v0  ;;  %v1434_v54 = vmul.f32 %v6197_v11, %v8686_v49  ;;  %v3225_v58 = vmul.f32 %v5263_v26, %v8678_v18  ;;  %v7125_v0 = vld [vmem:[%s6269_s26] ss:$0 sm:$0xff]  ;;  %v1442_v20 = vmul.f32 %v6197_v11, %v8689_v60  ;;  %v8694_v49 = vld [vmem:[#allocation46_spill] sm:$0xff]  ;;  %v8695_v60 = vld [vmem:[#allocation96_spill] sm:$0xff] }
 0x1d4   : > { %8684 = vst [vmem:[#allocation37_spill] sm:$0xff] %v7106_v48  ;;  %v7113_v40 = vadd.f32 %v1689_v1, %v1681_v29  ;;  %v1910_v45 = vmul.f32 %v5317_v37, %v7103_v39  ;;  %v2653_v22 = vmul.f32 %v5363_v47, %v7103_v39  ;;  %v3299_v55 = vmul.f32 %v8682_v42, %v7103_v39 }
 0x1d5   : > { %8685 = vst [vmem:[#allocation42_spill] sm:$0xff] %v7109_v9  ;;  %v1261_v29 = vmul.f32 %v7125_v0, %v8688_v50  ;;  %v1316_v43 = vmul.f32 %v6113_v19, %v8691_v34  ;;  %v1443_v50 = vmul.f32 %v6197_v11, %v8694_v49  ;;  %v1466_v9 = vadd.f32 %v1434_v54, %v1398_v56  ;;  %v8697_v34 = vld [vmem:[#allocation155_spill] sm:$0xff] }
 0x1d6   : > { %8687 = vst [vmem:[#allocation26_spill] sm:$0xff] %v7113_v40  ;;  %4562 = vtanh.f32 %v7113_v40  ;;  %v7133_v38 = vadd.f32 %v1910_v45, %v6997_v41  ;;  %v7138_v18 = vadd.f32 %v2653_v22, %v7000_v44  ;;  %v7141_v1 = vadd.f32 %v3299_v55, %v7003_v46  ;;  %v8696_v40 = vld [vmem:[#allocation154_spill] sm:$0xff]  ;;  %v8699_v46 = vld [vmem:[#allocation105_spill] sm:$0xff] }
 0x1d7   : > { %4564 = vrcp.f32 %v1616_v59  ;;  %v1269_v48 = vmul.f32 %v7125_v0, %v8695_v60  ;;  %v1406_v10 = vadd.f32 %v1374_v15, %v1338_v53  ;;  %v1498_v22 = vadd.f32 %v1466_v9, %v1261_v29  ;;  %v8700_v60 = vld [vmem:[#allocation76_spill] sm:$0xff]  ;;  %v8705_v29 = vld [vmem:[#allocation91_spill] sm:$0xff] }
 0x1d8   : > { %8690 = vst [vmem:[#allocation70_spill] sm:$0xff] %v7133_v38  ;;  %8692 = vst [vmem:[#allocation72_spill] sm:$0xff] %v7138_v18  ;;  %v1270_v55 = vmul.f32 %v7125_v0, %v8699_v46  ;;  %v1452_v53 = vmul.f32 %v6197_v11, %v8700_v60 }
 0x1d9   : > { %8693 = vst [vmem:[#allocation90_spill] sm:$0xff] %v7141_v1  ;;  %v539_v41 = vpop.permute.xlu1 %538  ;;  %v1474_v18 = vadd.f32 %v1442_v20, %v1406_v10  ;;  %v1407_v1 = vadd.f32 %v1375_v16, %v1339_v28  ;;  %v8702_v10 = vld [vmem:[#allocation159_spill] sm:$0xff]  ;;  %v8703_v16 = vld [vmem:[#allocation160_spill] sm:$0xff]  ;;  %v3904_v28 = vmul.f32 -1.442695, %v1498_v22 }
 0x1da   : > { %v1348_v45 = vadd.f32 %v1316_v43, %v539_v41  ;;  %v1800_v38 = vadd.f32 %v8696_v40, %v539_v41  ;;  %v2543_v59 = vadd.f32 %v8697_v34, %v539_v41  ;;  %v3189_v44 = vadd.f32 %v8698_v6, %v539_v41  ;;  %v8701_v34 = vld [vmem:[#allocation158_spill] sm:$0xff] }
 0x1db   : > { %v1506_v15 = vadd.f32 %v1474_v18, %v1269_v48  ;;  %v1475_v40 = vadd.f32 %v1443_v50, %v1407_v1  ;;  %v8704_v48 = vld [vmem:[#allocation80_spill] sm:$0xff]  ;;  %v1325_v1 = vmul.f32 %v6113_v19, %v7048_v33  ;;  %v8707_v50 = vld [vmem:[#allocation30_spill] sm:$0xff]  ;;  %4566 = vpow2.f32 %v3904_v28  ;;  %v8712_v28 = vld [vmem:[#allocation85_spill] sm:$0xff] }
 0x1dc   : > { %v1416_v49 = vadd.f32 %v1384_v14, %v1348_v45  ;;  %v1868_v56 = vadd.f32 %v1836_v27, %v1800_v38  ;;  %v2611_v54 = vadd.f32 %v2579_v52, %v2543_v59  ;;  %v3257_v3 = vadd.f32 %v3225_v58, %v3189_v44  ;;  %v4559_v27 = vpop.eup %4558  ;;  %v8708_v45 = vld [vmem:[#allocation100_spill] sm:$0xff] }
 0x1dd   : > { %v7154_v43 = vpop.permute.xlu1 %578  ;;  %v4561_v38 = vpop.eup %4560  ;;  %v1507_v18 = vadd.f32 %v1475_v40, %v1270_v55  ;;  %v1393_v41 = vmul.f32 %v6191_v62, %v8707_v50  ;;  %v3912_v22 = vmul.f32 -1.442695, %v1506_v15  ;;  %v3234_v55 = vmul.f32 %v5263_v26, %v8707_v50  ;;  %v8710_v40 = vld [vmem:[#allocation84_spill] sm:$0xff] }
 0x1de   : > { %v7158_v6 = vadd.f32 %v8701_v34, %v7154_v43  ;;  %v7162_v9 = vadd.f32 %v8702_v10, %v7154_v43  ;;  %v7166_v14 = vadd.f32 %v8703_v16, %v7154_v43  ;;  %v7168_v52 = vadd.f32 %v1452_v53, %v1416_v49 }
 0x1df   : > { %v7171_v58 = vadd.f32 %v8704_v48, %v1868_v56  ;;  %v7174_v20 = vadd.f32 %v8705_v29, %v2611_v54  ;;  %v7181_v59 = vadd.f32 %v8708_v45, %v3257_v3  ;;  %v1845_v49 = vmul.f32 %v5257_v24, %v8707_v50 }
 0x1e0   : > { %v4563_v44 = vpop.eup %4562  ;;  %v2588_v56 = vmul.f32 %v5260_v25, %v8707_v50  ;;  %v1461_v15 = vmul.f32 %v6197_v11, %v8710_v40  ;;  %v3913_v16 = vmul.f32 -1.442695, %v1507_v18  ;;  %4568 = vpow2.f32 %v3912_v22 }
 0x1e1   : > { %8706 = vst [vmem:[#allocation99_spill] sm:$0xff] %v7174_v20  ;;  %8709 = vst [vmem:[#allocation74_spill] sm:$0xff] %v7181_v59  ;;  %v584_v46 = vpop.permute.xlu1 %583  ;;  %v4565_v54 = vpop.eup %4564  ;;  %v7196_v10 = vmul.f32 %v4563_v44, %v4559_v27  ;;  %v8714_v27 = vld [vmem:[#allocation94_spill] sm:$0xff]  ;;  %v1451_v18 = vmul.f32 %v6197_v11, %v7080_v12  ;;  %v356_v12 = vld [vmem:[%s8295_s1 + $0x80] sm:$0xff] }
 0x1e2   : > { %v1357_v33 = vadd.f32 %v1325_v1, %v584_v46  ;;  %v1809_v60 = vadd.f32 %v7058_v31, %v584_v46  ;;  %v2552_v53 = vadd.f32 %v7062_v4, %v584_v46  ;;  %v3198_v3 = vadd.f32 %v7066_v51, %v584_v46  ;;  %v8711_v1 = vld [vmem:[#allocation133_spill] sm:$0xff]  ;;  %4263 = vmatprep.mubr.msk.f32.mxu1 %vm1948_vm0, %v356_v12 }
 0x1e3   : > { %v7194_v34 = vmul.f32 %v4565_v54, %v4561_v38  ;;  %v3905_v45 = vmul.f32 -1.442695, %v8711_v1  ;;  %4570 = vpow2.f32 %v3913_v16  ;;  %v1483_v40 = vadd.f32 %v1451_v18, %v6964_v21 }
 0x1e4   : > { %v1425_v48 = vadd.f32 %v1393_v41, %v1357_v33  ;;  %v1877_v29 = vadd.f32 %v1845_v49, %v1809_v60  ;;  %v2620_v50 = vadd.f32 %v2588_v56, %v2552_v53  ;;  %v3266_v4 = vadd.f32 %v3234_v55, %v3198_v3  ;;  %v7222_v56 = vld [vmem:[%s8295_s1] sm:$0xff] }
 0x1e5   : > { %v4415_v31 = vpack.c.bf16 %v7196_v10, %v7194_v34  ;;  %v8716_v55 = vld [vmem:[#allocation103_spill] sm:$0xff]  ;;  %4572 = vpow2.f32 %v3905_v45  ;;  %4239 = vmatprep.mubr.msk.f32.mxu0 %vm1948_vm0, %v7222_v56 }
 0x1e6   : > { %v7201_v51 = vpop.permute.xlu1 %841  ;;  %v7203_v46 = vadd.f32 %v1461_v15, %v1425_v48  ;;  %v7206_v38 = vadd.f32 %v8712_v28, %v1877_v29  ;;  %v7209_v44 = vadd.f32 %v8714_v27, %v2620_v50  ;;  %v7228_v54 = vadd.f32 %v8716_v55, %v3266_v4  ;;  %v4567_v29 = vpop.eup %4566  ;;  %v8719_v50 = vld [vmem:[#allocation163_spill] sm:$0xff] }
 0x1e7   : > { %v1837_v41 = vmul.f32 %v5257_v24, %v7201_v51  ;;  %v2580_v22 = vmul.f32 %v5260_v25, %v7201_v51  ;;  %v3226_v49 = vmul.f32 %v5263_v26, %v7201_v51  ;;  %4416 = vmatprep.subr.bf16.mxu0 %v4415_v31  ;;  %4463 = vmatprep.subr.bf16.mxu1 %v4415_v31 }
 0x1e8   : > { %8713 = vst [vmem:[#allocation140_spill] sm:$0xff] %v7206_v38  ;;  %8715 = vst [vmem:[#allocation137_spill] sm:$0xff] %v7209_v44  ;;  %4418 = vmatpush3.bf16.msra.mxu0 %v4415_v31  ;;  %4467 = vmatpush3.bf16.msra.mxu1 %v4415_v31  ;;  %v1278_v1 = vmul.f32 %v7125_v0, %v8719_v50  ;;  %v1390_v31 = vmul.f32 %v6191_v62, %v6978_v8 }
 0x1e9   : > { %8717 = vst [vmem:[#allocation61_spill] sm:$0xff] %v7228_v54  ;;  %v7233_v33 = vadd.f32 %v1837_v41, %v7041_v7  ;;  %v7236_v60 = vadd.f32 %v2580_v22, %v7044_v61  ;;  %v7242_v3 = vadd.f32 %v3226_v49, %v7054_v57  ;;  %v8718_v61 = vld [vmem:[#allocation151_spill] sm:$0xff]  ;;  %v1458_v41 = vmul.f32 %v6197_v11, %v7103_v39 }
 0x1ea   : > { %v7238_v53 = vpop.permute.xlu1 %869  ;;  %v1322_v48 = vmul.f32 %v6113_v19, %v8718_v61  ;;  %v4569_v4 = vpop.eup %4568  ;;  %v1515_v28 = vadd.f32 %v1483_v40, %v1278_v1  ;;  %v1602_v22 = vadd.f32 1.0, %v4567_v29 }
 0x1eb   : > { %v1844_v15 = vmul.f32 %v5257_v24, %v7238_v53  ;;  %v2587_v16 = vmul.f32 %v5260_v25, %v7238_v53  ;;  %v3233_v7 = vmul.f32 %v5263_v26, %v7238_v53 }
 0x1ec   : > { %v1354_v18 = vadd.f32 %v1322_v48, %v6893_v23  ;;  %4574 = vrcp.f32 %v1602_v22 }
 0x1ed   : > { %v7256_v57 = vadd.f32 %v1844_v15, %v7158_v6  ;;  %v7259_v21 = vadd.f32 %v2587_v16, %v7162_v9  ;;  %v7262_v45 = vadd.f32 %v3233_v7, %v7166_v14  ;;  %v4571_v49 = vpop.eup %4570  ;;  %v1610_v9 = vadd.f32 1.0, %v4569_v4 }
 0x1ee   : > { %v1422_v12 = vadd.f32 %v1390_v31, %v1354_v18  ;;  %v3921_v14 = vmul.f32 -1.442695, %v1515_v28  ;;  %v1611_v7 = vadd.f32 1.0, %v4571_v49  ;;  %v8720_v18 = vld [vmem:[#allocation125_spill] sm:$0xff] }
 0x1ef   : > { %v1186_v27 = vpop.permute.xlu1 %1185  ;;  %v4573_v55 = vpop.eup %4572  ;;  %4576 = vrcp.f32 %v1610_v9 }
 0x1f0   : > { %v1277_v6 = vmul.f32 %v7125_v0, %v1186_v27  ;;  %v1490_v40 = vadd.f32 %v1458_v41, %v1422_v12  ;;  %v1603_v23 = vadd.f32 1.0, %v4573_v55  ;;  %4578 = vpow2.f32 %v3921_v14 }
 0x1f1   : > { %v1308_v41 = vmul.f32 %v6113_v19, %v8720_v18 }
 0x1f2   : > { %v1514_v15 = vadd.f32 %v6912_v5, %v1277_v6 }
 0x1f3   : > { %v1226_v16 = vpop.permute.xlu1 %1225 }
 0x1f4   : > { %v1285_v8 = vmul.f32 %v7125_v0, %v1226_v16  ;;  %v3920_v39 = vmul.f32 -1.442695, %v1514_v15  ;;  %v8721_v16 = vld [vmem:[#allocation17_spill] sm:$0xff] }
 0x1f6   : > { %v1522_v61 = vadd.f32 %v1490_v40, %v1285_v8  ;;  %v4575_v28 = vpop.eup %4574  ;;  %v1377_v8 = vmul.f32 %v6191_v62, %v8721_v16 }
 0x1f7   : > { %v1231_v48 = vpop.permute.xlu1 %1230 }
 0x1f8   : > { %4580 = vtanh.f32 %v1522_v61  ;;  %v1286_v29 = vmul.f32 %v7125_v0, %v1231_v48 }
 0x1f9   : > { %4582 = vrcp.f32 %v1611_v7  ;;  %v8722_v7 = vld [vmem:[#allocation69_spill] sm:$0xff] }
 0x1fa   : > { %4584 = vrcp.f32 %v1603_v23  ;;  %v1523_v50 = vadd.f32 %v6948_v2, %v1286_v29  ;;  %v4577_v2 = vpop.eup %4576 }
 0x1fb   : > { %4586 = vpow2.f32 %v3920_v39  ;;  %v7274_v5 = vpop.permute.xlu1 %713  ;;  %v4579_v9 = vpop.eup %4578  ;;  %v1682_v40 = vmul.f32 0.0, %v4577_v2  ;;  %v8725_v2 = vld [vmem:[#allocation83_spill] sm:$0xff] }
 0x1fc   : > { %4588 = vtanh.f32 %v1523_v50  ;;  %v7278_v1 = vmul.f32 %v8668_v17, %v7274_v5  ;;  %v7282_v31 = vmul.f32 %v8669_v36, %v7274_v5  ;;  %v7286_v4 = vmul.f32 %v8670_v63, %v7274_v5 }
 0x1fd   : > { %v1619_v48 = vadd.f32 1.0, %v4579_v9 }
 0x1ff   : > { %v7288_v27 = vpop.permute.xlu1 %753  ;;  %4590 = vrcp.f32 %v1619_v48 }
 0x200   : > { %v7294_v6 = vmul.f32 %v8668_v17, %v7288_v27  ;;  %v7298_v22 = vmul.f32 %v8669_v36, %v7288_v27  ;;  %v7302_v49 = vmul.f32 %v8670_v63, %v7288_v27  ;;  %v1340_v17 = vadd.f32 %v1308_v41, %v8722_v7  ;;  %v8723_v36 = vld [vmem:[#allocation53_spill] sm:$0xff] }
 0x201   : > { %v1309_v39 = vmul.f32 %v6113_v19, %v8723_v36  ;;  %v1376_v41 = vmul.f32 %v6191_v62, %v8725_v2  ;;  %v8727_v7 = vld [vmem:[#allocation73_spill] sm:$0xff] }
 0x202   : > { %v4581_v12 = vpop.eup %4580 }
 0x203   : > { %v4583_v55 = vpop.eup %4582  ;;  %v1690_v14 = vmul.f32 %v4581_v12, %v4575_v28  ;;  %v8724_v28 = vld [vmem:[#allocation52_spill] sm:$0xff]  ;;  %v1341_v9 = vadd.f32 %v1309_v39, %v8727_v7  ;;  %v1408_v44 = vadd.f32 %v1376_v41, %v1340_v17  ;;  %v8733_v17 = vld [vmem:[#allocation134_spill] sm:$0xff]  ;;  %v8737_v41 = vld [vmem:[#allocation107_spill] sm:$0xff] }
 0x204   : > { %v4585_v15 = vpop.eup %4584  ;;  %v7307_v23 = vpop.permute.xlu1 %969  ;;  %v1445_v18 = vmul.f32 %v6197_v11, %v8724_v28  ;;  %v1683_v36 = vmul.f32 0.0, %v4583_v55  ;;  %v8732_v55 = vld [vmem:[#allocation117_spill] sm:$0xff] }
 0x205   : > { %v4587_v61 = vpop.eup %4586  ;;  %v1905_v63 = vmul.f32 %v5317_v37, %v7307_v23  ;;  %v2648_v29 = vmul.f32 %v5363_v47, %v7307_v23  ;;  %v7319_v12 = vadd.f32 %v1690_v14, %v1682_v40  ;;  %v3294_v16 = vmul.f32 %v8682_v42, %v7307_v23  ;;  %v8730_v40 = vld [vmem:[#allocation115_spill] sm:$0xff] }
 0x206   : > { %v4589_v50 = vpop.eup %4588  ;;  %v1618_v20 = vadd.f32 1.0, %v4587_v61  ;;  %v1444_v2 = vmul.f32 %v6197_v11, %v8730_v40  ;;  %v1263_v61 = vmul.f32 %v7125_v0, %v8733_v17  ;;  %v1409_v48 = vadd.f32 %v1377_v8, %v1341_v9 }
 0x207   : > { %8726 = vst [vmem:[#allocation81_spill] sm:$0xff] %v7319_v12  ;;  %v1691_v54 = vmul.f32 %v4589_v50, %v4585_v15  ;;  %v7325_v59 = vadd.f32 %v1905_v63, %v7233_v33  ;;  %v7330_v28 = vadd.f32 %v2648_v29, %v7236_v60  ;;  %v7333_v14 = vadd.f32 %v3294_v16, %v7242_v3 }
 0x208   : > { %v7327_v38 = vpop.permute.xlu1 %997  ;;  %v1271_v15 = vmul.f32 %v7125_v0, %v8732_v55  ;;  %4592 = vtanh.f32 %v7319_v12  ;;  %v1476_v63 = vadd.f32 %v1444_v2, %v1408_v44  ;;  %v1272_v16 = vmul.f32 %v7125_v0, %v8737_v41  ;;  %v8741_v2 = vld [vmem:[#allocation167_spill] sm:$0xff]  ;;  %v8742_v55 = vld [vmem:[#allocation126_spill] sm:$0xff] }
 0x209   : > { %8728 = vst [vmem:[#allocation93_spill] sm:$0xff] %v7330_v28  ;;  %8729 = vst [vmem:[#allocation149_spill] sm:$0xff] %v7333_v14  ;;  %v7337_v39 = vadd.f32 %v1691_v54, %v1683_v36  ;;  %v1912_v33 = vmul.f32 %v5317_v37, %v7327_v38  ;;  %v2655_v60 = vmul.f32 %v5363_v47, %v7327_v38  ;;  %v8738_v36 = vld [vmem:[#allocation32_spill] sm:$0xff] }
 0x20a   : > { %v3301_v3 = vmul.f32 %v8682_v42, %v7327_v38  ;;  %v1838_v8 = vmul.f32 %v5257_v24, %v8738_v36  ;;  %v1508_v44 = vadd.f32 %v1476_v63, %v1271_v15  ;;  %v8743_v15 = vld [vmem:[#allocation9_spill] sm:$0xff] }
 0x20b   : > { %8731 = vst [vmem:[#allocation102_spill] sm:$0xff] %v7337_v39  ;;  %4594 = vtanh.f32 %v7337_v39  ;;  %v7352_v54 = vadd.f32 %v1912_v33, %v7256_v57  ;;  %v7355_v29 = vadd.f32 %v2655_v60, %v7259_v21  ;;  %v2581_v57 = vmul.f32 %v5260_v25, %v8738_v36  ;;  %v8739_v21 = vld [vmem:[#allocation106_spill] sm:$0xff] }
 0x20c   : > { %4596 = vrcp.f32 %v1618_v20  ;;  %v7358_v50 = vadd.f32 %v3301_v3, %v7262_v45  ;;  %v3227_v20 = vmul.f32 %v5263_v26, %v8738_v36  ;;  %v8740_v45 = vld [vmem:[#allocation166_spill] sm:$0xff]  ;;  %v1500_v60 = vadd.f32 %v8742_v55, %v1263_v61  ;;  %v8746_v61 = vld [vmem:[#allocation89_spill] sm:$0xff] }
 0x20d   : > { %8734 = vst [vmem:[#allocation21_spill] sm:$0xff] %v7352_v54  ;;  %8735 = vst [vmem:[#allocation62_spill] sm:$0xff] %v7355_v29  ;;  %v7362_v7 = vpop.permute.xlu1 %548  ;;  %v1477_v3 = vadd.f32 %v1445_v18, %v1409_v48  ;;  %v3914_v28 = vmul.f32 -1.442695, %v1508_v44  ;;  %v8747_v48 = vld [vmem:[#allocation92_spill] sm:$0xff] }
 0x20e   : > { %8736 = vst [vmem:[#allocation141_spill] sm:$0xff] %v7358_v50  ;;  %v1802_v9 = vadd.f32 %v8739_v21, %v7362_v7  ;;  %v2545_v40 = vadd.f32 %v8740_v45, %v7362_v7  ;;  %v3191_v33 = vadd.f32 %v8741_v2, %v7362_v7  ;;  %v8744_v21 = vld [vmem:[#allocation109_spill] sm:$0xff]  ;;  %v8745_v45 = vld [vmem:[#allocation11_spill] sm:$0xff]  ;;  %v4591_v2 = vpop.eup %4590  ;;  %v3906_v54 = vmul.f32 -1.442695, %v1500_v60 }
 0x20f   : > { %v1509_v14 = vadd.f32 %v1477_v3, %v1272_v16  ;;  %4598 = vpow2.f32 %v3914_v28  ;;  %v1317_v28 = vmul.f32 %v6113_v19, %v7029_v13 }
 0x210   : > { %v1870_v17 = vadd.f32 %v1838_v8, %v1802_v9  ;;  %v2613_v41 = vadd.f32 %v2581_v57, %v2545_v40  ;;  %v3259_v50 = vadd.f32 %v3227_v20, %v3191_v33  ;;  %v8749_v57 = vld [vmem:[#allocation101_spill] sm:$0xff]  ;;  %4600 = vpow2.f32 %v3906_v54 }
 0x211   : > { %v7377_v29 = vpop.permute.xlu1 %588  ;;  %v3915_v9 = vmul.f32 -1.442695, %v1509_v14  ;;  %v8751_v33 = vld [vmem:[#allocation33_spill] sm:$0xff] }
 0x212   : > { %v1810_v63 = vadd.f32 %v8743_v15, %v7377_v29  ;;  %v2553_v12 = vadd.f32 %v8744_v21, %v7377_v29  ;;  %v3199_v39 = vadd.f32 %v8745_v45, %v7377_v29  ;;  %v7386_v18 = vadd.f32 %v8746_v61, %v1870_v17  ;;  %v4593_v16 = vpop.eup %4592  ;;  %v8752_v45 = vld [vmem:[#allocation138_spill] sm:$0xff] }
 0x213   : > { %v7389_v8 = vadd.f32 %v8747_v48, %v2613_v41  ;;  %v7392_v20 = vadd.f32 %v8749_v57, %v3259_v50  ;;  %v1847_v55 = vmul.f32 %v5257_v24, %v8751_v33  ;;  %v2590_v60 = vmul.f32 %v5260_v25, %v8751_v33 }
 0x214   : > { %v3236_v21 = vmul.f32 %v5263_v26, %v8751_v33  ;;  %v3907_v61 = vmul.f32 -1.442695, %v8752_v45  ;;  %4602 = vpow2.f32 %v3915_v9  ;;  %v8754_v9 = vld [vmem:[#allocation98_spill] sm:$0xff] }
 0x215   : > { %8748 = vst [vmem:[#allocation139_spill] sm:$0xff] %v7389_v8  ;;  %8750 = vst [vmem:[#allocation152_spill] sm:$0xff] %v7392_v20  ;;  %v4595_v44 = vpop.eup %4594  ;;  %v7394_v40 = vpop.permute.xlu1 %593 }
 0x216   : > { %v4597_v3 = vpop.eup %4596  ;;  %v1811_v17 = vadd.f32 %v7294_v6, %v7394_v40  ;;  %v2554_v41 = vadd.f32 %v7298_v22, %v7394_v40  ;;  %v3200_v50 = vadd.f32 %v7302_v49, %v7394_v40  ;;  %v7408_v15 = vmul.f32 %v4595_v44, %v4591_v2  ;;  %v7415_v22 = vpop.permute.xlu0 %553  ;;  %v8753_v44 = vld [vmem:[#allocation97_spill] sm:$0xff] }
 0x217   : > { %v7406_v14 = vmul.f32 %v4597_v3, %v4593_v16  ;;  %v1385_v49 = vmul.f32 %v6191_v62, %v7201_v51  ;;  %v1803_v57 = vadd.f32 %v7278_v1, %v7415_v22  ;;  %v2546_v13 = vadd.f32 %v7282_v31, %v7415_v22  ;;  %v8756_v31 = vld [vmem:[#allocation104_spill] sm:$0xff] }
 0x218   : > { %v1879_v6 = vadd.f32 %v1847_v55, %v1811_v17  ;;  %v2622_v48 = vadd.f32 %v2590_v60, %v2554_v41  ;;  %v3268_v2 = vadd.f32 %v3236_v21, %v3200_v50  ;;  %v3192_v1 = vadd.f32 %v7286_v4, %v7415_v22 }
 0x219   : > { %v4419_v54 = vpack.c.bf16 %v7408_v15, %v7406_v14  ;;  %4604 = vpow2.f32 %v3907_v61  ;;  %v1349_v41 = vadd.f32 %v1317_v28, %v8671_v30  ;;  %v1453_v21 = vmul.f32 %v6197_v11, %v7307_v23  ;;  %v4599_v23 = vpop.eup %4598 }
 0x21a   : > { %v7421_v16 = vpop.permute.xlu1 %849  ;;  %v7426_v3 = vadd.f32 %v8753_v44, %v1879_v6  ;;  %v7431_v55 = vadd.f32 %v8754_v9, %v2622_v48  ;;  %v7443_v50 = vadd.f32 %v8756_v31, %v3268_v2 }
 0x21b   : > { %v1839_v51 = vmul.f32 %v5257_v24, %v7421_v16  ;;  %v2582_v60 = vmul.f32 %v5260_v25, %v7421_v16  ;;  %v3228_v17 = vmul.f32 %v5263_v26, %v7421_v16  ;;  %4420 = vmatprep.subr.bf16.mxu0 %v4419_v54  ;;  %4464 = vmatprep.subr.bf16.mxu1 %v4419_v54 }
 0x21c   : > { %8755 = vst [vmem:[#allocation23_spill] sm:$0xff] %v7431_v55  ;;  %4422 = vmatpush3.bf16.msra.mxu0 %v4419_v54  ;;  %8757 = vst [vmem:[#allocation67_spill] sm:$0xff] %v7443_v50  ;;  %4468 = vmatpush3.bf16.msra.mxu1 %v4419_v54  ;;  %v1417_v4 = vadd.f32 %v1385_v49, %v1349_v41  ;;  %v4601_v54 = vpop.eup %4600  ;;  %v8759_v41 = vld [vmem:[#allocation57_spill] sm:$0xff]  ;;  %v8790_v55 = vld [vmem:[#allocation63_spill] sm:$0xff] }
 0x21d   : > { %v7447_v45 = vadd.f32 %v1839_v51, %v1803_v57  ;;  %v7449_v6 = vadd.f32 %v2582_v60, %v2546_v13  ;;  %v7451_v48 = vadd.f32 %v3228_v17, %v3192_v1  ;;  %v8758_v51 = vld [vmem:[#allocation157_spill] sm:$0xff]  ;;  %v1201_v60 = vpop.permute.xlu0 %1200  ;;  %v1612_v17 = vadd.f32 1.0, %v4599_v23 }
 0x21e   : > { %v7453_v44 = vpop.permute.xlu1 %877  ;;  %v1485_v2 = vadd.f32 %v1453_v21, %v1417_v4  ;;  %v1324_v49 = vmul.f32 %v6113_v19, %v8758_v51  ;;  %v3916_v31 = vmul.f32 -1.442695, %v8759_v41  ;;  %v1604_v21 = vadd.f32 1.0, %v4601_v54 }
 0x21f   : > { %v1846_v30 = vmul.f32 %v5257_v24, %v7453_v44  ;;  %v2589_v61 = vmul.f32 %v5260_v25, %v7453_v44  ;;  %v3235_v28 = vmul.f32 %v5263_v26, %v7453_v44  ;;  %v1392_v24 = vmul.f32 %v6191_v62, %v7238_v53  ;;  %v4603_v25 = vpop.eup %4602 }
 0x220   : > { %v1280_v26 = vmul.f32 %v7125_v0, %v1201_v60  ;;  %4606 = vrcp.f32 %v1612_v17 }
 0x221   : > { %v7461_v57 = vadd.f32 %v1846_v30, %v1810_v63  ;;  %v7463_v13 = vadd.f32 %v2589_v61, %v2553_v12  ;;  %v7465_v9 = vadd.f32 %v3235_v28, %v3199_v39  ;;  %v1356_v63 = vadd.f32 %v1324_v49, %v7154_v43 }
 0x222   : > { %v1460_v12 = vmul.f32 %v6197_v11, %v7327_v38  ;;  %v1517_v4 = vadd.f32 %v1485_v2, %v1280_v26  ;;  %v1613_v61 = vadd.f32 1.0, %v4603_v25  ;;  %4608 = vpow2.f32 %v3916_v31  ;;  %v8761_v25 = vld [vmem:[#allocation164_spill] sm:$0xff]  ;;  %v8762_v26 = vld [vmem:[#allocation165_spill] sm:$0xff] }
 0x223   : > { %v1196_v1 = vpop.permute.xlu1 %1195  ;;  %v4605_v30 = vpop.eup %4604  ;;  %v1424_v28 = vadd.f32 %v1392_v24, %v1356_v63  ;;  %4610 = vrcp.f32 %v1604_v21  ;;  %v3917_v17 = vmul.f32 -1.442695, %v8761_v25  ;;  %v1318_v31 = vmul.f32 %v6113_v19, %v8762_v26  ;;  %v8763_v21 = vld [vmem:[#allocation150_spill] sm:$0xff] }
 0x224   : > { %v1279_v39 = vmul.f32 %v7125_v0, %v1196_v1  ;;  %v3923_v43 = vmul.f32 -1.442695, %v1517_v4  ;;  %4612 = vrcp.f32 %v1613_v61  ;;  %v1605_v38 = vadd.f32 1.0, %v4605_v30  ;;  %v8760_v1 = vld [vmem:[#allocation161_spill] sm:$0xff]  ;;  %v1211_v26 = vpop.permute.xlu0 %1210 }
 0x225   : > { %v1492_v41 = vadd.f32 %v1460_v12, %v1424_v28  ;;  %v3908_v54 = vmul.f32 -1.442695, %v8760_v1  ;;  %v1319_v63 = vmul.f32 %v6113_v19, %v7274_v5  ;;  %v3909_v4 = vmul.f32 -1.442695, %v8763_v21 }
 0x226   : > { %v1516_v53 = vadd.f32 %v7168_v52, %v1279_v39  ;;  %v1350_v28 = vadd.f32 %v1318_v31, %v7362_v7  ;;  %v1386_v5 = vmul.f32 %v6191_v62, %v8738_v36  ;;  %v1394_v21 = vmul.f32 %v6191_v62, %v7453_v44 }
 0x227   : > { %v1236_v23 = vpop.permute.xlu1 %1235 }
 0x228   : > { %v3922_v51 = vmul.f32 -1.442695, %v1516_v53  ;;  %v1287_v60 = vmul.f32 %v7125_v0, %v1236_v23  ;;  %v1387_v23 = vmul.f32 %v6191_v62, %v7421_v16  ;;  %v1351_v16 = vadd.f32 %v1319_v63, %v7415_v22 }
 0x229   : > { %v1418_v31 = vadd.f32 %v1386_v5, %v1350_v28  ;;  %v1282_v63 = vmul.f32 %v7125_v0, %v1211_v26  ;;  %v7540_v26 = vpop.permute.xlu0 %1022 }
 0x22a   : > { %v1524_v49 = vadd.f32 %v1492_v41, %v1287_v60  ;;  %4614 = vpow2.f32 %v3922_v51  ;;  %v4607_v39 = vpop.eup %4606  ;;  %v8764_v60 = vld [vmem:[#allocation87_spill] sm:$0xff] }
 0x22b   : > { %v1241_v2 = vpop.permute.xlu1 %1240  ;;  %v1454_v41 = vmul.f32 %v6197_v11, %v8764_v60  ;;  %v1684_v1 = vmul.f32 0.0, %v4607_v39 }
 0x22c   : > { %4616 = vtanh.f32 %v1524_v49  ;;  %v1288_v52 = vmul.f32 %v7125_v0, %v1241_v2  ;;  %v4609_v53 = vpop.eup %4608 }
 0x22d   : > { %4618 = vpow2.f32 %v3923_v43  ;;  %v4611_v51 = vpop.eup %4610 }
 0x22e   : > { %4620 = vrcp.f32 %v1605_v38  ;;  %v1525_v24 = vadd.f32 %v7203_v46, %v1288_v52  ;;  %v4613_v7 = vpop.eup %4612  ;;  %v1614_v52 = vadd.f32 1.0, %v4609_v53 }
 0x22f   : > { %4622 = vpow2.f32 %v3908_v54  ;;  %v1685_v60 = vmul.f32 0.0, %v4613_v7 }
 0x230   : > { %4624 = vtanh.f32 %v1525_v24  ;;  %v978_v12 = vpop.permute.xlu1 %977  ;;  %v8767_v24 = vld [vmem:[#allocation10_spill] sm:$0xff] }
 0x231   : > { %v1907_v30 = vmul.f32 %v5317_v37, %v978_v12  ;;  %v2650_v61 = vmul.f32 %v5363_v47, %v978_v12  ;;  %v3296_v46 = vmul.f32 %v8682_v42, %v978_v12  ;;  %4626 = vpow2.f32 %v3917_v17 }
 0x232   : > { %v1455_v36 = vmul.f32 %v6197_v11, %v978_v12  ;;  %4628 = vpow2.f32 %v3909_v4  ;;  %v1327_v12 = vmul.f32 %v6113_v19, %v7288_v27 }
 0x233   : > { %v7499_v43 = vadd.f32 %v1907_v30, %v7447_v45  ;;  %v7502_v38 = vadd.f32 %v2650_v61, %v7449_v6  ;;  %v7505_v49 = vadd.f32 %v3296_v46, %v7451_v48  ;;  %v1326_v45 = vmul.f32 %v6113_v19, %v8767_v24 }
 0x234   : > { %v1006_v54 = vpop.permute.xlu1 %1005  ;;  %v4615_v2 = vpop.eup %4614  ;;  %v1419_v48 = vadd.f32 %v1387_v23, %v1351_v16  ;;  %v1359_v19 = vadd.f32 %v1327_v12, %v7394_v40 }
 0x235   : > { %8765 = vst [vmem:[#allocation4_spill] sm:$0xff] %v7502_v38  ;;  %8766 = vst [vmem:[#allocation5_spill] sm:$0xff] %v7505_v49  ;;  %v1914_v6 = vmul.f32 %v5317_v37, %v1006_v54  ;;  %v2657_v39 = vmul.f32 %v5363_v47, %v1006_v54  ;;  %v3303_v17 = vmul.f32 %v8682_v42, %v1006_v54  ;;  %v1620_v27 = vadd.f32 1.0, %v4615_v2  ;;  %v8789_v49 = vld [vmem:[#allocation112_spill] sm:$0xff] }
 0x236   : > { %v4617_v25 = vpop.eup %4616  ;;  %v1487_v37 = vadd.f32 %v1455_v36, %v1419_v48  ;;  %v1358_v53 = vadd.f32 %v1326_v45, %v7377_v29  ;;  %v1395_v29 = vmul.f32 %v6191_v62, %v8751_v33  ;;  %v8770_v62 = vld [vmem:[#allocation95_spill] sm:$0xff] }
 0x237   : > { %v4619_v22 = vpop.eup %4618  ;;  %v1692_v4 = vmul.f32 %v4617_v25, %v4611_v51  ;;  %v7520_v61 = vadd.f32 %v1914_v6, %v7461_v57  ;;  %v7523_v46 = vadd.f32 %v2657_v39, %v7463_v13  ;;  %v7526_v47 = vadd.f32 %v3303_v17, %v7465_v9 }
 0x238   : > { %v4621_v30 = vpop.eup %4620  ;;  %v1621_v5 = vadd.f32 1.0, %v4619_v22  ;;  %v1462_v57 = vmul.f32 %v6197_v11, %v1006_v54  ;;  %v1486_v13 = vadd.f32 %v1454_v41, %v1418_v31  ;;  %v1519_v40 = vadd.f32 %v1487_v37, %v1282_v63 }
 0x239   : > { %8768 = vst [vmem:[#allocation6_spill] sm:$0xff] %v7523_v46  ;;  %8769 = vst [vmem:[#allocation162_spill] sm:$0xff] %v7526_v47  ;;  %v4623_v42 = vpop.eup %4622  ;;  %v7530_v28 = vadd.f32 %v1692_v4, %v1684_v1  ;;  %v1206_v44 = vpop.permute.xlu1 %1205  ;;  %v1426_v1 = vadd.f32 %v1394_v21, %v1358_v53  ;;  %v1427_v54 = vadd.f32 %v1395_v29, %v1359_v19 }
 0x23a   : > { %v4625_v23 = vpop.eup %4624  ;;  %v1281_v51 = vmul.f32 %v7125_v0, %v1206_v44  ;;  %v1606_v36 = vadd.f32 1.0, %v4623_v42  ;;  %v1463_v33 = vmul.f32 %v6197_v11, %v8770_v62  ;;  %v7546_v4 = vpop.permute.xlu0 %1032  ;;  %v1720_v37 = vmul.f32 %v7194_v34, %v7540_v26 }
 0x23b   : > { %4630 = vtanh.f32 %v7530_v28  ;;  %v1693_v9 = vmul.f32 %v4625_v23, %v4621_v30  ;;  %v4627_v45 = vpop.eup %4626  ;;  %v1494_v6 = vadd.f32 %v1462_v57, %v1426_v1  ;;  %v1722_v19 = vmul.f32 %v7406_v14, %v7546_v4 }
 0x23c   : > { %4632 = vrcp.f32 %v1614_v52  ;;  %v1518_v16 = vadd.f32 %v1486_v13, %v1281_v51  ;;  %v4629_v25 = vpop.eup %4628  ;;  %v3925_v52 = vmul.f32 -1.442695, %v1519_v40  ;;  %v1615_v31 = vadd.f32 1.0, %v4627_v45 }
 0x23d   : > { %4634 = vrcp.f32 %v1620_v27  ;;  %v7537_v2 = vadd.f32 %v1693_v9, %v1685_v60  ;;  %v1246_v24 = vpop.permute.xlu1 %1245  ;;  %v1607_v17 = vadd.f32 1.0, %v4629_v25  ;;  %v1495_v63 = vadd.f32 %v1463_v33, %v1427_v54 }
 0x23e   : > { %4636 = vrcp.f32 %v1621_v5  ;;  %v3924_v41 = vmul.f32 -1.442695, %v1518_v16  ;;  %v1289_v7 = vmul.f32 %v7125_v0, %v1246_v24  ;;  %v7560_v9 = vpop.permute.xlu0 %1042 }
 0x23f   : > { %4638 = vtanh.f32 %v7537_v2 }
 0x240   : > { %4640 = vpow2.f32 %v3924_v41  ;;  %v1526_v48 = vadd.f32 %v1494_v6, %v1289_v7 }
 0x241   : > { %4642 = vrcp.f32 %v1606_v36  ;;  %v1251_v39 = vpop.permute.xlu1 %1250 }
 0x242   : > { %4644 = vtanh.f32 %v1526_v48  ;;  %v1290_v22 = vmul.f32 %v7125_v0, %v1251_v39 }
 0x243   : > { %4646 = vpow2.f32 %v3925_v52 }
 0x244   : > { %v1527_v12 = vadd.f32 %v1495_v63, %v1290_v22  ;;  %4648 = vrcp.f32 %v1615_v31  ;;  %v7572_v63 = vpop.permute.xlu0 %1052 }
 0x245   : > { %v4631_v21 = vpop.eup %4630  ;;  %v7548_v30 = vpop.permute.xlu1 %1027  ;;  %4650 = vrcp.f32 %v1607_v17 }
 0x246   : > { %v4633_v11 = vpop.eup %4632  ;;  %v1721_v42 = vmul.f32 %v7196_v10, %v7548_v30  ;;  %4652 = vtanh.f32 %v1527_v12 }
 0x247   : > { %v4635_v53 = vpop.eup %4634  ;;  %v1686_v1 = vmul.f32 0.0, %v4633_v11 }
 0x248   : > { %v4637_v0 = vpop.eup %4636  ;;  %v1728_v27 = vadd.f32 %v1721_v42, %v1720_v37  ;;  %v1716_v44 = vmul.f32 %v4635_v53, %v4631_v21 }
 0x249   : > { %v4639_v23 = vpop.eup %4638  ;;  %v7556_v5 = vpop.permute.xlu1 %1037 }
 0x24a   : > { %v4641_v57 = vpop.eup %4640  ;;  %v1723_v51 = vmul.f32 %v7408_v15, %v7556_v5  ;;  %v1729_v13 = vadd.f32 %v1728_v27, %v1722_v19  ;;  %v1717_v34 = vmul.f32 %v4639_v23, %v4637_v0  ;;  %v1724_v16 = vmul.f32 %v1716_v44, %v7560_v9  ;;  %v7586_v23 = vld [vmem:[%s8295_s1 + $0x88] sm:$0xff] }
 0x24b   : > { %v4643_v60 = vpop.eup %4642  ;;  %v1622_v29 = vadd.f32 1.0, %v4641_v57  ;;  %8771 = vst [vmem:[#allocation19_spill] sm:$0xff] %v7586_v23 }
 0x24c   : > { %v4645_v10 = vpop.eup %4644  ;;  %v1730_v40 = vadd.f32 %v1729_v13, %v1723_v51  ;;  %v4423_v14 = vpack.c.bf16 %v1717_v34, %v1716_v44  ;;  %v7581_v44 = vld [vmem:[%s8295_s1 + $0x8] sm:$0xff]  ;;  %v7591_v51 = vld [vmem:[%s8295_s1 + $0x10] sm:$0xff] }
 0x24d   : > { %v1694_v36 = vmul.f32 %v4645_v10, %v4643_v60  ;;  %v7563_v24 = vpop.permute.xlu1 %1047  ;;  %v4647_v54 = vpop.eup %4646  ;;  %4654 = vrcp.f32 %v1622_v29  ;;  %v7596_v13 = vld [vmem:[%s8295_s1 + $0x90] sm:$0xff]  ;;  %v7609_v60 = vld [vmem:[%s8295_s1 + $0x18] sm:$0xff] }
 0x24e   : > { %v1725_v45 = vmul.f32 %v1717_v34, %v7563_v24  ;;  %v1731_v41 = vadd.f32 %v1730_v40, %v1724_v16  ;;  %4424 = vmatprep.subr.bf16.mxu0 %v4423_v14  ;;  %4465 = vmatprep.subr.bf16.mxu1 %v4423_v14  ;;  %v4649_v15 = vpop.eup %4648  ;;  %v1623_v33 = vadd.f32 1.0, %v4647_v54  ;;  %8772 = vst [vmem:[#allocation13_spill] sm:$0xff] %v7596_v13  ;;  %v7614_v10 = vld [vmem:[%s8295_s1 + $0x98] sm:$0xff]  ;;  %v7619_v40 = vld [vmem:[%s8295_s1 + $0x20] sm:$0xff] }
 0x24f   : > { %v7566_v7 = vadd.f32 %v1694_v36, %v1686_v1  ;;  %4426 = vmatpush3.bf16.msra.mxu0 %v4423_v14  ;;  %4469 = vmatpush3.bf16.msra.mxu1 %v4423_v14  ;;  %v4651_v6 = vpop.eup %4650  ;;  %v1687_v52 = vmul.f32 0.0, %v4649_v15  ;;  %8773 = vst [vmem:[#allocation27_spill] sm:$0xff] %v7614_v10  ;;  %v7624_v16 = vld [vmem:[%s8295_s1 + $0xa0] sm:$0xff]  ;;  %v7639_v1 = vld [vmem:[%s8295_s1 + $0x28] sm:$0xff] }
 0x250   : > { %v1732_v25 = vadd.f32 %v1731_v41, %v1725_v45  ;;  %v4653_v62 = vpop.eup %4652  ;;  %8774 = vst [vmem:[#allocation15_spill] sm:$0xff] %v7624_v16  ;;  %v7644_v36 = vld [vmem:[%s8295_s1 + $0xa8] sm:$0xff]  ;;  %v7649_v45 = vld [vmem:[%s8295_s1 + $0x30] sm:$0xff] }
 0x251   : > { %4656 = vtanh.f32 %v7566_v7  ;;  %v1695_v48 = vmul.f32 %v4653_v62, %v4651_v6  ;;  %v7575_v53 = vpop.permute.xlu1 %1057  ;;  %8775 = vst [vmem:[#allocation20_spill] sm:$0xff] %v7644_v36  ;;  %v7654_v41 = vld [vmem:[%s8295_s1 + $0xb0] sm:$0xff]  ;;  %v7667_v6 = vld [vmem:[%s8295_s1 + $0x38] sm:$0xff]  ;;  %v7680_v62 = vld [vmem:[%s8295_s1 + $0x40] sm:$0xff] }
 0x252   : > { %4658 = vrcp.f32 %v1623_v33  ;;  %8776 = vst [vmem:[#allocation22_spill] sm:$0xff] %v7654_v41  ;;  %v7685_v33 = vld [vmem:[%s8295_s1 + $0xc0] sm:$0xff] }
 0x253   : > { %v7569_v31 = vadd.f32 %v1695_v48, %v1687_v52  ;;  %8778 = vst [vmem:[#allocation29_spill] sm:$0xff] %v7685_v33  ;;  %v7698_v52 = vld [vmem:[%s8295_s1 + $0x48] sm:$0xff] }
 0x254   : > { %v7703_v48 = vld [vmem:[%s8295_s1 + $0xc8] sm:$0xff] }
 0x255   : > { %4660 = vtanh.f32 %v7569_v31  ;;  %8779 = vst [vmem:[#allocation31_spill] sm:$0xff] %v7703_v48 }
 0x257   : > { %v4655_v39 = vpop.eup %4654 }
 0x25b   : > { %v4657_v17 = vpop.eup %4656 }
 0x25c   : > { %v1718_v22 = vmul.f32 %v4657_v17, %v4655_v39  ;;  %v4659_v21 = vpop.eup %4658  ;;  %v7708_v39 = vld [vmem:[%s8295_s1 + $0x50] sm:$0xff] }
 0x25d   : > { %v7713_v17 = vld [vmem:[%s8295_s1 + $0xd0] sm:$0xff] }
 0x25e   : > { %v1726_v12 = vmul.f32 %v1718_v22, %v7572_v63  ;;  %8780 = vst [vmem:[#allocation7_spill] sm:$0xff] %v7713_v17 }
 0x25f   : > { %v4661_v11 = vpop.eup %4660 }
 0x260   : > { %v1733_v37 = vadd.f32 %v1732_v25, %v1726_v12  ;;  %v1719_v42 = vmul.f32 %v4661_v11, %v4659_v21  ;;  %v7672_v25 = vld [vmem:[%s8295_s1 + $0xb8] sm:$0xff]  ;;  %v7736_v21 = vld [vmem:[%s8295_s1 + $0x60] sm:$0xff] }
 0x261   : > { %8777 = vst [vmem:[#allocation28_spill] sm:$0xff] %v7672_v25  ;;  %v7731_v12 = vld [vmem:[%s8295_s1 + $0xd8] sm:$0xff]  ;;  %v7741_v11 = vld [vmem:[%s8295_s1 + $0xe0] sm:$0xff] }
 0x262   : > { %v1727_v0 = vmul.f32 %v1719_v42, %v7575_v53  ;;  %v4427_v19 = vpack.c.bf16 %v1719_v42, %v1718_v22  ;;  %v7726_v22 = vld [vmem:[%s8295_s1 + $0x58] sm:$0xff]  ;;  %8781 = vst [vmem:[#allocation34_spill] sm:$0xff] %v7731_v12  ;;  %8782 = vst [vmem:[#allocation41_spill] sm:$0xff] %v7741_v11  ;;  %v7759_v42 = vld [vmem:[%s8295_s1 + $0xe8] sm:$0xff] }
 0x263   : > { %8783 = vst [vmem:[#allocation88_spill] sm:$0xff] %v7759_v42 }
 0x264   : > { %v1734_v27 = vadd.f32 %v1733_v37, %v1727_v0  ;;  %4428 = vmatprep.subr.bf16.mxu0 %v4427_v19  ;;  %4466 = vmatprep.subr.bf16.mxu1 %v4427_v19  ;;  %v7754_v37 = vld [vmem:[%s8295_s1 + $0x68] sm:$0xff]  ;;  %v7764_v0 = vld [vmem:[%s8295_s1 + $0x70] sm:$0xff] }
 0x265   : > { %4430 = vmatpush3.bf16.msra.mxu0 %v4427_v19  ;;  %4470 = vmatpush3.bf16.msra.mxu1 %v4427_v19  ;;  %v7769_v19 = vld [vmem:[%s8295_s1 + $0xf0] sm:$0xff] }
 0x266   : > { %v1735_v57 = vrot.slane %v1734_v27, 4  ;;  %8784 = vst [vmem:[#allocation60_spill] sm:$0xff] %v7769_v19 }
 0x268   : > { %v1736_v34 = vadd.f32 %v1735_v57, %v1734_v27  ;;  %4240 = vmatmul.mubr.msk.f32.vlgmr.msra.gmra.mrb[0].mxu0 %vm1948_vm0, %v7581_v44  ;;  %4264 = vmatmul.mubr.msk.f32.vlgmr.msra.gmra.mrb[0].mxu1 %vm1948_vm0, %v7586_v23  ;;  %v7782_v27 = vld [vmem:[%s8295_s1 + $0x78] sm:$0xff] }
 0x269   : > { %4242 = vmatprep.mubr.msk.f32.mxu0 %vm1948_vm0, %v7591_v51  ;;  %4266 = vmatprep.mubr.msk.f32.mxu1 %vm1948_vm0, %v7596_v13  ;;  %8785 = vst [vmem:[#allocation153_spill] sm:$0xff] %v7782_v27  ;;  %v7787_v57 = vld [vmem:[%s8295_s1 + $0xf8] sm:$0xff]  ;;  %v8806_v13 = vld [vmem:[#allocation140_spill] sm:$0xff] }
 0x26a   : > { %v1737_v29 = vrot.slane %v1736_v34, 2  ;;  %8786 = vst [vmem:[#allocation46_spill] sm:$0xff] %v7787_v57 }
 0x26c   : > { %v1738_v14 = vadd.f32 %v1737_v29, %v1736_v34  ;;  %4243 = vmatmul.mubr.msk.f32.gmra.mrb[2].mxu0 %vm1948_vm0, %v7609_v60  ;;  %4267 = vmatmul.mubr.msk.f32.gmra.mrb[2].mxu1 %vm1948_vm0, %v7614_v10 }
 0x26d   : > { %4245 = vmatprep.mubr.msk.f32.mxu0 %vm1948_vm0, %v7619_v40  ;;  %4269 = vmatprep.mubr.msk.f32.mxu1 %vm1948_vm0, %v7624_v16 }
 0x26e   : > { %v1739_v54 = vrot.slane %v1738_v14, 1 }
 0x270   : > { %v1740_v15 = vadd.f32 %v1739_v54, %v1738_v14  ;;  %4246 = vmatmul.mubr.msk.f32.gmra.mrb[4].mxu0 %vm1948_vm0, %v7639_v1  ;;  %4270 = vmatmul.mubr.msk.f32.gmra.mrb[4].mxu1 %vm1948_vm0, %v7644_v36  ;;  %v8787_v14 = vld [vmem:[#allocation111_spill] sm:$0xff]  ;;  %v8804_v36 = vld [vmem:[#allocation70_spill] sm:$0xff] }
 0x271   : > { %4248 = vmatprep.mubr.msk.f32.mxu0 %vm1948_vm0, %v7649_v45  ;;  %4272 = vmatprep.mubr.msk.f32.mxu1 %vm1948_vm0, %v7654_v41 }
 0x272   : > { %1741 = vst [vmem:[%s7674_s29] sm:$0x1] %v1740_v15  ;;  %v8788_v15 = vld [vmem:[#allocation14_spill] sm:$0xff] }
 0x274   : > { %4249 = vmatmul.mubr.msk.f32.gmra.mrb[6].mxu0 %vm1948_vm0, %v7667_v6  ;;  %4273 = vmatmul.mubr.msk.f32.gmra.mrb[6].mxu1 %vm1948_vm0, %v7672_v25 }
 0x275   : > { %4251 = vmatprep.mubr.msk.f32.mxu0 %vm1948_vm0, %v7680_v62  ;;  %4275 = vmatprep.mubr.msk.f32.mxu1 %vm1948_vm0, %v7685_v33 }
 0x278   : > { %4252 = vmatmul.mubr.msk.f32.gmra.mrb[8].mxu0 %vm1948_vm0, %v7698_v52  ;;  %4276 = vmatmul.mubr.msk.f32.gmra.mrb[8].mxu1 %vm1948_vm0, %v7703_v48  ;;  %v8792_v48 = vld [vmem:[#allocation43_spill] sm:$0xff] }
 0x279   : > { %4254 = vmatprep.mubr.msk.f32.mxu0 %vm1948_vm0, %v7708_v39  ;;  %4278 = vmatprep.mubr.msk.f32.mxu1 %vm1948_vm0, %v7713_v17 }
 0x27c   : > { %4255 = vmatmul.mubr.msk.f32.gmra.mrb[10].mxu0 %vm1948_vm0, %v7726_v22  ;;  %4279 = vmatmul.mubr.msk.f32.gmra.mrb[10].mxu1 %vm1948_vm0, %v7731_v12 }
 0x27d   : > { %4257 = vmatprep.mubr.msk.f32.mxu0 %vm1948_vm0, %v7736_v21  ;;  %4281 = vmatprep.mubr.msk.f32.mxu1 %vm1948_vm0, %v7741_v11 }
 0x280   : > { %4258 = vmatmul.mubr.msk.f32.gmra.mrb[12].mxu0 %vm1948_vm0, %v7754_v37  ;;  %4282 = vmatmul.mubr.msk.f32.gmra.mrb[12].mxu1 %vm1948_vm0, %v7759_v42 }
 0x281   : > { %4260 = vmatprep.mubr.msk.f32.mxu0 %vm1948_vm0, %v7764_v0  ;;  %4284 = vmatprep.mubr.msk.f32.mxu1 %vm1948_vm0, %v7769_v19  ;;  %v8791_v19 = vld [vmem:[#allocation121_spill] sm:$0xff] }
 0x284   : > { %4261 = vmatmul.mubr.msk.f32.gmra.mrb[14].mxu0 %vm1948_vm0, %v7782_v27  ;;  %4285 = vmatmul.mubr.msk.f32.gmra.mrb[14].mxu1 %vm1948_vm0, %v7787_v57 }
 0x285   : > { %4303 = vmatprep.mubr.msk.f32.mxu1 %vm1948_vm0, %v7222_v56  ;;  %4367 = vmatprep.mubr.msk.f32.mxu0 %vm1948_vm0, %v7222_v56 }
 0x33b   : > { %v4241_v34 = vpop.f32.mrb[0].mxu0  ;;  %v4265_v29 = vpop.f32.mrb[0].mxu1 }
 0x33c   : > { %v2117_v54 = vadd.f32 %v4241_v34, %v8787_v14  ;;  %v2197_v47 = vadd.f32 %v4265_v29, %v8788_v15  ;;  %v2111_v50 = vpop.f32.mrb[1].mxu0  ;;  %v2191_v20 = vpop.f32.mrb[1].mxu1 }
 0x33d   : > { %v2112_v46 = vadd.f32 %v2111_v50, %v8789_v49  ;;  %v2192_v8 = vadd.f32 %v2191_v20, %v8790_v55  ;;  %v8793_v49 = vld [vmem:[#allocation130_spill] sm:$0xff] }
 0x33e   : > { %v3960_v17 = vmul.f32 -1.442695, %v2117_v54  ;;  %v3976_v29 = vmul.f32 -1.442695, %v2197_v47 }
 0x33f   : > { %v4244_v38 = vpop.f32.mrb[2].mxu0  ;;  %v4268_v57 = vpop.f32.mrb[2].mxu1  ;;  %v3959_v14 = vmul.f32 -1.442695, %v2112_v46 }
 0x340   : > { %v2127_v42 = vadd.f32 %v4244_v38, %v8791_v19  ;;  %v2207_v11 = vadd.f32 %v4268_v57, %v7097_v32  ;;  %v2121_v12 = vpop.f32.mrb[3].mxu0  ;;  %v2201_v56 = vpop.f32.mrb[3].mxu1  ;;  %4662 = vpow2.f32 %v3960_v17  ;;  %v8794_v19 = vld [vmem:[#allocation127_spill] sm:$0xff]  ;;  %v8796_v17 = vld [vmem:[#allocation54_spill] sm:$0xff] }
 0x341   : > { %v2122_v33 = vadd.f32 %v2121_v12, %v8792_v48  ;;  %v2202_v34 = vadd.f32 %v2201_v56, %v6915_v35  ;;  %4664 = vpow2.f32 %v3976_v29  ;;  %v8795_v48 = vld [vmem:[#allocation143_spill] sm:$0xff] }
 0x342   : > { %v3962_v50 = vmul.f32 -1.442695, %v2127_v42  ;;  %4666 = vpow2.f32 %v3959_v14  ;;  %v3978_v29 = vmul.f32 -1.442695, %v2207_v11  ;;  %v8797_v14 = vld [vmem:[#allocation38_spill] sm:$0xff] }
 0x343   : > { %v4247_v15 = vpop.f32.mrb[4].mxu0  ;;  %v4271_v25 = vpop.f32.mrb[4].mxu1  ;;  %v3961_v32 = vmul.f32 -1.442695, %v2122_v33 }
 0x344   : > { %v2137_v20 = vadd.f32 %v4247_v15, %v8793_v49  ;;  %v2217_v55 = vadd.f32 %v4271_v25, %v7325_v59  ;;  %v2131_v41 = vpop.f32.mrb[5].mxu0  ;;  %v2211_v38 = vpop.f32.mrb[5].mxu1  ;;  %4668 = vpow2.f32 %v3962_v50 }
 0x345   : > { %v2132_v57 = vadd.f32 %v2131_v41, %v8794_v19  ;;  %v2212_v54 = vadd.f32 %v2211_v38, %v7171_v58  ;;  %4670 = vpow2.f32 %v3961_v32  ;;  %v3975_v58 = vmul.f32 -1.442695, %v2192_v8  ;;  %v8798_v38 = vld [vmem:[#allocation68_spill] sm:$0xff] }
 0x346   : > { %v3964_v35 = vmul.f32 -1.442695, %v2137_v20  ;;  %v3977_v20 = vmul.f32 -1.442695, %v2202_v34  ;;  %v8799_v19 = vld [vmem:[#allocation116_spill] sm:$0xff] }
 0x347   : > { %v4250_v47 = vpop.f32.mrb[6].mxu0  ;;  %v4274_v46 = vpop.f32.mrb[6].mxu1  ;;  %v3963_v8 = vmul.f32 -1.442695, %v2132_v57 }
 0x348   : > { %v2147_v12 = vadd.f32 %v4250_v47, %v8795_v48  ;;  %v7811_v42 = vadd.f32 %v4274_v46, %v7499_v43  ;;  %v2141_v59 = vpop.f32.mrb[7].mxu0  ;;  %v2221_v25 = vpop.f32.mrb[7].mxu1  ;;  %4672 = vpow2.f32 %v3964_v35  ;;  %v3980_v46 = vmul.f32 -1.442695, %v2217_v55  ;;  %v8800_v48 = vld [vmem:[#allocation35_spill] sm:$0xff] }
 0x349   : > { %v2142_v33 = vadd.f32 %v2141_v59, %v8796_v17  ;;  %v7815_v41 = vadd.f32 %v2221_v25, %v7386_v18  ;;  %4674 = vpow2.f32 %v3975_v58  ;;  %v3979_v17 = vmul.f32 -1.442695, %v2212_v54 }
 0x34a   : > { %v4663_v18 = vpop.eup %4662  ;;  %4676 = vpow2.f32 %v3978_v29  ;;  %v3966_v55 = vmul.f32 -1.442695, %v2147_v12 }
 0x34b   : > { %v4253_v56 = vpop.f32.mrb[8].mxu0  ;;  %v4277_v50 = vpop.f32.mrb[8].mxu1  ;;  %4678 = vpow2.f32 %v3977_v20  ;;  %v2343_v16 = vadd.f32 1.0, %v4663_v18  ;;  %v8808_v18 = vld [vmem:[#allocation21_spill] sm:$0xff] }
 0x34c   : > { %v2157_v15 = vadd.f32 %v4253_v56, %v8797_v14  ;;  %v2151_v49 = vpop.f32.mrb[9].mxu0  ;;  %v7819_v43 = vadd.f32 %v4277_v50, %v8798_v38  ;;  %v2231_v32 = vpop.f32.mrb[9].mxu1  ;;  %v8801_v56 = vld [vmem:[#allocation48_spill] sm:$0xff]  ;;  %4680 = vpow2.f32 %v3980_v46 }
 0x34d   : > { %v2152_v47 = vadd.f32 %v2151_v49, %v8799_v19  ;;  %v7823_v59 = vadd.f32 %v2231_v32, %v8800_v48  ;;  %v4665_v25 = vpop.eup %4664  ;;  %v8802_v14 = vld [vmem:[#allocation12_spill] sm:$0xff]  ;;  %4682 = vpow2.f32 %v3963_v8 }
 0x34e   : > { %v4667_v19 = vpop.eup %4666  ;;  %v8803_v32 = vld [vmem:[#allocation64_spill] sm:$0xff]  ;;  %v2359_v54 = vadd.f32 1.0, %v4665_v25  ;;  %4684 = vpow2.f32 %v3979_v17  ;;  %v3965_v25 = vmul.f32 -1.442695, %v2142_v33 }
 0x34f   : > { %v4256_v35 = vpop.f32.mrb[10].mxu0  ;;  %v4280_v11 = vpop.f32.mrb[10].mxu1  ;;  %4686 = vpow2.f32 %v3966_v55 }
 0x350   : > { %v2167_v34 = vadd.f32 %v4256_v35, %v8801_v56  ;;  %v7827_v50 = vadd.f32 %v4280_v11, %v8802_v14  ;;  %v2161_v38 = vpop.f32.mrb[11].mxu0  ;;  %v2241_v49 = vpop.f32.mrb[11].mxu1  ;;  %v2342_v11 = vadd.f32 1.0, %v4667_v19  ;;  %v8805_v14 = vld [vmem:[#allocation77_spill] sm:$0xff]  ;;  %4688 = vrcp.f32 %v2343_v16 }
 0x351   : > { %v2162_v48 = vadd.f32 %v2161_v38, %v8803_v32  ;;  %v7831_v58 = vadd.f32 %v2241_v49, %v8804_v36  ;;  %v4669_v57 = vpop.eup %4668  ;;  %v8807_v36 = vld [vmem:[#allocation129_spill] sm:$0xff]  ;;  %4690 = vrcp.f32 %v2359_v54 }
 0x352   : > { %v4671_v29 = vpop.eup %4670  ;;  %v2345_v32 = vadd.f32 1.0, %v4669_v57  ;;  %4692 = vrcp.f32 %v2342_v11  ;;  %v3967_v11 = vmul.f32 -1.442695, %v2152_v47 }
 0x353   : > { %v4259_v35 = vpop.f32.mrb[12].mxu0  ;;  %v4283_v56 = vpop.f32.mrb[12].mxu1  ;;  %v2344_v8 = vadd.f32 1.0, %v4671_v29 }
 0x354   : > { %v2177_v10 = vadd.f32 %v4259_v35, %v8805_v14  ;;  %v2257_v20 = vadd.f32 %v4283_v56, %v8806_v13  ;;  %v2171_v12 = vpop.f32.mrb[13].mxu0  ;;  %v2251_v23 = vpop.f32.mrb[13].mxu1  ;;  %v8809_v14 = vld [vmem:[#allocation128_spill] sm:$0xff]  ;;  %4694 = vrcp.f32 %v2345_v32 }
 0x355   : > { %v4673_v38 = vpop.eup %4672  ;;  %v2172_v49 = vadd.f32 %v2171_v12, %v8807_v36  ;;  %v7837_v46 = vadd.f32 %v2251_v23, %v8808_v18  ;;  %v3968_v23 = vmul.f32 -1.442695, %v2157_v15  ;;  %v8810_v12 = vld [vmem:[#allocation146_spill] sm:$0xff]  ;;  %4696 = vrcp.f32 %v2344_v8 }
 0x356   : > { %v2347_v35 = vadd.f32 1.0, %v4673_v38  ;;  %v7843_v27 = vpop.eup %4674  ;;  %4698 = vpow2.f32 %v3965_v25  ;;  %v3970_v36 = vmul.f32 -1.442695, %v2167_v34  ;;  %v3972_v47 = vmul.f32 -1.442695, %v2177_v10 }
 0x357   : > { %v4262_v19 = vpop.f32.mrb[14].mxu0  ;;  %v4286_v17 = vpop.f32.mrb[14].mxu1 }
 0x358   : > { %v2187_v13 = vadd.f32 %v4262_v19, %v8809_v14  ;;  %v7841_v56 = vadd.f32 %v4286_v17, %v7426_v3  ;;  %v2181_v57 = vpop.f32.mrb[15].mxu0  ;;  %v2261_v55 = vpop.f32.mrb[15].mxu1  ;;  %4700 = vrcp.f32 %v2347_v35 }
 0x359   : > { %v2182_v16 = vadd.f32 %v2181_v57, %v8810_v12  ;;  %v7847_v29 = vadd.f32 %v2261_v55, %v7520_v61  ;;  %v7849_v33 = vpop.eup %4676  ;;  %4702 = vpow2.f32 %v3968_v23  ;;  %v3969_v61 = vmul.f32 -1.442695, %v2162_v48 }
 0x35a   : > { %v7851_v54 = vpop.eup %4678  ;;  %4704 = vtanh.f32 %v7819_v43  ;;  %v3971_v57 = vmul.f32 -1.442695, %v2172_v49 }
 0x35b   : > { %v7853_v3 = vpop.eup %4680  ;;  %4706 = vpow2.f32 %v3967_v11 }
 0x35c   : > { %v4683_v38 = vpop.eup %4682  ;;  %4708 = vtanh.f32 %v7823_v59 }
 0x35d   : > { %v7855_v32 = vpop.eup %4684  ;;  %4710 = vpow2.f32 %v3970_v36  ;;  %v2346_v17 = vadd.f32 1.0, %v4683_v38 }
 0x35e   : > { %v4687_v15 = vpop.eup %4686  ;;  %4712 = vtanh.f32 %v7827_v50 }
 0x35f   : > { %v4689_v18 = vpop.eup %4688  ;;  %4714 = vpow2.f32 %v3969_v61  ;;  %v2349_v35 = vadd.f32 1.0, %v4687_v15 }
 0x360   : > { %v7859_v8 = vpop.eup %4690  ;;  %4716 = vtanh.f32 %v7831_v58  ;;  %v3974_v58 = vmul.f32 -1.442695, %v2187_v13  ;;  %v2358_v13 = vadd.f32 1.0, %v7843_v27  ;;  %v3981_v27 = vmul.f32 -1.442695, %v7815_v41 }
 0x361   : > { %v4693_v25 = vpop.eup %4692  ;;  %4718 = vpow2.f32 %v3972_v47  ;;  %v2360_v41 = vadd.f32 1.0, %v7851_v54 }
 0x362   : > { %v4695_v19 = vpop.eup %4694  ;;  %4720 = vtanh.f32 %v2257_v20 }
 0x363   : > { %v4697_v34 = vpop.eup %4696  ;;  %4722 = vrcp.f32 %v2346_v17 }
 0x364   : > { %v4699_v43 = vpop.eup %4698  ;;  %4724 = vrcp.f32 %v2349_v35 }
 0x365   : > { %v4701_v48 = vpop.eup %4700  ;;  %v2348_v14 = vadd.f32 1.0, %v4699_v43 }
 0x366   : > { %v4703_v59 = vpop.eup %4702 }
 0x367   : > { %v4705_v55 = vpop.eup %4704  ;;  %v2351_v10 = vadd.f32 1.0, %v4703_v59  ;;  %4726 = vrcp.f32 %v2348_v14 }
 0x368   : > { %v4707_v23 = vpop.eup %4706  ;;  %v2431_v50 = vmul.f32 %v4705_v55, %v4689_v18  ;;  %v3973_v18 = vmul.f32 -1.442695, %v2182_v16 }
 0x369   : > { %v4709_v12 = vpop.eup %4708  ;;  %4728 = vrcp.f32 %v2351_v10  ;;  %v2350_v11 = vadd.f32 1.0, %v4707_v23  ;;  %v3982_v10 = vmul.f32 -1.442695, %v7811_v42  ;;  %v8811_v23 = vld [vmem:[#allocation26_spill] sm:$0xff] }
 0x36a   : > { %v4711_v38 = vpop.eup %4710  ;;  %v2430_v36 = vmul.f32 %v4709_v12, %v4693_v25  ;;  %4730 = vpow2.f32 %v3971_v57 }
 0x36b   : > { %v4713_v15 = vpop.eup %4712  ;;  %4732 = vrcp.f32 %v2350_v11  ;;  %v2353_v61 = vadd.f32 1.0, %v4711_v38  ;;  %v8812_v38 = vld [vmem:[#allocation47_spill] sm:$0xff] }
 0x36c   : > { %v4715_v20 = vpop.eup %4714  ;;  %v2433_v47 = vmul.f32 %v4713_v15, %v4695_v19  ;;  %4734 = vtanh.f32 %v7837_v46  ;;  %v2361_v19 = vadd.f32 1.0, %v7849_v33 }
 0x36d   : > { %v4717_v49 = vpop.eup %4716  ;;  %4736 = vrcp.f32 %v2353_v61  ;;  %v2352_v17 = vadd.f32 1.0, %v4715_v20  ;;  %v8813_v20 = vld [vmem:[#allocation102_spill] sm:$0xff] }
 0x36e   : > { %v4719_v35 = vpop.eup %4718  ;;  %v2432_v43 = vmul.f32 %v4717_v49, %v4697_v34  ;;  %4738 = vpow2.f32 %v3974_v58 }
 0x36f   : > { %v4721_v14 = vpop.eup %4720  ;;  %4740 = vrcp.f32 %v2352_v17  ;;  %v2355_v59 = vadd.f32 1.0, %v4719_v35 }
 0x370   : > { %v4723_v25 = vpop.eup %4722  ;;  %v2435_v57 = vmul.f32 %v4721_v14, %v4701_v48  ;;  %4742 = vtanh.f32 %v7841_v56  ;;  %v8814_v14 = vld [vmem:[#allocation81_spill] sm:$0xff] }
 0x371   : > { %v4725_v55 = vpop.eup %4724  ;;  %4744 = vrcp.f32 %v2355_v59 }
 0x372   : > { %v4727_v46 = vpop.eup %4726  ;;  %4746 = vpow2.f32 %v3973_v18 }
 0x373   : > { %v4729_v34 = vpop.eup %4728  ;;  %4748 = vtanh.f32 %v7847_v29 }
 0x374   : > { %v4731_v16 = vpop.eup %4730  ;;  %4750 = vrcp.f32 %v2358_v13  ;;  %v2423_v12 = vmul.f32 %v4729_v34, %v8811_v23 }
 0x375   : > { %v4733_v11 = vpop.eup %4732  ;;  %4752 = vrcp.f32 %v2361_v19  ;;  %v2354_v56 = vadd.f32 1.0, %v4731_v16 }
 0x376   : > { %v4735_v48 = vpop.eup %4734  ;;  %4754 = vpow2.f32 %v3982_v10  ;;  %v7871_v33 = vadd.f32 %v2431_v50, %v2423_v12  ;;  %v2422_v58 = vmul.f32 %v4733_v11, %v8812_v38 }
 0x377   : > { %v4737_v42 = vpop.eup %4736  ;;  %4756 = vrcp.f32 %v2354_v56  ;;  %v2434_v15 = vmul.f32 %v4735_v48, %v4723_v25 }
 0x378   : > { %v4739_v61 = vpop.eup %4738  ;;  %4758 = vtanh.f32 %v7871_v33  ;;  %v7875_v29 = vadd.f32 %v2430_v36, %v2422_v58  ;;  %v2425_v49 = vmul.f32 %v4737_v42, %v8813_v20 }
 0x379   : > { %v4741_v17 = vpop.eup %4740  ;;  %4760 = vpow2.f32 %v3981_v27  ;;  %v2357_v35 = vadd.f32 1.0, %v4739_v61 }
 0x37a   : > { %v4743_v18 = vpop.eup %4742  ;;  %4762 = vtanh.f32 %v7875_v29  ;;  %v7880_v50 = vadd.f32 %v2433_v47, %v2425_v49  ;;  %v2424_v59 = vmul.f32 %v4741_v17, %v8814_v14 }
 0x37b   : > { %v4745_v25 = vpop.eup %4744  ;;  %4764 = vrcp.f32 %v2357_v35  ;;  %v2437_v13 = vmul.f32 %v4743_v18, %v4725_v55  ;;  %v2363_v55 = vadd.f32 1.0, %v7853_v3 }
 0x37c   : > { %v4747_v19 = vpop.eup %4746  ;;  %4766 = vtanh.f32 %v7880_v50  ;;  %v7884_v36 = vadd.f32 %v2432_v43, %v2424_v59  ;;  %v2427_v10 = vmul.f32 %v4745_v25, %v7537_v2  ;;  %v2362_v43 = vadd.f32 1.0, %v7855_v32 }
 0x37d   : > { %v4749_v54 = vpop.eup %4748  ;;  %4768 = vrcp.f32 %v2360_v41  ;;  %v2356_v34 = vadd.f32 1.0, %v4747_v19 }
 0x37e   : > { %v4751_v16 = vpop.eup %4750  ;;  %4770 = vtanh.f32 %v7884_v36  ;;  %v7888_v47 = vadd.f32 %v2435_v57, %v2427_v10  ;;  %v2436_v23 = vmul.f32 %v4749_v54, %v4727_v46 }
 0x37f   : > { %v4753_v12 = vpop.eup %4752  ;;  %4772 = vrcp.f32 %v2356_v34 }
 0x380   : > { %v4755_v11 = vpop.eup %4754  ;;  %4774 = vtanh.f32 %v7888_v47 }
 0x381   : > { %v4757_v27 = vpop.eup %4756  ;;  %4776 = vrcp.f32 %v2363_v55  ;;  %v2365_v41 = vadd.f32 1.0, %v4755_v11 }
 0x382   : > { %v4759_v56 = vpop.eup %4758  ;;  %v2426_v2 = vmul.f32 %v4757_v27, %v7530_v28  ;;  %4778 = vrcp.f32 %v2362_v43 }
 0x383   : > { %v4761_v48 = vpop.eup %4760  ;;  %v2455_v38 = vmul.f32 %v4759_v56, %v7859_v8 }
 0x384   : > { %v4763_v58 = vpop.eup %4762  ;;  %v7895_v57 = vadd.f32 %v2434_v15, %v2426_v2  ;;  %v2364_v18 = vadd.f32 1.0, %v4761_v48 }
 0x385   : > { %v4765_v46 = vpop.eup %4764  ;;  %v2454_v42 = vmul.f32 %v4763_v58, %v4751_v16  ;;  %v2463_v3 = vmul.f32 %v2455_v38, %v7548_v30 }
 0x386   : > { %v4767_v61 = vpop.eup %4766  ;;  %4780 = vtanh.f32 %v7895_v57  ;;  %v2429_v32 = vmul.f32 %v4765_v46, %v7569_v31 }
 0x387   : > { %v4769_v20 = vpop.eup %4768  ;;  %v2462_v28 = vmul.f32 %v2454_v42, %v7540_v26  ;;  %v4431_v49 = vpack.c.bf16 %v2455_v38, %v2454_v42  ;;  %v2457_v17 = vmul.f32 %v4767_v61, %v4753_v12 }
 0x388   : > { %v4771_v8 = vpop.eup %4770  ;;  %v7901_v35 = vadd.f32 %v2437_v13, %v2429_v32 }
 0x389   : > { %v4773_v15 = vpop.eup %4772  ;;  %v2470_v14 = vadd.f32 %v2463_v3, %v2462_v28  ;;  %4432 = vmatprep.subr.bf16.mxu1 %v4431_v49  ;;  %v2456_v59 = vmul.f32 %v4771_v8, %v4769_v20  ;;  %v2465_v13 = vmul.f32 %v2457_v17, %v7556_v5 }
 0x38a   : > { %4782 = vtanh.f32 %v7901_v35  ;;  %v2428_v25 = vmul.f32 %v4773_v15, %v7566_v7  ;;  %4434 = vmatpush3.bf16.msra.mxu1 %v4431_v49  ;;  %v4775_v10 = vpop.eup %4774 }
 0x38b   : > { %v2464_v31 = vmul.f32 %v2456_v59, %v7546_v4  ;;  %v4435_v19 = vpack.c.bf16 %v2457_v17, %v2456_v59  ;;  %4784 = vrcp.f32 %v2365_v41  ;;  %v4777_v16 = vpop.eup %4776  ;;  %v8827_v59 = vld [vmem:[#allocation41_spill] sm:$0xff] }
 0x38c   : > { %v7906_v54 = vadd.f32 %v2436_v23, %v2428_v25  ;;  %4786 = vrcp.f32 %v2364_v18  ;;  %v4779_v12 = vpop.eup %4778  ;;  %v2459_v7 = vmul.f32 %v4777_v16, %v4775_v10  ;;  %v8828_v25 = vld [vmem:[#allocation88_spill] sm:$0xff] }
 0x38d   : > { %v2471_v34 = vadd.f32 %v2470_v14, %v2464_v31  ;;  %4436 = vmatprep.subr.bf16.mxu1 %v4435_v19  ;;  %v8829_v31 = vld [vmem:[#allocation60_spill] sm:$0xff] }
 0x38e   : > { %4788 = vtanh.f32 %v7906_v54  ;;  %4438 = vmatpush3.bf16.msra.mxu1 %v4435_v19  ;;  %v2467_v23 = vmul.f32 %v2459_v7, %v7563_v24  ;;  %v8830_v19 = vld [vmem:[#allocation46_spill] sm:$0xff] }
 0x38f   : > { %v2472_v11 = vadd.f32 %v2471_v34, %v2465_v13  ;;  %v8831_v13 = vld [vmem:[#allocation113_spill] sm:$0xff] }
 0x390   : > { %v4781_v55 = vpop.eup %4780 }
 0x391   : > { %v2458_v27 = vmul.f32 %v4781_v55, %v4779_v12  ;;  %v8832_v12 = vld [vmem:[#allocation114_spill] sm:$0xff] }
 0x392   : > { %v8833_v55 = vld [vmem:[#allocation122_spill] sm:$0xff] }
 0x393   : > { %v2466_v43 = vmul.f32 %v2458_v27, %v7560_v9  ;;  %v4439_v56 = vpack.c.bf16 %v2459_v7, %v2458_v27 }
 0x394   : > { %v4783_v2 = vpop.eup %4782 }
 0x395   : > { %v2473_v48 = vadd.f32 %v2472_v11, %v2466_v43  ;;  %4440 = vmatprep.subr.bf16.mxu1 %v4439_v56  ;;  %v4785_v38 = vpop.eup %4784 }
 0x396   : > { %4442 = vmatpush3.bf16.msra.mxu1 %v4439_v56  ;;  %v4787_v58 = vpop.eup %4786  ;;  %v2461_v42 = vmul.f32 %v4785_v38, %v4783_v2  ;;  %v8834_v56 = vld [vmem:[#allocation44_spill] sm:$0xff]  ;;  %v8835_v38 = vld [vmem:[#allocation131_spill] sm:$0xff] }
 0x397   : > { %v2474_v46 = vadd.f32 %v2473_v48, %v2467_v23 }
 0x398   : > { %v4789_v3 = vpop.eup %4788  ;;  %v2469_v28 = vmul.f32 %v2461_v42, %v7575_v53 }
 0x399   : > { %v2460_v61 = vmul.f32 %v4789_v3, %v4787_v58 }
 0x39b   : > { %v2468_v32 = vmul.f32 %v2460_v61, %v7572_v63  ;;  %v4443_v20 = vpack.c.bf16 %v2461_v42, %v2460_v61  ;;  %v8836_v42 = vld [vmem:[#allocation132_spill] sm:$0xff] }
 0x39d   : > { %v2475_v49 = vadd.f32 %v2474_v46, %v2468_v32  ;;  %4444 = vmatprep.subr.bf16.mxu1 %v4443_v20 }
 0x39e   : > { %4446 = vmatpush3.bf16.msra.mxu1 %v4443_v20  ;;  %v8837_v20 = vld [vmem:[#allocation144_spill] sm:$0xff] }
 0x39f   : > { %v2476_v17 = vadd.f32 %v2475_v49, %v2469_v28 }
 0x3a1   : > { %v2477_v8 = vrot.slane %v2476_v17, 4  ;;  %4304 = vmatmul.mubr.msk.f32.vlgmr.msra.gmra.mrb[16].mxu1 %vm1948_vm0, %v7581_v44 }
 0x3a2   : > { %4306 = vmatprep.mubr.msk.f32.mxu1 %vm1948_vm0, %v7591_v51  ;;  %v8815_v51 = vld [vmem:[#allocation153_spill] sm:$0xff] }
 0x3a3   : > { %v2478_v41 = vadd.f32 %v2477_v8, %v2476_v17  ;;  %v8838_v8 = vld [vmem:[#allocation55_spill] sm:$0xff] }
 0x3a5   : > { %v2479_v15 = vrot.slane %v2478_v41, 2  ;;  %4307 = vmatmul.mubr.msk.f32.gmra.mrb[18].mxu1 %vm1948_vm0, %v7609_v60  ;;  %v7948_v60 = vld [vmem:[%s8295_s1 + $0x80] sm:$0xff] }
 0x3a6   : > { %4309 = vmatprep.mubr.msk.f32.mxu1 %vm1948_vm0, %v7619_v40  ;;  %v8816_v40 = vld [vmem:[#allocation19_spill] sm:$0xff] }
 0x3a7   : > { %v2480_v18 = vadd.f32 %v2479_v15, %v2478_v41 }
 0x3a9   : > { %v2481_v14 = vrot.slane %v2480_v18, 1  ;;  %4310 = vmatmul.mubr.msk.f32.gmra.mrb[20].mxu1 %vm1948_vm0, %v7639_v1  ;;  %v8817_v1 = vld [vmem:[#allocation13_spill] sm:$0xff] }
 0x3aa   : > { %4312 = vmatprep.mubr.msk.f32.mxu1 %vm1948_vm0, %v7649_v45  ;;  %v8818_v45 = vld [vmem:[#allocation27_spill] sm:$0xff] }
 0x3ab   : > { %v2482_v44 = vadd.f32 %v2481_v14, %v2480_v18 }
 0x3ad   : > { %3983 = vst [vmem:[%s7674_s29 + $0x1] sm:$0x1] %v2482_v44  ;;  %4313 = vmatmul.mubr.msk.f32.gmra.mrb[22].mxu1 %vm1948_vm0, %v7667_v6  ;;  %v8819_v6 = vld [vmem:[#allocation15_spill] sm:$0xff] }
 0x3ae   : > { %4315 = vmatprep.mubr.msk.f32.mxu1 %vm1948_vm0, %v7680_v62  ;;  %v8820_v62 = vld [vmem:[#allocation20_spill] sm:$0xff] }
 0x3b1   : > { %4316 = vmatmul.mubr.msk.f32.gmra.mrb[24].mxu1 %vm1948_vm0, %v7698_v52  ;;  %v8821_v52 = vld [vmem:[#allocation22_spill] sm:$0xff] }
 0x3b2   : > { %4318 = vmatprep.mubr.msk.f32.mxu1 %vm1948_vm0, %v7708_v39  ;;  %v8822_v39 = vld [vmem:[#allocation28_spill] sm:$0xff] }
 0x3b5   : > { %4319 = vmatmul.mubr.msk.f32.gmra.mrb[26].mxu1 %vm1948_vm0, %v7726_v22  ;;  %v8823_v22 = vld [vmem:[#allocation29_spill] sm:$0xff] }
 0x3b6   : > { %4321 = vmatprep.mubr.msk.f32.mxu1 %vm1948_vm0, %v7736_v21  ;;  %v8824_v21 = vld [vmem:[#allocation31_spill] sm:$0xff] }
 0x3b9   : > { %4322 = vmatmul.mubr.msk.f32.gmra.mrb[28].mxu1 %vm1948_vm0, %v7754_v37  ;;  %v8825_v37 = vld [vmem:[#allocation7_spill] sm:$0xff] }
 0x3ba   : > { %4324 = vmatprep.mubr.msk.f32.mxu1 %vm1948_vm0, %v7764_v0  ;;  %v8826_v0 = vld [vmem:[#allocation34_spill] sm:$0xff] }
 0x3bd   : > { %4325 = vmatmul.mubr.msk.f32.gmra.mrb[30].mxu1 %vm1948_vm0, %v8815_v51  ;;  %v8839_v51 = vld [vmem:[#allocation39_spill] sm:$0xff] }
 0x3be   : > { %4327 = vmatprep.mubr.msk.f32.mxu1 %vm1948_vm0, %v7948_v60 }
 0x3c1   : > { %4328 = vmatmul.mubr.msk.f32.gmra.mrb[32].mxu1 %vm1948_vm0, %v8816_v40 }
 0x3c2   : > { %4330 = vmatprep.mubr.msk.f32.mxu1 %vm1948_vm0, %v8817_v1 }
 0x3c5   : > { %4331 = vmatmul.mubr.msk.f32.gmra.mrb[34].mxu1 %vm1948_vm0, %v8818_v45 }
 0x3c6   : > { %4333 = vmatprep.mubr.msk.f32.mxu1 %vm1948_vm0, %v8819_v6  ;;  %v8840_v6 = vld [vmem:[#allocation118_spill] sm:$0xff] }
 0x3c9   : > { %4334 = vmatmul.mubr.msk.f32.gmra.mrb[36].mxu1 %vm1948_vm0, %v8820_v62 }
 0x3ca   : > { %4336 = vmatprep.mubr.msk.f32.mxu1 %vm1948_vm0, %v8821_v52 }
 0x3cd   : > { %4337 = vmatmul.mubr.msk.f32.gmra.mrb[38].mxu1 %vm1948_vm0, %v8822_v39 }
 0x3ce   : > { %4339 = vmatprep.mubr.msk.f32.mxu1 %vm1948_vm0, %v8823_v22 }
 0x3d1   : > { %4340 = vmatmul.mubr.msk.f32.gmra.mrb[40].mxu1 %vm1948_vm0, %v8824_v21  ;;  %v8841_v21 = vld [vmem:[#allocation49_spill] sm:$0xff] }
 0x3d2   : > { %4342 = vmatprep.mubr.msk.f32.mxu1 %vm1948_vm0, %v8825_v37 }
 0x3d5   : > { %4343 = vmatmul.mubr.msk.f32.gmra.mrb[42].mxu1 %vm1948_vm0, %v8826_v0 }
 0x3d6   : > { %4345 = vmatprep.mubr.msk.f32.mxu1 %vm1948_vm0, %v8827_v59  ;;  %v8842_v59 = vld [vmem:[#allocation65_spill] sm:$0xff] }
 0x3d9   : > { %4346 = vmatmul.mubr.msk.f32.gmra.mrb[44].mxu1 %vm1948_vm0, %v8828_v25 }
 0x3da   : > { %4348 = vmatprep.mubr.msk.f32.mxu1 %vm1948_vm0, %v8829_v31 }
 0x3dd   : > { %4349 = vmatmul.mubr.msk.f32.gmra.mrb[46].mxu1 %vm1948_vm0, %v8830_v19 }
 0x474   : > { %v4305_v10 = vpop.f32.mrb[16].mxu1 }
 0x475   : > { %v2763_v34 = vadd.f32 %v4305_v10, %v8831_v13  ;;  %v2757_v16 = vpop.f32.mrb[17].mxu1 }
 0x476   : > { %v2758_v11 = vadd.f32 %v2757_v16, %v8832_v12 }
 0x477   : > { %v4018_v48 = vmul.f32 -1.442695, %v2763_v34  ;;  %v8843_v34 = vld [vmem:[#allocation78_spill] sm:$0xff] }
 0x478   : > { %v4308_v7 = vpop.f32.mrb[18].mxu1  ;;  %v4017_v61 = vmul.f32 -1.442695, %v2758_v11 }
 0x479   : > { %v2773_v27 = vadd.f32 %v4308_v7, %v8833_v55  ;;  %v2767_v43 = vpop.f32.mrb[19].mxu1  ;;  %4790 = vpow2.f32 %v4018_v48  ;;  %v8844_v55 = vld [vmem:[#allocation135_spill] sm:$0xff] }
 0x47a   : > { %v2768_v2 = vadd.f32 %v2767_v43, %v8834_v56  ;;  %4792 = vpow2.f32 %v4017_v61 }
 0x47b   : > { %v4020_v17 = vmul.f32 -1.442695, %v2773_v27 }
 0x47c   : > { %v4311_v23 = vpop.f32.mrb[20].mxu1  ;;  %v4019_v15 = vmul.f32 -1.442695, %v2768_v2 }
 0x47d   : > { %v2783_v58 = vadd.f32 %v4311_v23, %v8835_v38  ;;  %v2777_v46 = vpop.f32.mrb[21].mxu1  ;;  %4794 = vpow2.f32 %v4020_v17 }
 0x47e   : > { %v2778_v3 = vadd.f32 %v2777_v46, %v8836_v42  ;;  %4796 = vpow2.f32 %v4019_v15 }
 0x47f   : > { %v4022_v18 = vmul.f32 -1.442695, %v2783_v58  ;;  %v8845_v58 = vld [vmem:[#allocation58_spill] sm:$0xff] }
 0x480   : > { %v4314_v32 = vpop.f32.mrb[22].mxu1  ;;  %v4021_v44 = vmul.f32 -1.442695, %v2778_v3 }
 0x481   : > { %v2793_v28 = vadd.f32 %v4314_v32, %v8837_v20  ;;  %v2787_v49 = vpop.f32.mrb[23].mxu1  ;;  %4798 = vpow2.f32 %v4022_v18  ;;  %v8846_v32 = vld [vmem:[#allocation147_spill] sm:$0xff] }
 0x482   : > { %v2788_v41 = vadd.f32 %v2787_v49, %v8838_v8  ;;  %4800 = vpow2.f32 %v4021_v44 }
 0x483   : > { %v4024_v45 = vmul.f32 -1.442695, %v2793_v28  ;;  %v4791_v31 = vpop.eup %4790 }
 0x484   : > { %v4317_v14 = vpop.f32.mrb[24].mxu1  ;;  %v4023_v52 = vmul.f32 -1.442695, %v2788_v41  ;;  %v4793_v11 = vpop.eup %4792  ;;  %v2989_v7 = vadd.f32 1.0, %v4791_v31 }
 0x485   : > { %v2803_v40 = vadd.f32 %v4317_v14, %v8839_v51  ;;  %v2797_v1 = vpop.f32.mrb[25].mxu1  ;;  %4802 = vpow2.f32 %v4024_v45  ;;  %v2988_v38 = vadd.f32 1.0, %v4793_v11  ;;  %v8847_v14 = vld [vmem:[#allocation108_spill] sm:$0xff] }
 0x486   : > { %v2798_v62 = vadd.f32 %v2797_v1, %v8840_v6  ;;  %4804 = vpow2.f32 %v4023_v52  ;;  %v8848_v1 = vld [vmem:[#allocation71_spill] sm:$0xff] }
 0x487   : > { %v4026_v22 = vmul.f32 -1.442695, %v2803_v40  ;;  %v4795_v56 = vpop.eup %4794 }
 0x488   : > { %v4320_v39 = vpop.f32.mrb[26].mxu1  ;;  %v4025_v19 = vmul.f32 -1.442695, %v2798_v62  ;;  %v4797_v48 = vpop.eup %4796  ;;  %v2991_v49 = vadd.f32 1.0, %v4795_v56 }
 0x489   : > { %v2813_v37 = vadd.f32 %v4320_v39, %v8841_v21  ;;  %v2807_v0 = vpop.f32.mrb[27].mxu1  ;;  %4806 = vpow2.f32 %v4026_v22  ;;  %v2990_v8 = vadd.f32 1.0, %v4797_v48 }
 0x48a   : > { %v2808_v25 = vadd.f32 %v2807_v0, %v8842_v59  ;;  %4808 = vpow2.f32 %v4025_v19  ;;  %v8850_v19 = vld [vmem:[#allocation16_spill] sm:$0xff] }
 0x48b   : > { %v4028_v10 = vmul.f32 -1.442695, %v2813_v37  ;;  %v4799_v3 = vpop.eup %4798  ;;  %v8849_v37 = vld [vmem:[#allocation37_spill] sm:$0xff] }
 0x48c   : > { %v4323_v13 = vpop.f32.mrb[28].mxu1  ;;  %v4027_v43 = vmul.f32 -1.442695, %v2808_v25  ;;  %v4801_v28 = vpop.eup %4800  ;;  %v2993_v18 = vadd.f32 1.0, %v4799_v3 }
 0x48d   : > { %v2823_v16 = vadd.f32 %v4323_v13, %v8843_v34  ;;  %v2817_v12 = vpop.f32.mrb[29].mxu1  ;;  %4810 = vpow2.f32 %v4028_v10  ;;  %v2992_v40 = vadd.f32 1.0, %v4801_v28 }
 0x48e   : > { %v2818_v27 = vadd.f32 %v2817_v12, %v8844_v55  ;;  %4812 = vrcp.f32 %v2989_v7  ;;  %v8851_v55 = vld [vmem:[#allocation93_spill] sm:$0xff] }
 0x48f   : > { %v4030_v2 = vmul.f32 -1.442695, %v2823_v16  ;;  %4814 = vpow2.f32 %v4027_v43  ;;  %v4803_v17 = vpop.eup %4802 }
 0x490   : > { %v4326_v23 = vpop.f32.mrb[30].mxu1  ;;  %v4029_v61 = vmul.f32 -1.442695, %v2818_v27  ;;  %v4805_v15 = vpop.eup %4804  ;;  %v2995_v62 = vadd.f32 1.0, %v4803_v17 }
 0x491   : > { %v2833_v46 = vadd.f32 %v4326_v23, %v8845_v58  ;;  %v2827_v42 = vpop.f32.mrb[31].mxu1  ;;  %4816 = vpow2.f32 %v4030_v2  ;;  %v2994_v52 = vadd.f32 1.0, %v4805_v15  ;;  %v8852_v23 = vld [vmem:[#allocation99_spill] sm:$0xff] }
 0x492   : > { %v2828_v20 = vadd.f32 %v2827_v42, %v8846_v32  ;;  %4818 = vrcp.f32 %v2988_v38 }
 0x493   : > { %4820 = vpow2.f32 %v4029_v61  ;;  %v4807_v6 = vpop.eup %4806  ;;  %v4032_v21 = vmul.f32 -1.442695, %v2833_v46 }
 0x494   : > { %v4329_v41 = vpop.f32.mrb[32].mxu1  ;;  %4822 = vrcp.f32 %v2991_v49  ;;  %v4809_v22 = vpop.eup %4808  ;;  %v2997_v31 = vadd.f32 1.0, %v4807_v6  ;;  %v4031_v13 = vmul.f32 -1.442695, %v2828_v20  ;;  %v8853_v20 = vld [vmem:[#allocation4_spill] sm:$0xff]  ;;  %v8855_v6 = vld [vmem:[#allocation79_spill] sm:$0xff] }
 0x495   : > { %v2843_v44 = vadd.f32 %v4329_v41, %v8847_v14  ;;  %v2837_v51 = vpop.f32.mrb[33].mxu1  ;;  %4824 = vrcp.f32 %v2990_v8  ;;  %v2996_v16 = vadd.f32 1.0, %v4809_v22  ;;  %v8854_v41 = vld [vmem:[#allocation139_spill] sm:$0xff]  ;;  %v8856_v22 = vld [vmem:[#allocation110_spill] sm:$0xff] }
 0x496   : > { %v2838_v45 = vadd.f32 %v2837_v51, %v8848_v1  ;;  %4826 = vrcp.f32 %v2993_v18 }
 0x497   : > { %v4811_v25 = vpop.eup %4810  ;;  %4828 = vrcp.f32 %v2992_v40  ;;  %v4034_v2 = vmul.f32 -1.442695, %v2843_v44 }
 0x498   : > { %v4332_v39 = vpop.f32.mrb[34].mxu1  ;;  %4830 = vrcp.f32 %v2995_v62  ;;  %v8002_v34 = vpop.eup %4812  ;;  %v2999_v7 = vadd.f32 1.0, %v4811_v25  ;;  %v4033_v58 = vmul.f32 -1.442695, %v2838_v45 }
 0x499   : > { %v2853_v0 = vadd.f32 %v4332_v39, %v8849_v37  ;;  %v2847_v59 = vpop.f32.mrb[35].mxu1  ;;  %4832 = vrcp.f32 %v2994_v52  ;;  %v4815_v11 = vpop.eup %4814 }
 0x49a   : > { %v2848_v10 = vadd.f32 %v2847_v59, %v8850_v19  ;;  %4834 = vpow2.f32 %v4032_v21  ;;  %v2998_v42 = vadd.f32 1.0, %v4815_v11  ;;  %v8857_v19 = vld [vmem:[#allocation24_spill] sm:$0xff] }
 0x49b   : > { %v4817_v56 = vpop.eup %4816  ;;  %4836 = vrcp.f32 %v2997_v31  ;;  %v4036_v8 = vmul.f32 -1.442695, %v2853_v0  ;;  %v8858_v11 = vld [vmem:[#allocation72_spill] sm:$0xff] }
 0x49c   : > { %v4335_v12 = vpop.f32.mrb[36].mxu1  ;;  %v8006_v38 = vpop.eup %4818  ;;  %4838 = vpow2.f32 %v4031_v13  ;;  %v3001_v32 = vadd.f32 1.0, %v4817_v56  ;;  %v4035_v51 = vmul.f32 -1.442695, %v2848_v10 }
 0x49d   : > { %v2863_v27 = vadd.f32 %v4335_v12, %v8851_v55  ;;  %v2857_v43 = vpop.f32.mrb[37].mxu1  ;;  %v4821_v46 = vpop.eup %4820  ;;  %4840 = vrcp.f32 %v2996_v16 }
 0x49e   : > { %v2858_v48 = vadd.f32 %v2857_v43, %v8852_v23  ;;  %v8008_v61 = vpop.eup %4822  ;;  %4842 = vrcp.f32 %v2999_v7  ;;  %v3000_v14 = vadd.f32 1.0, %v4821_v46 }
 0x49f   : > { %v8011_v17 = vpop.eup %4824  ;;  %4844 = vpow2.f32 %v4034_v2  ;;  %v4038_v45 = vmul.f32 -1.442695, %v2863_v27 }
 0x4a0   : > { %v4338_v3 = vpop.f32.mrb[38].mxu1  ;;  %v8014_v18 = vpop.eup %4826  ;;  %4846 = vpow2.f32 %v4033_v58  ;;  %v4037_v59 = vmul.f32 -1.442695, %v2858_v48  ;;  %v8859_v48 = vld [vmem:[#allocation137_spill] sm:$0xff] }
 0x4a1   : > { %v2873_v28 = vadd.f32 %v4338_v3, %v8853_v20  ;;  %v2867_v49 = vpop.f32.mrb[39].mxu1  ;;  %v8016_v44 = vpop.eup %4828  ;;  %4848 = vrcp.f32 %v2998_v42  ;;  %v8860_v3 = vld [vmem:[#allocation62_spill] sm:$0xff] }
 0x4a2   : > { %v2868_v15 = vadd.f32 %v2867_v49, %v8854_v41  ;;  %v8018_v1 = vpop.eup %4830  ;;  %4850 = vrcp.f32 %v3001_v32 }
 0x4a3   : > { %v8021_v39 = vpop.eup %4832  ;;  %4852 = vpow2.f32 %v4036_v8  ;;  %v4040_v27 = vmul.f32 -1.442695, %v2873_v28 }
 0x4a4   : > { %v4341_v40 = vpop.f32.mrb[40].mxu1  ;;  %v4835_v37 = vpop.eup %4834  ;;  %4854 = vrcp.f32 %v3000_v14  ;;  %v4039_v56 = vmul.f32 -1.442695, %v2868_v15  ;;  %v8861_v15 = vld [vmem:[#allocation23_spill] sm:$0xff] }
 0x4a5   : > { %v2883_v62 = vadd.f32 %v4341_v40, %v8855_v6  ;;  %v2877_v52 = vpop.f32.mrb[41].mxu1  ;;  %v4837_v0 = vpop.eup %4836  ;;  %4856 = vpow2.f32 %v4035_v51  ;;  %v3003_v12 = vadd.f32 1.0, %v4835_v37  ;;  %v8862_v6 = vld [vmem:[#allocation6_spill] sm:$0xff] }
 0x4a6   : > { %v2878_v21 = vadd.f32 %v2877_v52, %v8856_v22  ;;  %v4839_v31 = vpop.eup %4838  ;;  %4858 = vpow2.f32 %v4038_v45 }
 0x4a7   : > { %v4841_v16 = vpop.eup %4840  ;;  %4860 = vtanh.f32 %v2883_v62  ;;  %v3002_v49 = vadd.f32 1.0, %v4839_v31 }
 0x4a8   : > { %v4344_v25 = vpop.f32.mrb[42].mxu1  ;;  %v4843_v55 = vpop.eup %4842  ;;  %4862 = vtanh.f32 %v2878_v21 }
 0x4a9   : > { %v2893_v10 = vadd.f32 %v4344_v25, %v8857_v19  ;;  %v2887_v13 = vpop.f32.mrb[43].mxu1  ;;  %v4845_v43 = vpop.eup %4844  ;;  %4864 = vpow2.f32 %v4037_v59  ;;  %v3069_v59 = vmul.f32 %v4837_v0, %v7871_v33  ;;  %v3068_v19 = vmul.f32 %v4841_v16, %v7875_v29 }
 0x4aa   : > { %v2888_v7 = vadd.f32 %v2887_v13, %v8858_v11  ;;  %v4847_v23 = vpop.eup %4846  ;;  %v3005_v41 = vadd.f32 1.0, %v4845_v43 }
 0x4ab   : > { %4866 = vtanh.f32 %v2893_v10  ;;  %v4849_v42 = vpop.eup %4848  ;;  %v3004_v21 = vadd.f32 1.0, %v4847_v23 }
 0x4ac   : > { %v4347_v2 = vpop.f32.mrb[44].mxu1  ;;  %4868 = vrcp.f32 %v3003_v12  ;;  %v4851_v20 = vpop.eup %4850 }
 0x4ad   : > { %v2903_v58 = vadd.f32 %v4347_v2, %v8859_v48  ;;  %v2897_v46 = vpop.f32.mrb[45].mxu1  ;;  %4870 = vpow2.f32 %v4040_v27  ;;  %v4853_v8 = vpop.eup %4852  ;;  %v3071_v27 = vmul.f32 %v4843_v55, %v7880_v50  ;;  %v3070_v50 = vmul.f32 %v4849_v42, %v7884_v36 }
 0x4ae   : > { %v2898_v32 = vadd.f32 %v2897_v46, %v8860_v3  ;;  %4872 = vpow2.f32 %v4039_v56  ;;  %v4855_v14 = vpop.eup %4854  ;;  %v3007_v12 = vadd.f32 1.0, %v4853_v8  ;;  %v3073_v48 = vmul.f32 %v4851_v20, %v7888_v47 }
 0x4af   : > { %4874 = vtanh.f32 %v2888_v7  ;;  %v4857_v45 = vpop.eup %4856  ;;  %v3072_v42 = vmul.f32 %v4855_v14, %v7895_v57 }
 0x4b0   : > { %v4350_v28 = vpop.f32.mrb[46].mxu1  ;;  %4876 = vtanh.f32 %v2903_v58  ;;  %v4859_v52 = vpop.eup %4858  ;;  %v3006_v0 = vadd.f32 1.0, %v4857_v45 }
 0x4b1   : > { %v2913_v51 = vadd.f32 %v4350_v28, %v8861_v15  ;;  %v2907_v40 = vpop.f32.mrb[47].mxu1  ;;  %4878 = vrcp.f32 %v3002_v49  ;;  %v4861_v22 = vpop.eup %4860 }
 0x4b2   : > { %v2908_v62 = vadd.f32 %v2907_v40, %v8862_v6  ;;  %4880 = vrcp.f32 %v3005_v41  ;;  %v4863_v37 = vpop.eup %4862  ;;  %v3077_v25 = vmul.f32 %v4861_v22, %v8002_v34 }
 0x4b3   : > { %4882 = vtanh.f32 %v2898_v32  ;;  %v4865_v31 = vpop.eup %4864  ;;  %v3076_v10 = vmul.f32 %v4863_v37, %v8006_v38  ;;  %v3009_v38 = vadd.f32 1.0, %v4859_v52 }
 0x4b4   : > { %4884 = vtanh.f32 %v2913_v51  ;;  %v8034_v11 = vadd.f32 %v3077_v25, %v3069_v59  ;;  %v3008_v2 = vadd.f32 1.0, %v4865_v31 }
 0x4b5   : > { %v4867_v13 = vpop.eup %4866  ;;  %4886 = vtanh.f32 %v2908_v62  ;;  %v8037_v43 = vadd.f32 %v3076_v10, %v3068_v19 }
 0x4b6   : > { %v4869_v7 = vpop.eup %4868  ;;  %4888 = vrcp.f32 %v3004_v21  ;;  %v3079_v33 = vmul.f32 %v4867_v13, %v8008_v61 }
 0x4b7   : > { %v4871_v34 = vpop.eup %4870  ;;  %4890 = vtanh.f32 %v8034_v11 }
 0x4b8   : > { %v4873_v29 = vpop.eup %4872  ;;  %4892 = vtanh.f32 %v8037_v43  ;;  %v8042_v16 = vadd.f32 %v3079_v33, %v3071_v27  ;;  %v3011_v3 = vadd.f32 1.0, %v4871_v34 }
 0x4b9   : > { %v4875_v56 = vpop.eup %4874  ;;  %4894 = vrcp.f32 %v3007_v12  ;;  %v3010_v8 = vadd.f32 1.0, %v4873_v29 }
 0x4ba   : > { %v4877_v23 = vpop.eup %4876  ;;  %4896 = vtanh.f32 %v8042_v16  ;;  %v3078_v61 = vmul.f32 %v4875_v56, %v8011_v17 }
 0x4bb   : > { %v4879_v55 = vpop.eup %4878  ;;  %4898 = vrcp.f32 %v3006_v0  ;;  %v3081_v58 = vmul.f32 %v4877_v23, %v8014_v18  ;;  %v3075_v18 = vmul.f32 %v4869_v7, %v7901_v35 }
 0x4bc   : > { %v4881_v46 = vpop.eup %4880  ;;  %4900 = vrcp.f32 %v3009_v38  ;;  %v8049_v32 = vadd.f32 %v3078_v61, %v3070_v50  ;;  %v3074_v15 = vmul.f32 %v4879_v55, %v7906_v54 }
 0x4bd   : > { %v4883_v49 = vpop.eup %4882  ;;  %4902 = vrcp.f32 %v3008_v2  ;;  %v8051_v41 = vadd.f32 %v3081_v58, %v3073_v48 }
 0x4be   : > { %v4885_v36 = vpop.eup %4884  ;;  %4904 = vtanh.f32 %v8049_v32  ;;  %v3080_v47 = vmul.f32 %v4883_v49, %v8016_v44 }
 0x4bf   : > { %v4887_v17 = vpop.eup %4886  ;;  %4906 = vtanh.f32 %v8051_v41  ;;  %v3083_v20 = vmul.f32 %v4885_v36, %v8018_v1 }
 0x4c0   : > { %v4889_v28 = vpop.eup %4888  ;;  %4908 = vrcp.f32 %v3011_v3  ;;  %v8060_v51 = vadd.f32 %v3080_v47, %v3072_v42  ;;  %v3082_v40 = vmul.f32 %v4887_v17, %v8021_v39 }
 0x4c1   : > { %v4891_v57 = vpop.eup %4890  ;;  %4910 = vrcp.f32 %v3010_v8  ;;  %v8063_v14 = vadd.f32 %v3083_v20, %v3075_v18  ;;  %v5051_v18 = vld [vmem:[%s8295_s1 + $0x8] sm:$0xff]  ;;  %v5052_v20 = vld [vmem:[%s8295_s1 + $0x10] sm:$0xff] }
 0x4c2   : > { %v4893_v44 = vpop.eup %4892  ;;  %4912 = vtanh.f32 %v8060_v51  ;;  %v8066_v35 = vadd.f32 %v3082_v40, %v3074_v15  ;;  %v3101_v45 = vmul.f32 %v4891_v57, %v4881_v46  ;;  %v5053_v40 = vld [vmem:[%s8295_s1 + $0x18] sm:$0xff]  ;;  %v5054_v57 = vld [vmem:[%s8295_s1 + $0x20] sm:$0xff] }
 0x4c3   : > { %v4895_v6 = vpop.eup %4894  ;;  %4914 = vtanh.f32 %v8063_v14  ;;  %v3100_v1 = vmul.f32 %v4893_v44, %v4889_v28 }
 0x4c4   : > { %v4897_v54 = vpop.eup %4896  ;;  %4916 = vtanh.f32 %v8066_v35  ;;  %v3109_v62 = vmul.f32 %v3101_v45, %v7548_v30 }
 0x4c5   : > { %v4899_v39 = vpop.eup %4898  ;;  %v3108_v52 = vmul.f32 %v3100_v1, %v7540_v26  ;;  %v4447_v22 = vpack.c.bf16 %v3101_v45, %v3100_v1  ;;  %v3103_v25 = vmul.f32 %v4897_v54, %v4895_v6  ;;  %v5055_v6 = vld [vmem:[%s8295_s1 + $0x28] sm:$0xff]  ;;  %v5056_v1 = vld [vmem:[%s8295_s1 + $0x30] sm:$0xff] }
 0x4c6   : > { %v4901_v21 = vpop.eup %4900 }
 0x4c7   : > { %v4903_v37 = vpop.eup %4902  ;;  %v3116_v59 = vadd.f32 %v3109_v62, %v3108_v52  ;;  %4448 = vmatprep.subr.bf16.mxu0 %v4447_v22  ;;  %v3111_v29 = vmul.f32 %v3103_v25, %v7556_v5  ;;  %v5057_v62 = vld [vmem:[%s8295_s1 + $0x38] sm:$0xff]  ;;  %v5059_v52 = vld [vmem:[%s8295_s1 + $0x48] sm:$0xff] }
 0x4c8   : > { %v4905_v31 = vpop.eup %4904  ;;  %4450 = vmatpush3.bf16.msra.mxu0 %v4447_v22  ;;  %v5060_v22 = vld [vmem:[%s8295_s1 + $0x50] sm:$0xff] }
 0x4c9   : > { %v4907_v19 = vpop.eup %4906  ;;  %v3102_v10 = vmul.f32 %v4905_v31, %v4899_v39  ;;  %v5058_v39 = vld [vmem:[%s8295_s1 + $0x40] sm:$0xff]  ;;  %v5065_v31 = vld [vmem:[%s8295_s1 + $0x78] sm:$0xff] }
 0x4ca   : > { %v4909_v13 = vpop.eup %4908  ;;  %v3105_v33 = vmul.f32 %v4907_v19, %v4901_v21  ;;  %v5061_v21 = vld [vmem:[%s8295_s1 + $0x58] sm:$0xff]  ;;  %v5066_v19 = vld [vmem:[%s8295_s1 + $0x88] sm:$0xff] }
 0x4cb   : > { %v4911_v12 = vpop.eup %4910  ;;  %v3110_v7 = vmul.f32 %v3102_v10, %v7546_v4  ;;  %v4451_v27 = vpack.c.bf16 %v3103_v25, %v3102_v10  ;;  %v5064_v25 = vld [vmem:[%s8295_s1 + $0x70] sm:$0xff] }
 0x4cc   : > { %v4913_v34 = vpop.eup %4912  ;;  %v3113_v58 = vmul.f32 %v3105_v33, %v7563_v24  ;;  %v5067_v10 = vld [vmem:[%s8295_s1 + $0x90] sm:$0xff] }
 0x4cd   : > { %v4915_v0 = vpop.eup %4914  ;;  %v3117_v38 = vadd.f32 %v3116_v59, %v3110_v7  ;;  %4452 = vmatprep.subr.bf16.mxu0 %v4451_v27  ;;  %v3104_v56 = vmul.f32 %v4913_v34, %v4903_v37  ;;  %v5062_v37 = vld [vmem:[%s8295_s1 + $0x60] sm:$0xff]  ;;  %v5063_v59 = vld [vmem:[%s8295_s1 + $0x68] sm:$0xff]  ;;  %v5071_v7 = vld [vmem:[%s8295_s1 + $0xb0] sm:$0xff] }
 0x4ce   : > { %v4917_v2 = vpop.eup %4916  ;;  %4454 = vmatpush3.bf16.msra.mxu0 %v4451_v27  ;;  %v3107_v23 = vmul.f32 %v4915_v0, %v4909_v13  ;;  %v5068_v13 = vld [vmem:[%s8295_s1 + $0x98] sm:$0xff]  ;;  %v5074_v34 = vld [vmem:[%s8295_s1 + $0xc8] sm:$0xff]  ;;  %v5075_v0 = vld [vmem:[%s8295_s1 + $0xd0] sm:$0xff] }
 0x4cf   : > { %v3118_v50 = vadd.f32 %v3117_v38, %v3111_v29  ;;  %v3112_v61 = vmul.f32 %v3104_v56, %v7560_v9  ;;  %v4455_v55 = vpack.c.bf16 %v3105_v33, %v3104_v56  ;;  %v3106_v48 = vmul.f32 %v4917_v2, %v4911_v12  ;;  %v5070_v12 = vld [vmem:[%s8295_s1 + $0xa8] sm:$0xff]  ;;  %v5072_v27 = vld [vmem:[%s8295_s1 + $0xb8] sm:$0xff]  ;;  %v5073_v33 = vld [vmem:[%s8295_s1 + $0xc0] sm:$0xff] }
 0x4d0   : > { %v3115_v36 = vmul.f32 %v3107_v23, %v7575_v53  ;;  %v5076_v29 = vld [vmem:[%s8295_s1 + $0xd8] sm:$0xff]  ;;  %v5077_v38 = vld [vmem:[%s8295_s1 + $0xe0] sm:$0xff]  ;;  %v5078_v56 = vld [vmem:[%s8295_s1 + $0xe8] sm:$0xff] }
 0x4d1   : > { %v3119_v46 = vadd.f32 %v3118_v50, %v3112_v61  ;;  %4456 = vmatprep.subr.bf16.mxu0 %v4455_v55  ;;  %v3114_v3 = vmul.f32 %v3106_v48, %v7572_v63  ;;  %v4459_v49 = vpack.c.bf16 %v3107_v23, %v3106_v48  ;;  %v5079_v2 = vld [vmem:[%s8295_s1 + $0xf0] sm:$0xff]  ;;  %v5080_v23 = vld [vmem:[%s8295_s1 + $0xf8] sm:$0xff]  ;;  %v8863_v61 = vld [vmem:[#allocation119_spill] sm:$0xff] }
 0x4d2   : > { %4458 = vmatpush3.bf16.msra.mxu0 %v4455_v55 }
 0x4d3   : > { %v3120_v8 = vadd.f32 %v3119_v46, %v3113_v58  ;;  %4460 = vmatprep.subr.bf16.mxu0 %v4459_v49  ;;  %v8864_v58 = vld [vmem:[#allocation120_spill] sm:$0xff] }
 0x4d5   : > { %v3121_v42 = vadd.f32 %v3120_v8, %v3114_v3 }
 0x4d6   : > { %4462 = vmatpush3.bf16.msra.mxu0 %v4459_v49  ;;  %v8865_v49 = vld [vmem:[#allocation123_spill] sm:$0xff] }
 0x4d7   : > { %v3122_v47 = vadd.f32 %v3121_v42, %v3115_v36  ;;  %v8866_v42 = vld [vmem:[#allocation45_spill] sm:$0xff] }
 0x4d9   : > { %v3123_v17 = vrot.slane %v3122_v47, 4  ;;  %4368 = vmatmul.mubr.msk.f32.vlgmr.msra.gmra.mrb[16].mxu0 %vm1948_vm0, %v5051_v18 }
 0x4da   : > { %4370 = vmatprep.mubr.msk.f32.mxu0 %vm1948_vm0, %v5052_v20  ;;  %v8867_v20 = vld [vmem:[#allocation136_spill] sm:$0xff] }
 0x4db   : > { %v3124_v28 = vadd.f32 %v3123_v17, %v3122_v47 }
 0x4dd   : > { %v3125_v15 = vrot.slane %v3124_v28, 2  ;;  %4371 = vmatmul.mubr.msk.f32.gmra.mrb[18].mxu0 %vm1948_vm0, %v5053_v40  ;;  %v8868_v40 = vld [vmem:[#allocation51_spill] sm:$0xff] }
 0x4de   : > { %4373 = vmatprep.mubr.msk.f32.mxu0 %vm1948_vm0, %v5054_v57 }
 0x4df   : > { %v3126_v44 = vadd.f32 %v3125_v15, %v3124_v28 }
 0x4e1   : > { %v3127_v45 = vrot.slane %v3126_v44, 1  ;;  %4374 = vmatmul.mubr.msk.f32.gmra.mrb[20].mxu0 %vm1948_vm0, %v5055_v6  ;;  %v8869_v6 = vld [vmem:[#allocation145_spill] sm:$0xff] }
 0x4e2   : > { %4376 = vmatprep.mubr.msk.f32.mxu0 %vm1948_vm0, %v5056_v1 }
 0x4e3   : > { %v3128_v54 = vadd.f32 %v3127_v45, %v3126_v44 }
 0x4e5   : > { %4041 = vst [vmem:[%s7674_s29 + $0x2] sm:$0x1] %v3128_v54  ;;  %4377 = vmatmul.mubr.msk.f32.gmra.mrb[22].mxu0 %vm1948_vm0, %v5057_v62 }
 0x4e6   : > { %4379 = vmatprep.mubr.msk.f32.mxu0 %vm1948_vm0, %v5058_v39  ;;  %v8870_v39 = vld [vmem:[#allocation56_spill] sm:$0xff] }
 0x4e9   : > { %4380 = vmatmul.mubr.msk.f32.gmra.mrb[24].mxu0 %vm1948_vm0, %v5059_v52 }
 0x4ea   : > { %4382 = vmatprep.mubr.msk.f32.mxu0 %vm1948_vm0, %v5060_v22 }
 0x4ed   : > { %4383 = vmatmul.mubr.msk.f32.gmra.mrb[26].mxu0 %vm1948_vm0, %v5061_v21 }
 0x4ee   : > { %4385 = vmatprep.mubr.msk.f32.mxu0 %vm1948_vm0, %v5062_v37 }
 0x4f1   : > { %4386 = vmatmul.mubr.msk.f32.gmra.mrb[28].mxu0 %vm1948_vm0, %v5063_v59 }
 0x4f2   : > { %4388 = vmatprep.mubr.msk.f32.mxu0 %vm1948_vm0, %v5064_v25  ;;  %v8871_v25 = vld [vmem:[#allocation40_spill] sm:$0xff] }
 0x4f5   : > { %4389 = vmatmul.mubr.msk.f32.gmra.mrb[30].mxu0 %vm1948_vm0, %v5065_v31 }
 0x4f6   : > { %4391 = vmatprep.mubr.msk.f32.mxu0 %vm1948_vm0, %v7948_v60  ;;  %v5069_v60 = vld [vmem:[%s8295_s1 + $0xa0] sm:$0xff] }
 0x4f9   : > { %4392 = vmatmul.mubr.msk.f32.gmra.mrb[32].mxu0 %vm1948_vm0, %v5066_v19 }
 0x4fa   : > { %4394 = vmatprep.mubr.msk.f32.mxu0 %vm1948_vm0, %v5067_v10 }
 0x4fd   : > { %4395 = vmatmul.mubr.msk.f32.gmra.mrb[34].mxu0 %vm1948_vm0, %v5068_v13  ;;  %v8872_v13 = vld [vmem:[#allocation124_spill] sm:$0xff] }
 0x4fe   : > { %4397 = vmatprep.mubr.msk.f32.mxu0 %vm1948_vm0, %v5069_v60 }
 0x501   : > { %4398 = vmatmul.mubr.msk.f32.gmra.mrb[36].mxu0 %vm1948_vm0, %v5070_v12 }
 0x502   : > { %4400 = vmatprep.mubr.msk.f32.mxu0 %vm1948_vm0, %v5071_v7 }
 0x505   : > { %4401 = vmatmul.mubr.msk.f32.gmra.mrb[38].mxu0 %vm1948_vm0, %v5072_v27 }
 0x506   : > { %4403 = vmatprep.mubr.msk.f32.mxu0 %vm1948_vm0, %v5073_v33  ;;  %v8873_v33 = vld [vmem:[#allocation50_spill] sm:$0xff] }
 0x509   : > { %4404 = vmatmul.mubr.msk.f32.gmra.mrb[40].mxu0 %vm1948_vm0, %v5074_v34 }
 0x50a   : > { %4406 = vmatprep.mubr.msk.f32.mxu0 %vm1948_vm0, %v5075_v0 }
 0x50d   : > { %4407 = vmatmul.mubr.msk.f32.gmra.mrb[42].mxu0 %vm1948_vm0, %v5076_v29  ;;  %v8874_v29 = vld [vmem:[#allocation66_spill] sm:$0xff] }
 0x50e   : > { %4409 = vmatprep.mubr.msk.f32.mxu0 %vm1948_vm0, %v5077_v38 }
 0x511   : > { %4410 = vmatmul.mubr.msk.f32.gmra.mrb[44].mxu0 %vm1948_vm0, %v5078_v56 }
 0x512   : > { %4412 = vmatprep.mubr.msk.f32.mxu0 %vm1948_vm0, %v5079_v2 }
 0x515   : > { %4413 = vmatmul.mubr.msk.f32.gmra.mrb[46].mxu0 %vm1948_vm0, %v5080_v23 }
 0x5ac   : > { %v4369_v50 = vpop.f32.mrb[16].mxu0 }
 0x5ad   : > { %v3409_v55 = vadd.f32 %v4369_v50, %v8863_v61  ;;  %v3403_v48 = vpop.f32.mrb[17].mxu0  ;;  %v8875_v61 = vld [vmem:[#allocation82_spill] sm:$0xff] }
 0x5ae   : > { %v3404_v46 = vadd.f32 %v3403_v48, %v8864_v58 }
 0x5af   : > { %v4076_v18 = vmul.f32 -1.442695, %v3409_v55 }
 0x5b0   : > { %v4372_v3 = vpop.f32.mrb[18].mxu0  ;;  %v4075_v44 = vmul.f32 -1.442695, %v3404_v46 }
 0x5b1   : > { %v3419_v8 = vadd.f32 %v4372_v3, %v8865_v49  ;;  %v3413_v36 = vpop.f32.mrb[19].mxu0  ;;  %4918 = vpow2.f32 %v4076_v18  ;;  %v8876_v3 = vld [vmem:[#allocation142_spill] sm:$0xff] }
 0x5b2   : > { %v3414_v47 = vadd.f32 %v3413_v36, %v8866_v42  ;;  %4920 = vpow2.f32 %v4075_v44  ;;  %v8878_v44 = vld [vmem:[#allocation148_spill] sm:$0xff] }
 0x5b3   : > { %v4078_v62 = vmul.f32 -1.442695, %v3419_v8 }
 0x5b4   : > { %v4375_v17 = vpop.f32.mrb[20].mxu0  ;;  %v4077_v22 = vmul.f32 -1.442695, %v3414_v47 }
 0x5b5   : > { %v3429_v28 = vadd.f32 %v4375_v17, %v8867_v20  ;;  %v3423_v15 = vpop.f32.mrb[21].mxu0  ;;  %4922 = vpow2.f32 %v4078_v62  ;;  %v8877_v20 = vld [vmem:[#allocation59_spill] sm:$0xff] }
 0x5b6   : > { %v3424_v57 = vadd.f32 %v3423_v15, %v8868_v40  ;;  %4924 = vpow2.f32 %v4077_v22 }
 0x5b7   : > { %v4080_v21 = vmul.f32 -1.442695, %v3429_v28 }
 0x5b8   : > { %v4378_v45 = vpop.f32.mrb[22].mxu0  ;;  %v4079_v59 = vmul.f32 -1.442695, %v3424_v57 }
 0x5b9   : > { %v3439_v1 = vadd.f32 %v4378_v45, %v8869_v6  ;;  %v3433_v54 = vpop.f32.mrb[23].mxu0  ;;  %4926 = vpow2.f32 %v4080_v21  ;;  %v8879_v21 = vld [vmem:[#allocation8_spill] sm:$0xff] }
 0x5ba   : > { %v3434_v52 = vadd.f32 %v3433_v54, %v8870_v39  ;;  %4928 = vpow2.f32 %v4079_v59 }
 0x5bb   : > { %v4082_v10 = vmul.f32 -1.442695, %v3439_v1  ;;  %v4919_v56 = vpop.eup %4918 }
 0x5bc   : > { %v4381_v37 = vpop.f32.mrb[24].mxu0  ;;  %v4081_v12 = vmul.f32 -1.442695, %v3434_v52  ;;  %v4921_v58 = vpop.eup %4920  ;;  %v3635_v46 = vadd.f32 1.0, %v4919_v56  ;;  %v8882_v56 = vld [vmem:[#allocation36_spill] sm:$0xff] }
 0x5bd   : > { %v3449_v31 = vadd.f32 %v4381_v37, %v8871_v25  ;;  %v3443_v19 = vpop.f32.mrb[25].mxu0  ;;  %4930 = vpow2.f32 %v4082_v10  ;;  %v3634_v18 = vadd.f32 1.0, %v4921_v58 }
 0x5be   : > { %v3444_v60 = vadd.f32 %v3443_v19, %v8872_v13  ;;  %4932 = vpow2.f32 %v4081_v12 }
 0x5bf   : > { %v4084_v27 = vmul.f32 -1.442695, %v3449_v31  ;;  %v4923_v36 = vpop.eup %4922  ;;  %v8880_v31 = vld [vmem:[#allocation75_spill] sm:$0xff] }
 0x5c0   : > { %v4384_v7 = vpop.f32.mrb[26].mxu0  ;;  %v4083_v2 = vmul.f32 -1.442695, %v3444_v60  ;;  %v4925_v17 = vpop.eup %4924  ;;  %v3637_v1 = vadd.f32 1.0, %v4923_v36 }
 0x5c1   : > { %v3459_v34 = vadd.f32 %v4384_v7, %v8873_v33  ;;  %v3453_v0 = vpop.f32.mrb[27].mxu0  ;;  %4934 = vpow2.f32 %v4084_v27  ;;  %v3636_v62 = vadd.f32 1.0, %v4925_v17  ;;  %v8881_v33 = vld [vmem:[#allocation42_spill] sm:$0xff] }
 0x5c2   : > { %v3454_v38 = vadd.f32 %v3453_v0, %v8874_v29  ;;  %4936 = vpow2.f32 %v4083_v2 }
 0x5c3   : > { %v4086_v23 = vmul.f32 -1.442695, %v3459_v34  ;;  %v4927_v40 = vpop.eup %4926 }
 0x5c4   : > { %v4387_v50 = vpop.f32.mrb[28].mxu0  ;;  %v4085_v8 = vmul.f32 -1.442695, %v3454_v38  ;;  %v4929_v6 = vpop.eup %4928  ;;  %v3639_v22 = vadd.f32 1.0, %v4927_v40 }
 0x5c5   : > { %v3469_v55 = vadd.f32 %v4387_v50, %v8875_v61  ;;  %v3463_v48 = vpop.f32.mrb[29].mxu0  ;;  %4938 = vpow2.f32 %v4086_v23  ;;  %v3638_v25 = vadd.f32 1.0, %v4929_v6 }
 0x5c6   : > { %v3464_v49 = vadd.f32 %v3463_v48, %v8876_v3  ;;  %4940 = vrcp.f32 %v3635_v46  ;;  %v8883_v46 = vld [vmem:[#allocation149_spill] sm:$0xff] }
 0x5c7   : > { %v4088_v42 = vmul.f32 -1.442695, %v3469_v55  ;;  %4942 = vpow2.f32 %v4085_v8  ;;  %v4931_v54 = vpop.eup %4930 }
 0x5c8   : > { %v4390_v47 = vpop.f32.mrb[30].mxu0  ;;  %v4087_v57 = vmul.f32 -1.442695, %v3464_v49  ;;  %v4933_v52 = vpop.eup %4932  ;;  %v3641_v13 = vadd.f32 1.0, %v4931_v54 }
 0x5c9   : > { %v3479_v28 = vadd.f32 %v4390_v47, %v8877_v20  ;;  %v3473_v15 = vpop.f32.mrb[31].mxu0  ;;  %4944 = vpow2.f32 %v4088_v42  ;;  %v3640_v60 = vadd.f32 1.0, %v4933_v52  ;;  %v8884_v42 = vld [vmem:[#allocation74_spill] sm:$0xff] }
 0x5ca   : > { %v3474_v45 = vadd.f32 %v3473_v15, %v8878_v44  ;;  %4946 = vrcp.f32 %v3634_v18  ;;  %v8885_v44 = vld [vmem:[#allocation5_spill] sm:$0xff] }
 0x5cb   : > { %4948 = vpow2.f32 %v4087_v57  ;;  %v4935_v10 = vpop.eup %4934  ;;  %v4090_v27 = vmul.f32 -1.442695, %v3479_v28 }
 0x5cc   : > { %v4393_v39 = vpop.f32.mrb[32].mxu0  ;;  %4950 = vrcp.f32 %v3637_v1  ;;  %v4937_v7 = vpop.eup %4936  ;;  %v3643_v38 = vadd.f32 1.0, %v4935_v10  ;;  %v4089_v23 = vmul.f32 -1.442695, %v3474_v45 }
 0x5cd   : > { %v3489_v37 = vadd.f32 %v4393_v39, %v8879_v21  ;;  %v3483_v59 = vpop.f32.mrb[33].mxu0  ;;  %4952 = vrcp.f32 %v3636_v62  ;;  %v3642_v61 = vadd.f32 1.0, %v4937_v7  ;;  %v8886_v62 = vld [vmem:[#allocation152_spill] sm:$0xff] }
 0x5ce   : > { %v3484_v19 = vadd.f32 %v3483_v59, %v8880_v31  ;;  %4954 = vrcp.f32 %v3639_v22 }
 0x5cf   : > { %v4939_v29 = vpop.eup %4938  ;;  %4956 = vrcp.f32 %v3638_v25  ;;  %v4092_v36 = vmul.f32 -1.442695, %v3489_v37 }
 0x5d0   : > { %v4396_v12 = vpop.f32.mrb[34].mxu0  ;;  %4958 = vrcp.f32 %v3641_v13  ;;  %v8221_v50 = vpop.eup %4940  ;;  %v3645_v58 = vadd.f32 1.0, %v4939_v29  ;;  %v4091_v18 = vmul.f32 -1.442695, %v3484_v19  ;;  %v8887_v19 = vld [vmem:[#allocation86_spill] sm:$0xff] }
 0x5d1   : > { %v3499_v34 = vadd.f32 %v4396_v12, %v8881_v33  ;;  %v3493_v0 = vpop.f32.mrb[35].mxu0  ;;  %4960 = vrcp.f32 %v3640_v60  ;;  %v4943_v48 = vpop.eup %4942  ;;  %v8888_v12 = vld [vmem:[#allocation18_spill] sm:$0xff] }
 0x5d2   : > { %v3494_v2 = vadd.f32 %v3493_v0, %v8882_v56  ;;  %4962 = vpow2.f32 %v4090_v27  ;;  %v3644_v28 = vadd.f32 1.0, %v4943_v48 }
 0x5d3   : > { %v4945_v8 = vpop.eup %4944  ;;  %4964 = vrcp.f32 %v3643_v38  ;;  %v4094_v54 = vmul.f32 -1.442695, %v3499_v34  ;;  %v8889_v38 = vld [vmem:[#allocation25_spill] sm:$0xff] }
 0x5d4   : > { %v4399_v55 = vpop.f32.mrb[36].mxu0  ;;  %v8225_v17 = vpop.eup %4946  ;;  %4966 = vpow2.f32 %v4089_v23  ;;  %v3647_v57 = vadd.f32 1.0, %v4945_v8  ;;  %v4093_v37 = vmul.f32 -1.442695, %v3494_v2 }
 0x5d5   : > { %v3509_v3 = vadd.f32 %v4399_v55, %v8883_v46  ;;  %v3503_v49 = vpop.f32.mrb[37].mxu0  ;;  %v4949_v20 = vpop.eup %4948  ;;  %4968 = vrcp.f32 %v3642_v61  ;;  %v8890_v55 = vld [vmem:[#allocation90_spill] sm:$0xff] }
 0x5d6   : > { %v3504_v47 = vadd.f32 %v3503_v49, %v8884_v42  ;;  %v8227_v40 = vpop.eup %4950  ;;  %4970 = vrcp.f32 %v3645_v58  ;;  %v3646_v22 = vadd.f32 1.0, %v4949_v20  ;;  %v8891_v42 = vld [vmem:[#allocation61_spill] sm:$0xff] }
 0x5d7   : > { %v8230_v1 = vpop.eup %4952  ;;  %4972 = vpow2.f32 %v4092_v36  ;;  %v4096_v31 = vmul.f32 -1.442695, %v3509_v3 }
 0x5d8   : > { %v4402_v15 = vpop.f32.mrb[38].mxu0  ;;  %v8233_v52 = vpop.eup %4954  ;;  %4974 = vpow2.f32 %v4091_v18  ;;  %v4095_v34 = vmul.f32 -1.442695, %v3504_v47 }
 0x5d9   : > { %v3519_v45 = vadd.f32 %v4402_v15, %v8885_v44  ;;  %v3513_v6 = vpop.f32.mrb[39].mxu0  ;;  %v8235_v21 = vpop.eup %4956  ;;  %4976 = vrcp.f32 %v3644_v28  ;;  %v8892_v28 = vld [vmem:[#allocation141_spill] sm:$0xff] }
 0x5da   : > { %v3514_v39 = vadd.f32 %v3513_v6, %v8886_v62  ;;  %v8237_v25 = vpop.eup %4958  ;;  %4978 = vrcp.f32 %v3647_v57 }
 0x5db   : > { %v8240_v60 = vpop.eup %4960  ;;  %4980 = vpow2.f32 %v4094_v54  ;;  %v4098_v46 = vmul.f32 -1.442695, %v3519_v45 }
 0x5dc   : > { %v4405_v59 = vpop.f32.mrb[40].mxu0  ;;  %v4963_v27 = vpop.eup %4962  ;;  %4982 = vrcp.f32 %v3646_v22  ;;  %v4097_v49 = vmul.f32 -1.442695, %v3514_v39  ;;  %v8893_v39 = vld [vmem:[#allocation67_spill] sm:$0xff] }
 0x5dd   : > { %v3529_v10 = vadd.f32 %v4405_v59, %v8887_v19  ;;  %v3523_v13 = vpop.f32.mrb[41].mxu0  ;;  %v4965_v33 = vpop.eup %4964  ;;  %4984 = vpow2.f32 %v4093_v37  ;;  %v3649_v61 = vadd.f32 1.0, %v4963_v27 }
 0x5de   : > { %v3524_v7 = vadd.f32 %v3523_v13, %v8888_v12  ;;  %v4967_v29 = vpop.eup %4966  ;;  %4986 = vpow2.f32 %v4096_v31  ;;  %v8894_v31 = vld [vmem:[#allocation162_spill] sm:$0xff]  ;;  %v3715_v27 = vmul.f32 %v4965_v33, %v8034_v11 }
 0x5df   : > { %v4969_v23 = vpop.eup %4968  ;;  %4988 = vtanh.f32 %v3529_v10  ;;  %v3648_v44 = vadd.f32 1.0, %v4967_v29 }
 0x5e0   : > { %v4408_v0 = vpop.f32.mrb[42].mxu0  ;;  %v4971_v58 = vpop.eup %4970  ;;  %4990 = vtanh.f32 %v3524_v7  ;;  %v3714_v29 = vmul.f32 %v4969_v23, %v8037_v43 }
 0x5e1   : > { %v3539_v56 = vadd.f32 %v4408_v0, %v8889_v38  ;;  %v3533_v2 = vpop.f32.mrb[43].mxu0  ;;  %v4973_v3 = vpop.eup %4972  ;;  %4992 = vpow2.f32 %v4095_v34 }
 0x5e2   : > { %v3534_v48 = vadd.f32 %v3533_v2, %v8890_v55  ;;  %v4975_v36 = vpop.eup %4974  ;;  %v3651_v54 = vadd.f32 1.0, %v4973_v3 }
 0x5e3   : > { %4994 = vtanh.f32 %v3539_v56  ;;  %v4977_v20 = vpop.eup %4976  ;;  %v3650_v12 = vadd.f32 1.0, %v4975_v36 }
 0x5e4   : > { %v4411_v8 = vpop.f32.mrb[44].mxu0  ;;  %4996 = vrcp.f32 %v3649_v61  ;;  %v4979_v57 = vpop.eup %4978  ;;  %v3716_v36 = vmul.f32 %v4977_v20, %v8049_v32 }
 0x5e5   : > { %v3549_v47 = vadd.f32 %v4411_v8, %v8891_v42  ;;  %v3543_v18 = vpop.f32.mrb[45].mxu0  ;;  %4998 = vpow2.f32 %v4098_v46  ;;  %v4981_v6 = vpop.eup %4980  ;;  %v3719_v42 = vmul.f32 %v4979_v57, %v8051_v41 }
 0x5e6   : > { %v3544_v15 = vadd.f32 %v3543_v18, %v8892_v28  ;;  %5000 = vpow2.f32 %v4097_v49  ;;  %v4983_v62 = vpop.eup %4982  ;;  %v3653_v2 = vadd.f32 1.0, %v4981_v6 }
 0x5e7   : > { %5002 = vtanh.f32 %v3534_v48  ;;  %v4985_v59 = vpop.eup %4984  ;;  %v3717_v48 = vmul.f32 %v4971_v58, %v8042_v16  ;;  %v3718_v32 = vmul.f32 %v4983_v62, %v8060_v51 }
 0x5e8   : > { %v4414_v45 = vpop.f32.mrb[46].mxu0  ;;  %5004 = vtanh.f32 %v3549_v47  ;;  %v4987_v10 = vpop.eup %4986 }
 0x5e9   : > { %v3559_v22 = vadd.f32 %v4414_v45, %v8893_v39  ;;  %v3553_v37 = vpop.f32.mrb[47].mxu0  ;;  %5006 = vrcp.f32 %v3648_v44  ;;  %v4989_v13 = vpop.eup %4988  ;;  %v3655_v49 = vadd.f32 1.0, %v4987_v10 }
 0x5ea   : > { %v3554_v19 = vadd.f32 %v3553_v37, %v8894_v31  ;;  %5008 = vrcp.f32 %v3651_v54  ;;  %v4991_v7 = vpop.eup %4990  ;;  %v3723_v34 = vmul.f32 %v4989_v13, %v8221_v50  ;;  %v3652_v50 = vadd.f32 1.0, %v4985_v59 }
 0x5eb   : > { %5010 = vtanh.f32 %v3544_v15  ;;  %v4993_v0 = vpop.eup %4992  ;;  %v3722_v38 = vmul.f32 %v4991_v7, %v8225_v17 }
 0x5ec   : > { %5012 = vtanh.f32 %v3559_v22  ;;  %v3731_v61 = vadd.f32 %v3723_v34, %v3715_v27  ;;  %v3654_v23 = vadd.f32 1.0, %v4993_v0 }
 0x5ed   : > { %v4995_v56 = vpop.eup %4994  ;;  %5014 = vtanh.f32 %v3554_v19  ;;  %v3730_v46 = vadd.f32 %v3722_v38, %v3714_v29 }
 0x5ee   : > { %v4997_v55 = vpop.eup %4996  ;;  %5016 = vrcp.f32 %v3650_v12  ;;  %v3725_v11 = vmul.f32 %v4995_v56, %v8227_v40 }
 0x5ef   : > { %v4999_v33 = vpop.eup %4998  ;;  %5018 = vtanh.f32 %v3731_v61  ;;  %v3721_v41 = vmul.f32 %v4997_v55, %v8063_v14 }
 0x5f0   : > { %v5001_v3 = vpop.eup %5000  ;;  %5020 = vtanh.f32 %v3730_v46  ;;  %v3733_v43 = vadd.f32 %v3725_v11, %v3717_v48  ;;  %v3657_v18 = vadd.f32 1.0, %v4999_v33 }
 0x5f1   : > { %v5003_v17 = vpop.eup %5002  ;;  %5022 = vrcp.f32 %v3653_v2  ;;  %v3656_v44 = vadd.f32 1.0, %v5001_v3 }
 0x5f2   : > { %v5005_v8 = vpop.eup %5004  ;;  %5024 = vtanh.f32 %v3733_v43  ;;  %v3724_v16 = vmul.f32 %v5003_v17, %v8230_v1 }
 0x5f3   : > { %v5007_v58 = vpop.eup %5006  ;;  %5026 = vrcp.f32 %v3652_v50  ;;  %v3727_v40 = vmul.f32 %v5005_v8, %v8233_v52 }
 0x5f4   : > { %v5009_v47 = vpop.eup %5008  ;;  %5028 = vrcp.f32 %v3655_v49  ;;  %v3732_v28 = vadd.f32 %v3724_v16, %v3716_v36  ;;  %v3720_v45 = vmul.f32 %v5007_v58, %v8066_v35 }
 0x5f5   : > { %v5011_v15 = vpop.eup %5010  ;;  %5030 = vrcp.f32 %v3654_v23  ;;  %v3735_v6 = vadd.f32 %v3727_v40, %v3719_v42 }
 0x5f6   : > { %v5013_v54 = vpop.eup %5012  ;;  %5032 = vtanh.f32 %v3732_v28  ;;  %v3726_v1 = vmul.f32 %v5011_v15, %v8235_v21 }
 0x5f7   : > { %v5015_v20 = vpop.eup %5014  ;;  %5034 = vtanh.f32 %v3735_v6  ;;  %v3729_v52 = vmul.f32 %v5013_v54, %v8237_v25 }
 0x5f8   : > { %v5017_v57 = vpop.eup %5016  ;;  %5036 = vrcp.f32 %v3657_v18  ;;  %v3734_v39 = vadd.f32 %v3726_v1, %v3718_v32  ;;  %v3728_v22 = vmul.f32 %v5015_v20, %v8240_v60 }
 0x5f9   : > { %v5019_v37 = vpop.eup %5018  ;;  %5038 = vrcp.f32 %v3656_v44  ;;  %v3737_v59 = vadd.f32 %v3729_v52, %v3721_v41 }
 0x5fa   : > { %v5021_v51 = vpop.eup %5020  ;;  %v3747_v62 = vmul.f32 %v5019_v37, %v5009_v47  ;;  %5040 = vtanh.f32 %v3734_v39  ;;  %v3736_v21 = vadd.f32 %v3728_v22, %v3720_v45 }
 0x5fb   : > { %v5023_v31 = vpop.eup %5022  ;;  %v3746_v19 = vmul.f32 %v5021_v51, %v5017_v57  ;;  %5042 = vtanh.f32 %v3737_v59 }
 0x5fc   : > { %v5025_v14 = vpop.eup %5024  ;;  %v3755_v25 = vmul.f32 %v3747_v62, %v7548_v30  ;;  %5044 = vtanh.f32 %v3736_v21 }
 0x5fd   : > { %v5027_v10 = vpop.eup %5026  ;;  %v3754_v35 = vmul.f32 %v3746_v19, %v7540_v26  ;;  %v3749_v13 = vmul.f32 %v5025_v14, %v5023_v31 }
 0x5fe   : > { %v5029_v12 = vpop.eup %5028 }
 0x5ff   : > { %v5031_v60 = vpop.eup %5030  ;;  %v3762_v7 = vadd.f32 %v3755_v25, %v3754_v35  ;;  %v3757_v30 = vmul.f32 %v3749_v13, %v7556_v5 }
 0x600   : > { %v5033_v27 = vpop.eup %5032 }
 0x601   : > { %v5035_v34 = vpop.eup %5034  ;;  %v3748_v0 = vmul.f32 %v5033_v27, %v5027_v10 }
 0x602   : > { %v5037_v29 = vpop.eup %5036  ;;  %v3751_v38 = vmul.f32 %v5035_v34, %v5029_v12 }
 0x603   : > { %v5039_v56 = vpop.eup %5038  ;;  %v3756_v2 = vmul.f32 %v3748_v0, %v7546_v4 }
 0x604   : > { %v5041_v61 = vpop.eup %5040  ;;  %v3759_v49 = vmul.f32 %v3751_v38, %v7563_v24  ;;  %v3802_v24 = vld [vmem:[%s7674_s29 + $0x1] sm:$0x1] (%p5179_p5) }
 0x605   : > { %v5043_v55 = vpop.eup %5042  ;;  %v3763_v48 = vadd.f32 %v3762_v7, %v3756_v2  ;;  %v3750_v46 = vmul.f32 %v5041_v61, %v5031_v60  ;;  %3803 = vst [vmem:[%s3784_s17 + $0x2] sm:$0x1] (%p5179_p5), %v3802_v24 }
 0x606   : > { %v5045_v11 = vpop.eup %5044  ;;  %v3753_v26 = vmul.f32 %v5043_v55, %v5037_v29 }
 0x607   : > { %v3758_v33 = vmul.f32 %v3750_v46, %v7560_v9  ;;  %v3764_v50 = vadd.f32 %v3763_v48, %v3757_v30  ;;  %v3752_v3 = vmul.f32 %v5045_v11, %v5039_v56  ;;  %v3800_v9 = vld [vmem:[%s7674_s29] sm:$0x1] (%p5179_p5) }
 0x608   : > { %v3761_v4 = vmul.f32 %v3753_v26, %v7575_v53  ;;  %3801 = vst [vmem:[%s3784_s17] sm:$0x1] (%p5179_p5), %v3800_v9 }
 0x609   : > { %v3765_v43 = vadd.f32 %v3764_v50, %v3758_v33  ;;  %v3760_v17 = vmul.f32 %v3752_v3, %v7572_v63  ;;  %v3804_v63 = vld [vmem:[%s7674_s29 + $0x2] sm:$0x1] (%p5179_p5) }
 0x60a   : > { %3805 = vst [vmem:[%s3784_s17 + $0x4] sm:$0x1] (%p5179_p5), %v3804_v63 }
 0x60b   : > { %v3766_v23 = vadd.f32 %v3765_v43, %v3759_v49 }
 0x60d   : > { %v3767_v8 = vadd.f32 %v3766_v23, %v3760_v17 }
 0x60f   : > { %v3768_v36 = vadd.f32 %v3767_v8, %v3761_v4 }
 0x611   : > { %v3769_v5 = vrot.slane %v3768_v36, 4 }
 0x613   : > { %v3770_v16 = vadd.f32 %v3769_v5, %v3768_v36 }
 0x615   : > { %v3771_v58 = vrot.slane %v3770_v16, 2 }
 0x617   : > { %v3772_v42 = vadd.f32 %v3771_v58, %v3770_v16  ;;  %3783 = sbr.rel (!%p5179_p5) target bundleno = 1574 (0x626), region = 93 }
 0x619   : > { %v3773_v40 = vrot.slane %v3772_v42, 1 }
 0x61b   : > { %v3774_v47 = vadd.f32 %v3773_v40, %v3772_v42 }
 0x61d   : > { %4099 = vst [vmem:[%s7674_s29 + $0x3] sm:$0x1] %v3774_v47 }
 0x624   : > { %v3806_v53 = vld [vmem:[%s7674_s29 + $0x3] sm:$0x1] }
 0x625   : > { %3807 = vst [vmem:[%s3784_s17 + $0x6] sm:$0x1] %v3806_v53 }
 0x626 PF: > { %p14_p11 = scmp.ge.s32.totalorder %s5167_s28, 4   ;;  %s8895_s24 = smov %s5099_s25 }
 0x627   : > { %s8896_s25 = smov %s5177_s8  ;;  %s8897_s26 = smov %s5167_s28 }
 0x628   :  { %16 = sbr.rel (!%p14_p11) target bundleno = 2 (0x2), region = 167 }

</bundles_post_ra>
